<compile_context>
chip_gen: v7x
topology: tpu7x:2x2x1
jax: 0.10.0
libtpu: 0.0.40
codegen_flags: <defaults>
</compile_context>

<pallas_src>
import functools
import math

import jax
import jax.numpy as jnp
from jax.experimental import pallas as pl
from jax.experimental.pallas import tpu as pltpu


def _round_up(x, m):
    return ((x + m - 1) // m) * m


def _word_embed_ln_kernel(ids_ref, table_ref, out_ref, *, eps, vc, num_vc):
    # ids_ref   : (TQ, 1) int32 token-id tile (lane-0 column, VMEM).
    # table_ref : (V_pad, H) VMEM-resident embedding table.
    # out_ref   : (TQ, H) output tile (sublane/lane dense).
    ids = ids_ref[...]                                   # (TQ, 1) int32
    tq, h = out_ref.shape

    # MXU one-hot gather, accumulated in f32, chunked over the vocab axis so
    # the one-hot tile stays at (TQ, vc) lanes.
    acc = jnp.zeros((tq, h), jnp.float32)
    for c in range(num_vc):                              # static, fully unrolled
        v_base = c * vc
        lane_v = jax.lax.broadcasted_iota(jnp.int32, (tq, vc), 1) + v_base
        one_hot = (ids == lane_v).astype(table_ref.dtype)
        acc = acc + jnp.dot(
            one_hot,
            table_ref[pl.ds(v_base, vc), :],
            preferred_element_type=jnp.float32,
            precision=jax.lax.Precision.HIGHEST,  # keep f32 table rows exact
        )

    # Non-affine LayerNorm directly on the MXU accumulator (no VMEM scratch
    # round-trip), then a single dense (TQ, H) store.
    mean = jnp.mean(acc, axis=-1, keepdims=True)
    centered = acc - mean
    var = jnp.mean(centered * centered, axis=-1, keepdims=True)
    out_ref[...] = (centered * jax.lax.rsqrt(var + eps)).astype(out_ref.dtype)


def word_embedding_layernorm(input_ids, emb_table, *, eps, tq=256, vocab_chunk=2048):
    """nn.Embedding lookup + LayerNorm(elementwise_affine=False), fused."""
    B, S = input_ids.shape
    V, H = emb_table.shape
    N = B * S

    # Token tile: multiple of 8 sublanes, no larger than the padded token count.
    tq_eff = min(tq, _round_up(N, 8))
    n_pad = _round_up(N, tq_eff)

    # Vocab chunk for the one-hot gather: lane axis, multiple of 128.
    vc = min(_round_up(V, 128), vocab_chunk)
    v_pad = _round_up(V, vc)
    num_vc = v_pad // vc

    table = emb_table
    if v_pad != V:
        # Zero rows: never matched by the one-hot (ids are clamped to < V).
        table = jnp.pad(table, ((0, v_pad - V), (0, 0)))

    # Clamp ids defensively (OOV would otherwise gather an all-zero row);
    # pad with token 0 — padded outputs are sliced away.
    ids = jnp.clip(input_ids.reshape(N).astype(jnp.int32), 0, V - 1)
    if n_pad != N:
        ids = jnp.pad(ids, (0, n_pad - N))
    ids2d = ids.reshape(n_pad, 1)

    # VMEM budget: resident table (x2 for default buffering) + double-buffered
    # output/ids tiles + margin, capped by the chip's physical VMEM minus
    # headroom (no hard 64 MiB clamp on 128 MiB-class chips).
    itemsize = emb_table.dtype.itemsize
    needed = (2 * v_pad * H * itemsize
              + 4 * tq_eff * H * itemsize
              + 4 * tq_eff * 4
              + (4 << 20))
    try:
        vmem_cap = int(pltpu.get_tpu_info().vmem_capacity_bytes)
    except Exception:
        vmem_cap = 64 * 1024 * 1024  # conservative fallback
    vmem_limit = max(min(needed, vmem_cap - (16 << 20)), 32 << 20)

    out = pl.pallas_call(
        functools.partial(_word_embed_ln_kernel, eps=eps, vc=vc, num_vc=num_vc),
        out_shape=jax.ShapeDtypeStruct((n_pad, H), emb_table.dtype),
        grid=(n_pad // tq_eff,),
        in_specs=[
            # Token-id tile, lane-dense enough ((TQ,1), minor dim == full dim).
            pl.BlockSpec((tq_eff, 1), lambda i: (i, 0)),
            # Table DMA'd once and resident across the grid (constant index map).
            pl.BlockSpec((v_pad, H), lambda i: (0, 0)),
        ],
        out_specs=pl.BlockSpec((tq_eff, H), lambda i: (i, 0)),
        compiler_params=pltpu.CompilerParams(
            dimension_semantics=("parallel",),  # tokens independent -> 2-TC sharding
            vmem_limit_bytes=vmem_limit,
        ),
    )(ids2d, table)
    return out[:N].reshape(B, S, H)


def _affine_ln_kernel(x_ref, g_ref, b_ref, out_ref, *, eps):
    x = x_ref[...].astype(jnp.float32)
    mean = jnp.mean(x, axis=-1, keepdims=True)
    centered = x - mean
    var = jnp.mean(centered * centered, axis=-1, keepdims=True)
    normed = centered * jax.lax.rsqrt(var + eps)
    out_ref[...] = (normed * g_ref[...] + b_ref[...]).astype(out_ref.dtype)


def relative_layernorm(rel_emb, gamma, beta, *, eps):
    """LayerNorm (with affine) over the relative-position embedding matrix."""
    R, H = rel_emb.shape
    return pl.pallas_call(
        functools.partial(_affine_ln_kernel, eps=eps),
        out_shape=jax.ShapeDtypeStruct((R, H), rel_emb.dtype),
        grid=(1,),
        in_specs=[
            pl.BlockSpec((R, H), lambda i: (0, 0)),
            pl.BlockSpec((1, H), lambda i: (0, 0)),
            pl.BlockSpec((1, H), lambda i: (0, 0)),
        ],
        out_specs=pl.BlockSpec((R, H), lambda i: (0, 0)),
    )(rel_emb, gamma.reshape(1, H), beta.reshape(1, H))


def embedding_forward(input_ids, word_emb, rel_emb, rel_gamma, rel_beta, *, eps):
    word_embedding = word_embedding_layernorm(input_ids, word_emb, eps=eps)
    # Dropout: identity at inference.
    relative_embeddings = relative_layernorm(rel_emb, rel_gamma, rel_beta, eps=eps)
    return word_embedding, relative_embeddings


if __name__ == "__main__":
    # Small synthetic config consistent with the module.
    vocab_size = 512
    hidden_size = 256
    position_bucket_size = 32
    layer_norm_eps = 1e-7
    B, S = 2, 8

    std = math.sqrt(2.0 / (5.0 * hidden_size))
    key = jax.random.PRNGKey(0)
    k_word, k_rel, k_ids = jax.random.split(key, 3)

    # trunc_normal_(mean=0, std=std, a=-2*std, b=2*std)
    word_emb = std * jax.random.truncated_normal(
        k_word, -2.0, 2.0, (vocab_size, hidden_size), jnp.float32)
    rel_emb = std * jax.random.truncated_normal(
        k_rel, -2.0, 2.0, (2 * position_bucket_size - 1, hidden_size), jnp.float32)
    rel_gamma = jnp.ones((hidden_size,), jnp.float32)   # LayerNorm affine weight
    rel_beta = jnp.zeros((hidden_size,), jnp.float32)   # LayerNorm affine bias

    input_ids = jax.random.randint(k_ids, (B, S), 0, vocab_size, dtype=jnp.int32)

    word_out, rel_out = embedding_forward(
        input_ids, word_emb, rel_emb, rel_gamma, rel_beta, eps=layer_norm_eps)
    jax.block_until_ready((word_out, rel_out))

    # Pure-JAX reference check.
    def _ln(x, eps, g=None, b=None):
        mu = x.mean(-1, keepdims=True)
        var = ((x - mu) ** 2).mean(-1, keepdims=True)
        y = (x - mu) * jax.lax.rsqrt(var + eps)
        if g is not None:
            y = y * g + b
        return y

    ref_word = _ln(word_emb[input_ids], layer_norm_eps)
    ref_rel = _ln(rel_emb, layer_norm_eps, rel_gamma, rel_beta)

    assert word_out.shape == (B, S, hidden_size)
    assert rel_out.shape == (2 * position_bucket_size - 1, hidden_size)
    # Word-path tolerance is set to survive any MXU contract-precision mode
    # for the one-hot gather (HIGHEST requested -> essentially exact); a wrong
    # gather row or broken LN would be off by O(1), far beyond this tolerance.
    assert jnp.allclose(word_out, ref_word, atol=1e-2, rtol=1e-2)
    assert jnp.allclose(rel_out, ref_rel, atol=1e-4, rtol=1e-4)

    print("KERNEL_OK")
</pallas_src>

<mosaic_0001>
module attributes {stable_mosaic.version = 11 : i64} {
  func.func @_word_embed_ln_kernel(%arg0: i32, %arg1: memref<16x1xi32, #tpu.memory_space<vmem>>, %arg2: memref<512x256xf32, #tpu.memory_space<vmem>>, %arg3: memref<16x256xf32, #tpu.memory_space<vmem>>) attributes {dimension_semantics = [#tpu.dimension_semantics<parallel>], iteration_bounds = array<i64: 1>, scalar_prefetch = 0 : i64, scratch_operands = 0 : i64, tpu.core_type = #tpu.core_type<tc>, window_params = [{transform_indices = @transform_0, window_bounds = array<i64: 16, 1>}, {pipeline_mode = #tpu.pipeline_mode<synchronous>, transform_indices = @transform_1, window_bounds = array<i64: 512, 256>}, {transform_indices = @transform_2, window_bounds = array<i64: 16, 256>}]} {
    %c0 = arith.constant 0 : index
    %c0_0 = arith.constant 0 : index
    %0 = vector.load %arg1[%c0, %c0_0] : memref<16x1xi32, #tpu.memory_space<vmem>>, vector<16x1xi32>
    %cst = arith.constant 0.000000e+00 : f32
    %1 = vector.broadcast %cst : f32 to vector<16x256xf32>
    %2 = tpu.iota {dimensions = array<i32: 1>} : vector<16x512xi32>
    %c0_i32 = arith.constant 0 : i32
    %3 = vector.broadcast %c0_i32 : i32 to vector<16x512xi32>
    %4 = arith.addi %2, %3 : vector<16x512xi32>
    %5 = vector.broadcast %0 : vector<16x1xi32> to vector<16x512xi32>
    %6 = arith.cmpi eq, %5, %4 : vector<16x512xi32>
    %7 = arith.extui %6 : vector<16x512xi1> to vector<16x512xi32>
    %8 = arith.sitofp %7 : vector<16x512xi32> to vector<16x512xf32>
    %c0_1 = arith.constant 0 : index
    %c0_2 = arith.constant 0 : index
    %9 = vector.load %arg2[%c0_1, %c0_2] : memref<512x256xf32, #tpu.memory_space<vmem>>, vector<512x256xf32>
    %cst_3 = arith.constant dense<0.000000e+00> : vector<16x256xf32>
    %10 = tpu.matmul %8, %9, %cst_3 {dimension_numbers = #tpu.dot_dimension_numbers<[1], [0], [0], [1], [0, 0, 1, 1], [], []>, precision = #tpu.contract_precision<fp32>} : vector<16x512xf32>, vector<512x256xf32>, vector<16x256xf32> -> vector<16x256xf32>
    %11 = arith.addf %1, %10 : vector<16x256xf32>
    %cst_4 = arith.constant dense<0.000000e+00> : vector<16xf32>
    %12 = vector.multi_reduction <add>, %11, %cst_4 [1] : vector<16x256xf32> to vector<16xf32>
    %13 = vector.shape_cast %12 : vector<16xf32> to vector<16x1xf32>
    %cst_5 = arith.constant 2.560000e+02 : f32
    %14 = vector.broadcast %cst_5 : f32 to vector<16x1xf32>
    %15 = arith.divf %13, %14 : vector<16x1xf32>
    %16 = vector.broadcast %15 : vector<16x1xf32> to vector<16x256xf32>
    %17 = arith.subf %11, %16 : vector<16x256xf32>
    %18 = arith.mulf %17, %17 : vector<16x256xf32>
    %cst_6 = arith.constant dense<0.000000e+00> : vector<16xf32>
    %19 = vector.multi_reduction <add>, %18, %cst_6 [1] : vector<16x256xf32> to vector<16xf32>
    %20 = vector.shape_cast %19 : vector<16xf32> to vector<16x1xf32>
    %cst_7 = arith.constant 2.560000e+02 : f32
    %21 = vector.broadcast %cst_7 : f32 to vector<16x1xf32>
    %22 = arith.divf %20, %21 : vector<16x1xf32>
    %cst_8 = arith.constant 1.000000e-07 : f32
    %23 = vector.broadcast %cst_8 : f32 to vector<16x1xf32>
    %24 = arith.addf %22, %23 : vector<16x1xf32>
    %25 = math.rsqrt %24 : vector<16x1xf32>
    %26 = vector.broadcast %25 : vector<16x1xf32> to vector<16x256xf32>
    %27 = arith.mulf %17, %26 : vector<16x256xf32>
    %c0_9 = arith.constant 0 : index
    %c0_10 = arith.constant 0 : index
    %28 = vector.load %arg3[%c0_9, %c0_10] : memref<16x256xf32, #tpu.memory_space<vmem>>, vector<16x256xf32>
    tpu.vector_store %arg3[%c0_9, %c0_10], %27 {strides = array<i32>} : memref<16x256xf32, #tpu.memory_space<vmem>>, vector<16x256xf32>,
    return
  }
  func.func @transform_0(%arg0: i32) -> (i32, i32) {
    %c0_i32 = arith.constant 0 : i32
    %c0_i32_0 = arith.constant 0 : i32
    return %arg0, %c0_i32 : i32, i32
  }
  func.func @transform_1(%arg0: i32) -> (i32, i32) {
    %c0_i32 = arith.constant 0 : i32
    %c0_i32_0 = arith.constant 0 : i32
    %c0_i32_1 = arith.constant 0 : i32
    return %c0_i32, %c0_i32_0 : i32, i32
  }
  func.func @transform_2(%arg0: i32) -> (i32, i32) {
    %c0_i32 = arith.constant 0 : i32
    %c0_i32_0 = arith.constant 0 : i32
    return %arg0, %c0_i32 : i32, i32
  }
}

</mosaic_0001>

<bundles_post_ra>
// kernel: tpu_custom_call.1
= control target key start
LH: loop header
LB: loop body
LE: loop exit
PB: predicated region body
PF: predicated region fallthrough
CT: control target
= control target key end

     0   :  { %7 = vsyncpa [#allocation3], 0  ;;  %s5795_s0 = inlined_call_operand.vmem [shape: s32[16,1], index: 0, kind: input, shape index: {}]   ;;  %s5796_s1 = inlined_call_operand.hbm [shape: f32[512,256], index: 1, kind: input, shape index: {}]   ;;  %s5797_s2 = inlined_call_operand.hbm [shape: f32[16,256], index: 2, kind: output, shape index: {}]  }
   0x1   :  { %8 = vsyncpa [#allocation4], 0  ;;  %s3841_s9 = smov [#allocation2]   ;;  %s3793_s13 = scalar_lea.hbm %s5796_s1, 16384 }
   0x2   :  { %s16_s10 = sshll.u32 %s3841_s9, 4  ;;  %p3794_p0 = scmp.ne.s32.totalorder %s5796_s1, %s3793_s13  ;;  %s17_s10 = int_to_ptr.vmem [resolvable:$true] %s16_s10 }
   0x3   :  { %p3797_p1 = scmp.lt.u32.totalorder %s3793_s13, %s5796_s1 }
   0x5   :  { %p3799_p2 = pnand %p3797_p1, %p3794_p0 }
   0x7   :  { %3802 = shalt.err (!%p3799_p2)
}
   0x8   :  { %s3803_s18 = scalar_lea.vmem %s17_s10, 16384  ;;  %p3808_p4 = scmp.lt.s32.totalorder %s17_s10, %s17_s10 }
   0x9   :  { %p3804_p3 = scmp.ne.s32.totalorder %s17_s10, %s3803_s18  ;;  %p3809_p5 = scmp.lt.s32.totalorder %s3803_s18, %s3803_s18 }
   0xb   :  { %p3810_p6 = por %p3809_p5, %p3808_p4 }
   0xd   :  { %p3811_p7 = pnand %p3810_p6, %p3804_p3 }
   0xf   :  { %3814 = shalt.err (!%p3811_p7)
}
  0x10   :  { %s3842_s19 = smov 256   ;;  %s3843_s20 = smov 16  }
  0x11   :  { %22 = dma.hbm_to_vmem [thread:$0]  %s5796_s1, 16384, %s17_s10, [#allocation3], %s3842_s19, %s3842_s19, %s3843_s20  }
  0x12   :  { %3837 = dma.done.wait [#allocation3], 16384  }
  0x13   :  { %3838 = vsyncadd [#allocation3], 4294950912  ;;  %v28_v0 = vlaneseq  ;;  %v3844_v1 = vmov 0   ;;  %v26_v3 = vld [vmem:[%s5795_s0] sm:$0xff]  ;;  %v27_v4 = vld [vmem:[%s5795_s0 + $0x8] sm:$0xff]  ;;  %s3847_s0 = smov [#allocation5]  }
  0x14   :  { %3788 = vset.pattern.permute.xlu0 %v3844_v1  ;;  %v64_v5 = vld [vmem:[#allocation2 + $0x8] sm:$0xff]  ;;  %v66_v8 = vld [vmem:[#allocation2 + $0x18] sm:$0xff]  ;;  %v63_v16 = vld [vmem:[#allocation2] sm:$0xff]  ;;  %s2925_s1 = sshll.u32 %s3847_s0, 4  ;;  %s2926_s1 = int_to_ptr.vmem [resolvable:$true] %s2925_s1 }
  0x15   :  { %v3878_v2 = vand.u32 127, %v28_v0  ;;  %34 = vperm.xlu0 %3788, %v26_v3   ;;  %v191_v9 = vand.u32 4294901760, %v64_v5  ;;  %v128_v10 = vld [vmem:[#allocation2 + $0x208] sm:$0xff]  ;;  %v130_v11 = vld [vmem:[#allocation2 + $0x218] sm:$0xff]  ;;  %v195_v13 = vand.u32 4294901760, %v66_v8  ;;  %v65_v17 = vld [vmem:[#allocation2 + $0x10] sm:$0xff]  ;;  %p3820_p9 = scmp.lt.s32.totalorder %s2926_s1, %s2926_s1 }
  0x16   :  { %v1537_v14 = vand.u32 4294901760, %v128_v10  ;;  %v1541_v15 = vand.u32 4294901760, %v130_v11  ;;  %v127_v18 = vld [vmem:[#allocation2 + $0x200] sm:$0xff]  ;;  %v193_v20 = vand.u32 4294901760, %v63_v16  ;;  %v197_v21 = vand.u32 4294901760, %v65_v17  ;;  %v129_v22 = vld [vmem:[#allocation2 + $0x210] sm:$0xff] }
  0x17   :  { %6333 = vst [vmem:[#allocation8_spill] sm:$0xff] %v3878_v2  ;;  %v3887_v6 = vadd.s32 128, %v3878_v2  ;;  %v3890_v7 = vadd.s32 256, %v3878_v2  ;;  %v3893_v12 = vadd.s32 384, %v3878_v2  ;;  %v3895_v19 = vsub.f32 %v64_v5, %v191_v9  ;;  %v68_v24 = vld [vmem:[#allocation2 + $0x28] sm:$0xff]  ;;  %v70_v25 = vld [vmem:[#allocation2 + $0x38] sm:$0xff] }
  0x18   :  { %v1539_v23 = vand.u32 4294901760, %v127_v18  ;;  %v3897_v26 = vpack.c.bf16 %v195_v13, %v191_v9  ;;  %v3899_v27 = vsub.f32 %v66_v8, %v195_v13  ;;  %v3901_v28 = vpack.c.bf16 %v1541_v15, %v1537_v14  ;;  %v132_v30 = vld [vmem:[#allocation2 + $0x228] sm:$0xff]  ;;  %v134_v31 = vld [vmem:[#allocation2 + $0x238] sm:$0xff]  ;;  %v67_v32 = vld [vmem:[#allocation2 + $0x20] sm:$0xff]  ;;  %s3815_s27 = scalar_lea.vmem %s2926_s1, 512 }
  0x19   :  { %6334 = vst [vmem:[#allocation9_spill] sm:$0xff] %v3887_v6  ;;  %6335 = vst [vmem:[#allocation10_spill] sm:$0xff] %v3890_v7  ;;  %v3903_v29 = vsub.f32 %v128_v10, %v1537_v14  ;;  %37 = vperm.xlu0 %3788, %v27_v4   ;;  %v3905_v33 = vsub.f32 %v130_v11, %v1541_v15  ;;  %v3907_v34 = vpack.c.bf16 %v197_v21, %v193_v20  ;;  %v69_v37 = vld [vmem:[#allocation2 + $0x30] sm:$0xff]  ;;  %v131_v46 = vld [vmem:[#allocation2 + $0x220] sm:$0xff]  ;;  %p3816_p8 = scmp.ne.s32.totalorder %s2926_s1, %s3815_s27  ;;  %p3821_p10 = scmp.lt.s32.totalorder %s3815_s27, %s3815_s27 }
  0x1a   :  { %6336 = vst [vmem:[#allocation11_spill] sm:$0xff] %v3893_v12  ;;  %6337 = vst [vmem:[#allocation12_spill] sm:$0xff] %v3895_v19  ;;  %v3909_v35 = vsub.f32 %v63_v16, %v193_v20  ;;  %v3911_v36 = vsub.f32 %v65_v17, %v197_v21  ;;  %2970 = vmatprep.subr.bf16.mxu1 %v3897_v26  ;;  %3354 = vmatprep.subr.bf16.mxu0 %v3901_v28  ;;  %v1543_v38 = vand.u32 4294901760, %v129_v22  ;;  %v133_v47 = vld [vmem:[#allocation2 + $0x230] sm:$0xff]  ;;  %v72_v52 = vld [vmem:[#allocation2 + $0x48] sm:$0xff] }
  0x1b   :  { %6338 = vst [vmem:[#allocation13_spill] sm:$0xff] %v3897_v26  ;;  %6339 = vst [vmem:[#allocation14_spill] sm:$0xff] %v3899_v27  ;;  %v3915_v39 = vsub.f32 %v127_v18, %v1539_v23  ;;  %v199_v40 = vand.u32 4294901760, %v68_v24  ;;  %v203_v41 = vand.u32 4294901760, %v70_v25  ;;  %2972 = vmatpush1.bf16.msra.mxu1 %v3907_v34  ;;  %v1545_v42 = vand.u32 4294901760, %v132_v30  ;;  %v74_v53 = vld [vmem:[#allocation2 + $0x58] sm:$0xff]  ;;  %p3822_p11 = por %p3821_p10, %p3820_p9 }
  0x1c   :  { %6340 = vst [vmem:[#allocation15_spill] sm:$0xff] %v3901_v28  ;;  %6341 = vst [vmem:[#allocation16_spill] sm:$0xff] %v3903_v29  ;;  %v1549_v43 = vand.u32 4294901760, %v134_v31  ;;  %v201_v44 = vand.u32 4294901760, %v67_v32  ;;  %v205_v45 = vand.u32 4294901760, %v69_v37  ;;  %v3918_v48 = vpack.c.bf16 %v1543_v38, %v1539_v23  ;;  %v136_v54 = vld [vmem:[#allocation2 + $0x248] sm:$0xff] }
  0x1d   :  { %6342 = vst [vmem:[#allocation17_spill] sm:$0xff] %v3905_v33  ;;  %6343 = vst [vmem:[#allocation18_spill] sm:$0xff] %v3907_v34  ;;  %v3920_v49 = vsub.f32 %v129_v22, %v1543_v38  ;;  %v3922_v50 = vpack.c.bf16 %v203_v41, %v199_v40  ;;  %v3924_v51 = vsub.f32 %v68_v24, %v199_v40  ;;  %v138_v59 = vld [vmem:[#allocation2 + $0x258] sm:$0xff]  ;;  %v71_v60 = vld [vmem:[#allocation2 + $0x40] sm:$0xff]  ;;  %v1547_v1 = vand.u32 4294901760, %v131_v46  ;;  %p3823_p12 = pnand %p3822_p11, %p3816_p8 }
  0x1e   :  { %6344 = vst [vmem:[#allocation19_spill] sm:$0xff] %v3909_v35  ;;  %6345 = vst [vmem:[#allocation20_spill] sm:$0xff] %v3911_v36  ;;  %v3926_v55 = vsub.f32 %v70_v25, %v203_v41  ;;  %v3928_v56 = vpack.c.bf16 %v1549_v43, %v1545_v42  ;;  %v3930_v57 = vsub.f32 %v132_v30, %v1545_v42  ;;  %v73_v61 = vld [vmem:[#allocation2 + $0x50] sm:$0xff]  ;;  %3356 = vmatpush1.bf16.msra.mxu0 %v3918_v48  ;;  %v135_v14 = vld [vmem:[#allocation2 + $0x240] sm:$0xff] }
  0x1f   :  { %6346 = vst [vmem:[#allocation21_spill] sm:$0xff] %v3915_v39  ;;  %6347 = vst [vmem:[#allocation22_spill] sm:$0xff] %v3918_v48  ;;  %v3932_v58 = vsub.f32 %v134_v31, %v1549_v43  ;;  %2974 = vmatprep.subr.bf16.mxu1 %v3922_v50  ;;  %v3936_v62 = vpack.c.bf16 %v205_v45, %v201_v44  ;;  %v3938_v63 = vsub.f32 %v67_v32, %v201_v44  ;;  %v137_v15 = vld [vmem:[#allocation2 + $0x250] sm:$0xff]  ;;  %v76_v21 = vld [vmem:[#allocation2 + $0x68] sm:$0xff] }
  0x20   :  { %6348 = vst [vmem:[#allocation23_spill] sm:$0xff] %v3920_v49  ;;  %6349 = vst [vmem:[#allocation24_spill] sm:$0xff] %v3922_v50  ;;  %v3940_v0 = vsub.f32 %v69_v37, %v205_v45  ;;  %3358 = vmatprep.subr.bf16.mxu0 %v3928_v56  ;;  %v1551_v3 = vand.u32 4294901760, %v133_v47  ;;  %v207_v4 = vand.u32 4294901760, %v72_v52  ;;  %v211_v5 = vand.u32 4294901760, %v74_v53  ;;  %v78_v22 = vld [vmem:[#allocation2 + $0x78] sm:$0xff] }
  0x21   :  { %6350 = vst [vmem:[#allocation25_spill] sm:$0xff] %v3924_v51  ;;  %6351 = vst [vmem:[#allocation26_spill] sm:$0xff] %v3926_v55  ;;  %v1553_v8 = vand.u32 4294901760, %v136_v54  ;;  %2976 = vmatpush1.bf16.msra.mxu1 %v3936_v62  ;;  %v3944_v9 = vsub.f32 %v131_v46, %v1547_v1  ;;  %v1557_v10 = vand.u32 4294901760, %v138_v59  ;;  %v209_v11 = vand.u32 4294901760, %v71_v60  ;;  %v140_v23 = vld [vmem:[#allocation2 + $0x268] sm:$0xff] }
  0x22   :  { %6352 = vst [vmem:[#allocation27_spill] sm:$0xff] %v3928_v56  ;;  %6353 = vst [vmem:[#allocation28_spill] sm:$0xff] %v3930_v57  ;;  %v213_v13 = vand.u32 4294901760, %v73_v61  ;;  %v3946_v16 = vpack.c.bf16 %v1551_v3, %v1547_v1  ;;  %v3948_v17 = vsub.f32 %v133_v47, %v1551_v3  ;;  %v3950_v18 = vpack.c.bf16 %v211_v5, %v207_v4  ;;  %v142_v32 = vld [vmem:[#allocation2 + $0x278] sm:$0xff]  ;;  %v75_v37 = vld [vmem:[#allocation2 + $0x60] sm:$0xff] }
  0x23   :  { %6354 = vst [vmem:[#allocation29_spill] sm:$0xff] %v3932_v58  ;;  %6355 = vst [vmem:[#allocation30_spill] sm:$0xff] %v3936_v62  ;;  %v3952_v20 = vsub.f32 %v72_v52, %v207_v4  ;;  %v3954_v24 = vsub.f32 %v74_v53, %v211_v5  ;;  %v3956_v25 = vpack.c.bf16 %v1557_v10, %v1553_v8  ;;  %v77_v38 = vld [vmem:[#allocation2 + $0x70] sm:$0xff]  ;;  %v1555_v43 = vand.u32 4294901760, %v135_v14  ;;  %v139_v1 = vld [vmem:[#allocation2 + $0x260] sm:$0xff] }
  0x24   :  { %6356 = vst [vmem:[#allocation31_spill] sm:$0xff] %v3938_v63  ;;  %6357 = vst [vmem:[#allocation32_spill] sm:$0xff] %v3940_v0  ;;  %v3958_v30 = vsub.f32 %v136_v54, %v1553_v8  ;;  %v3960_v31 = vsub.f32 %v138_v59, %v1557_v10  ;;  %3360 = vmatpush1.bf16.msra.mxu0 %v3946_v16  ;;  %2978 = vmatprep.subr.bf16.mxu1 %v3950_v18  ;;  %v1559_v44 = vand.u32 4294901760, %v137_v15  ;;  %v141_v3 = vld [vmem:[#allocation2 + $0x270] sm:$0xff]  ;;  %v80_v8 = vld [vmem:[#allocation2 + $0x88] sm:$0xff] }
  0x25   :  { %6358 = vst [vmem:[#allocation33_spill] sm:$0xff] %v3944_v9  ;;  %6359 = vst [vmem:[#allocation34_spill] sm:$0xff] %v3946_v16  ;;  %v3964_v40 = vpack.c.bf16 %v213_v13, %v209_v11  ;;  %v3966_v41 = vsub.f32 %v71_v60, %v209_v11  ;;  %v3968_v42 = vsub.f32 %v73_v61, %v213_v13  ;;  %3362 = vmatprep.subr.bf16.mxu0 %v3956_v25  ;;  %v82_v10 = vld [vmem:[#allocation2 + $0x98] sm:$0xff]  ;;  %v144_v11 = vld [vmem:[#allocation2 + $0x288] sm:$0xff] }
  0x26   :  { %6360 = vst [vmem:[#allocation35_spill] sm:$0xff] %v3948_v17  ;;  %6361 = vst [vmem:[#allocation36_spill] sm:$0xff] %v3950_v18  ;;  %v215_v45 = vand.u32 4294901760, %v76_v21  ;;  %v219_v46 = vand.u32 4294901760, %v78_v22  ;;  %v1561_v47 = vand.u32 4294901760, %v140_v23  ;;  %v3972_v52 = vsub.f32 %v135_v14, %v1555_v43  ;;  %v146_v18 = vld [vmem:[#allocation2 + $0x298] sm:$0xff] }
  0x27   :  { %6362 = vst [vmem:[#allocation37_spill] sm:$0xff] %v3952_v20  ;;  %6363 = vst [vmem:[#allocation38_spill] sm:$0xff] %v3954_v24  ;;  %2980 = vmatpush1.bf16.msra.mxu1 %v3964_v40  ;;  %v1565_v53 = vand.u32 4294901760, %v142_v32  ;;  %v217_v54 = vand.u32 4294901760, %v75_v37  ;;  %v221_v59 = vand.u32 4294901760, %v77_v38  ;;  %v3974_v60 = vpack.c.bf16 %v1559_v44, %v1555_v43  ;;  %v79_v43 = vld [vmem:[#allocation2 + $0x80] sm:$0xff] }
  0x28   :  { %6364 = vst [vmem:[#allocation39_spill] sm:$0xff] %v3956_v25  ;;  %6365 = vst [vmem:[#allocation40_spill] sm:$0xff] %v3958_v30  ;;  %v3976_v61 = vsub.f32 %v137_v15, %v1559_v44  ;;  %v3978_v4 = vpack.c.bf16 %v219_v46, %v215_v45  ;;  %v3980_v5 = vsub.f32 %v76_v21, %v215_v45  ;;  %v81_v16 = vld [vmem:[#allocation2 + $0x90] sm:$0xff]  ;;  %v223_v45 = vand.u32 4294901760, %v80_v8  ;;  %v143_v62 = vld [vmem:[#allocation2 + $0x280] sm:$0xff] }
  0x29   :  { %6366 = vst [vmem:[#allocation41_spill] sm:$0xff] %v3960_v31  ;;  %6367 = vst [vmem:[#allocation42_spill] sm:$0xff] %v3964_v40  ;;  %v3982_v13 = vsub.f32 %v78_v22, %v219_v46  ;;  %v3984_v14 = vpack.c.bf16 %v1565_v53, %v1561_v47  ;;  %v3986_v40 = vsub.f32 %v140_v23, %v1561_v47  ;;  %3364 = vmatpush1.bf16.msra.mxu0 %v3974_v60  ;;  %v145_v56 = vld [vmem:[#allocation2 + $0x290] sm:$0xff]  ;;  %v86_v50 = vld [vmem:[#allocation2 + $0xb8] sm:$0xff] }
  0x2a   :  { %6368 = vst [vmem:[#allocation43_spill] sm:$0xff] %v3966_v41  ;;  %6369 = vst [vmem:[#allocation44_spill] sm:$0xff] %v3968_v42  ;;  %v3988_v25 = vsub.f32 %v142_v32, %v1565_v53  ;;  %2982 = vmatprep.subr.bf16.mxu1 %v3978_v4  ;;  %v3992_v15 = vpack.c.bf16 %v221_v59, %v217_v54  ;;  %v3994_v21 = vsub.f32 %v75_v37, %v217_v54  ;;  %v148_v48 = vld [vmem:[#allocation2 + $0x2a8] sm:$0xff]  ;;  %v150_v26 = vld [vmem:[#allocation2 + $0x2b8] sm:$0xff] }
  0x2b   :  { %6370 = vst [vmem:[#allocation45_spill] sm:$0xff] %v3972_v52  ;;  %6371 = vst [vmem:[#allocation46_spill] sm:$0xff] %v3974_v60  ;;  %v3996_v44 = vsub.f32 %v77_v38, %v221_v59  ;;  %v1563_v22 = vand.u32 4294901760, %v139_v1  ;;  %3366 = vmatprep.subr.bf16.mxu0 %v3984_v14  ;;  %v1567_v23 = vand.u32 4294901760, %v141_v3  ;;  %v227_v32 = vand.u32 4294901760, %v82_v10  ;;  %v85_v12 = vld [vmem:[#allocation2 + $0xb0] sm:$0xff] }
  0x2c   :  { %6372 = vst [vmem:[#allocation47_spill] sm:$0xff] %v3976_v61  ;;  %6373 = vst [vmem:[#allocation48_spill] sm:$0xff] %v3978_v4  ;;  %v1569_v46 = vand.u32 4294901760, %v144_v11  ;;  %2984 = vmatpush1.bf16.msra.mxu1 %v3992_v15  ;;  %v1573_v53 = vand.u32 4294901760, %v146_v18  ;;  %v225_v60 = vand.u32 4294901760, %v79_v43  ;;  %v229_v4 = vand.u32 4294901760, %v81_v16 }
  0x2d   :  { %6374 = vst [vmem:[#allocation49_spill] sm:$0xff] %v3980_v5  ;;  %6375 = vst [vmem:[#allocation50_spill] sm:$0xff] %v3982_v13  ;;  %v4000_v47 = vsub.f32 %v139_v1, %v1563_v22  ;;  %v4002_v37 = vpack.c.bf16 %v1567_v23, %v1563_v22  ;;  %v4004_v38 = vsub.f32 %v141_v3, %v1567_v23  ;;  %v83_v22 = vld [vmem:[#allocation2 + $0xa0] sm:$0xff]  ;;  %v149_v6 = vld [vmem:[#allocation2 + $0x2b0] sm:$0xff] }
  0x2e   :  { %6376 = vst [vmem:[#allocation51_spill] sm:$0xff] %v3984_v14  ;;  %6377 = vst [vmem:[#allocation52_spill] sm:$0xff] %v3986_v40  ;;  %v4006_v54 = vpack.c.bf16 %v227_v32, %v223_v45  ;;  %v4008_v59 = vsub.f32 %v80_v8, %v223_v45  ;;  %v84_v14 = vld [vmem:[#allocation2 + $0xa8] sm:$0xff]  ;;  %v4010_v34 = vsub.f32 %v82_v10, %v227_v32  ;;  %v1571_v10 = vand.u32 4294901760, %v143_v62  ;;  %v147_v7 = vld [vmem:[#allocation2 + $0x2a0] sm:$0xff] }
  0x2f   :  { %6378 = vst [vmem:[#allocation53_spill] sm:$0xff] %v3988_v25  ;;  %6379 = vst [vmem:[#allocation54_spill] sm:$0xff] %v3992_v15  ;;  %v4012_v1 = vpack.c.bf16 %v1573_v53, %v1569_v46  ;;  %v4014_v15 = vsub.f32 %v144_v11, %v1569_v46  ;;  %v4016_v28 = vsub.f32 %v146_v18, %v1573_v53  ;;  %3368 = vmatpush1.bf16.msra.mxu0 %v4002_v37  ;;  %v90_v2 = vld [vmem:[#allocation2 + $0xd8] sm:$0xff] }
  0x30   :  { %6380 = vst [vmem:[#allocation55_spill] sm:$0xff] %v3994_v21  ;;  %6381 = vst [vmem:[#allocation56_spill] sm:$0xff] %v3996_v44  ;;  %2986 = vmatprep.subr.bf16.mxu1 %v4006_v54  ;;  %v4020_v3 = vpack.c.bf16 %v229_v4, %v225_v60  ;;  %v4022_v8 = vsub.f32 %v79_v43, %v225_v60  ;;  %v4024_v23 = vsub.f32 %v81_v16, %v229_v4 }
  0x31   :  { %6382 = vst [vmem:[#allocation57_spill] sm:$0xff] %v4000_v47  ;;  %6383 = vst [vmem:[#allocation58_spill] sm:$0xff] %v4002_v37  ;;  %3370 = vmatprep.subr.bf16.mxu0 %v4012_v1  ;;  %v1575_v11 = vand.u32 4294901760, %v145_v56  ;;  %v231_v45 = vand.u32 4294901760, %v84_v14  ;;  %v235_v18 = vand.u32 4294901760, %v86_v50  ;;  %v1577_v32 = vand.u32 4294901760, %v148_v48 }
  0x32   :  { %6384 = vst [vmem:[#allocation59_spill] sm:$0xff] %v4004_v38  ;;  %6385 = vst [vmem:[#allocation60_spill] sm:$0xff] %v4006_v54  ;;  %2988 = vmatpush1.bf16.msra.mxu1 %v4020_v3  ;;  %v4028_v46 = vsub.f32 %v143_v62, %v1571_v10  ;;  %v1581_v53 = vand.u32 4294901760, %v150_v26  ;;  %v233_v37 = vand.u32 4294901760, %v83_v22  ;;  %v237_v54 = vand.u32 4294901760, %v85_v12 }
  0x33   :  { %6386 = vst [vmem:[#allocation61_spill] sm:$0xff] %v4008_v59  ;;  %6387 = vst [vmem:[#allocation62_spill] sm:$0xff] %v4010_v34  ;;  %v4030_v60 = vpack.c.bf16 %v1575_v11, %v1571_v10  ;;  %v4032_v16 = vsub.f32 %v145_v56, %v1575_v11  ;;  %v4034_v4 = vpack.c.bf16 %v235_v18, %v231_v45  ;;  %v87_v10 = vld [vmem:[#allocation2 + $0xc0] sm:$0xff] }
  0x34   :  { %6388 = vst [vmem:[#allocation63_spill] sm:$0xff] %v4012_v1  ;;  %6389 = vst [vmem:[#allocation64_spill] sm:$0xff] %v4014_v15  ;;  %v4036_v43 = vsub.f32 %v84_v14, %v231_v45  ;;  %v88_v1 = vld [vmem:[#allocation2 + $0xc8] sm:$0xff]  ;;  %v4040_v62 = vpack.c.bf16 %v1581_v53, %v1577_v32  ;;  %v89_v15 = vld [vmem:[#allocation2 + $0xd0] sm:$0xff]  ;;  %v4048_v56 = vpack.c.bf16 %v237_v54, %v233_v37 }
  0x35   :  { %6390 = vst [vmem:[#allocation65_spill] sm:$0xff] %v4016_v28  ;;  %6391 = vst [vmem:[#allocation66_spill] sm:$0xff] %v4020_v3  ;;  %v4042_v3 = vsub.f32 %v148_v48, %v1577_v32  ;;  %v154_v28 = vld [vmem:[#allocation2 + $0x2d8] sm:$0xff]  ;;  %3372 = vmatpush1.bf16.msra.mxu0 %v4030_v60  ;;  %2990 = vmatprep.subr.bf16.mxu1 %v4034_v4  ;;  %v4050_v14 = vsub.f32 %v83_v22, %v233_v37  ;;  %v1583_v48 = vand.u32 4294901760, %v149_v6 }
  0x36   :  { %6392 = vst [vmem:[#allocation67_spill] sm:$0xff] %v4022_v8  ;;  %6393 = vst [vmem:[#allocation68_spill] sm:$0xff] %v4024_v23  ;;  %v152_v23 = vld [vmem:[#allocation2 + $0x2c8] sm:$0xff]  ;;  %v4038_v8 = vsub.f32 %v86_v50, %v235_v18  ;;  %v4052_v11 = vsub.f32 %v85_v12, %v237_v54  ;;  %v1579_v50 = vand.u32 4294901760, %v147_v7  ;;  %3374 = vmatprep.subr.bf16.mxu0 %v4040_v62  ;;  %v239_v45 = vand.u32 4294901760, %v88_v1 }
  0x37   :  { %6394 = vst [vmem:[#allocation69_spill] sm:$0xff] %v4028_v46  ;;  %6395 = vst [vmem:[#allocation70_spill] sm:$0xff] %v4030_v60  ;;  %v4044_v46 = vsub.f32 %v150_v26, %v1581_v53  ;;  %v243_v26 = vand.u32 4294901760, %v90_v2  ;;  %v1585_v18 = vand.u32 4294901760, %v152_v23  ;;  %2992 = vmatpush1.bf16.msra.mxu1 %v4048_v56  ;;  %v1589_v53 = vand.u32 4294901760, %v154_v28 }
  0x38   :  { %6396 = vst [vmem:[#allocation71_spill] sm:$0xff] %v4032_v16  ;;  %6397 = vst [vmem:[#allocation72_spill] sm:$0xff] %v4034_v4  ;;  %v4056_v32 = vsub.f32 %v147_v7, %v1579_v50  ;;  %v241_v60 = vand.u32 4294901760, %v87_v10  ;;  %v245_v4 = vand.u32 4294901760, %v89_v15  ;;  %v4058_v37 = vpack.c.bf16 %v1583_v48, %v1579_v50  ;;  %v91_v50 = vld [vmem:[#allocation2 + $0xe0] sm:$0xff]  ;;  %v93_v16 = vld [vmem:[#allocation2 + $0xf0] sm:$0xff] }
  0x39   :  { %6398 = vst [vmem:[#allocation73_spill] sm:$0xff] %v4036_v43  ;;  %6399 = vst [vmem:[#allocation74_spill] sm:$0xff] %v4038_v8  ;;  %v4060_v12 = vsub.f32 %v149_v6, %v1583_v48  ;;  %v4062_v54 = vpack.c.bf16 %v243_v26, %v239_v45  ;;  %v4064_v22 = vsub.f32 %v88_v1, %v239_v45  ;;  %v158_v43 = vld [vmem:[#allocation2 + $0x2f8] sm:$0xff] }
  0x3a   :  { %6400 = vst [vmem:[#allocation75_spill] sm:$0xff] %v4040_v62  ;;  %6401 = vst [vmem:[#allocation76_spill] sm:$0xff] %v4042_v3  ;;  %v153_v3 = vld [vmem:[#allocation2 + $0x2d0] sm:$0xff]  ;;  %v92_v62 = vld [vmem:[#allocation2 + $0xe8] sm:$0xff]  ;;  %v4066_v8 = vsub.f32 %v90_v2, %v243_v26  ;;  %v4068_v7 = vpack.c.bf16 %v1589_v53, %v1585_v18  ;;  %3376 = vmatpush1.bf16.msra.mxu0 %v4058_v37  ;;  %v4076_v6 = vpack.c.bf16 %v245_v4, %v241_v60 }
  0x3b   :  { %6402 = vst [vmem:[#allocation77_spill] sm:$0xff] %v4044_v46  ;;  %6403 = vst [vmem:[#allocation78_spill] sm:$0xff] %v4048_v56  ;;  %v151_v46 = vld [vmem:[#allocation2 + $0x2c0] sm:$0xff]  ;;  %v4070_v56 = vsub.f32 %v152_v23, %v1585_v18  ;;  %2994 = vmatprep.subr.bf16.mxu1 %v4062_v54  ;;  %v4078_v1 = vsub.f32 %v87_v10, %v241_v60  ;;  %v4080_v48 = vsub.f32 %v89_v15, %v245_v4 }
  0x3c   :  { %6404 = vst [vmem:[#allocation79_spill] sm:$0xff] %v4050_v14  ;;  %6405 = vst [vmem:[#allocation80_spill] sm:$0xff] %v4052_v11  ;;  %v94_v11 = vld [vmem:[#allocation2 + $0xf8] sm:$0xff]  ;;  %v156_v14 = vld [vmem:[#allocation2 + $0x2e8] sm:$0xff]  ;;  %v1587_v2 = vand.u32 4294901760, %v151_v46  ;;  %3378 = vmatprep.subr.bf16.mxu0 %v4068_v7  ;;  %v1591_v23 = vand.u32 4294901760, %v153_v3  ;;  %2996 = vmatpush1.bf16.msra.mxu1 %v4076_v6 }
  0x3d   :  { %6406 = vst [vmem:[#allocation81_spill] sm:$0xff] %v4056_v32  ;;  %6407 = vst [vmem:[#allocation82_spill] sm:$0xff] %v4058_v37  ;;  %v4072_v32 = vsub.f32 %v154_v28, %v1589_v53  ;;  %v247_v45 = vand.u32 4294901760, %v92_v62  ;;  %v251_v28 = vand.u32 4294901760, %v94_v11  ;;  %v1593_v26 = vand.u32 4294901760, %v156_v14 }
  0x3e   :  { %6408 = vst [vmem:[#allocation83_spill] sm:$0xff] %v4060_v12  ;;  %6409 = vst [vmem:[#allocation84_spill] sm:$0xff] %v4062_v54  ;;  %v4084_v18 = vsub.f32 %v151_v46, %v1587_v2  ;;  %v1597_v53 = vand.u32 4294901760, %v158_v43  ;;  %v249_v37 = vand.u32 4294901760, %v91_v50  ;;  %v253_v54 = vand.u32 4294901760, %v93_v16  ;;  %v97_v12 = vld [vmem:[#allocation2 + $0x110] sm:$0xff] }
  0x3f   :  { %6410 = vst [vmem:[#allocation85_spill] sm:$0xff] %v4064_v22  ;;  %6411 = vst [vmem:[#allocation86_spill] sm:$0xff] %v4066_v8  ;;  %v4086_v60 = vpack.c.bf16 %v1591_v23, %v1587_v2  ;;  %v4088_v15 = vsub.f32 %v153_v3, %v1591_v23  ;;  %v4090_v4 = vpack.c.bf16 %v251_v28, %v247_v45  ;;  %v162_v22 = vld [vmem:[#allocation2 + $0x318] sm:$0xff]  ;;  %v95_v2 = vld [vmem:[#allocation2 + $0x100] sm:$0xff] }
  0x40   :  { %6412 = vst [vmem:[#allocation87_spill] sm:$0xff] %v4068_v7  ;;  %6413 = vst [vmem:[#allocation88_spill] sm:$0xff] %v4070_v56  ;;  %v157_v56 = vld [vmem:[#allocation2 + $0x2f0] sm:$0xff]  ;;  %v4092_v10 = vsub.f32 %v92_v62, %v247_v45  ;;  %v96_v7 = vld [vmem:[#allocation2 + $0x108] sm:$0xff]  ;;  %v4094_v8 = vsub.f32 %v94_v11, %v251_v28  ;;  %v4096_v46 = vpack.c.bf16 %v1597_v53, %v1593_v26 }
  0x41   :  { %6414 = vst [vmem:[#allocation89_spill] sm:$0xff] %v4072_v32  ;;  %6415 = vst [vmem:[#allocation90_spill] sm:$0xff] %v4076_v6  ;;  %v155_v32 = vld [vmem:[#allocation2 + $0x2e0] sm:$0xff]  ;;  %v4098_v6 = vsub.f32 %v156_v14, %v1593_v26  ;;  %3380 = vmatpush1.bf16.msra.mxu0 %v4086_v60  ;;  %2998 = vmatprep.subr.bf16.mxu1 %v4090_v4  ;;  %v4104_v3 = vpack.c.bf16 %v253_v54, %v249_v37  ;;  %v1599_v14 = vand.u32 4294901760, %v157_v56 }
  0x42   :  { %6416 = vst [vmem:[#allocation91_spill] sm:$0xff] %v4078_v1  ;;  %6417 = vst [vmem:[#allocation92_spill] sm:$0xff] %v4080_v48  ;;  %v98_v48 = vld [vmem:[#allocation2 + $0x118] sm:$0xff]  ;;  %v160_v1 = vld [vmem:[#allocation2 + $0x308] sm:$0xff]  ;;  %v4106_v62 = vsub.f32 %v91_v50, %v249_v37  ;;  %v4108_v23 = vsub.f32 %v93_v16, %v253_v54  ;;  %v1595_v11 = vand.u32 4294901760, %v155_v32  ;;  %3382 = vmatprep.subr.bf16.mxu0 %v4096_v46  ;;  %v255_v45 = vand.u32 4294901760, %v96_v7 }
  0x43   :  { %6418 = vst [vmem:[#allocation93_spill] sm:$0xff] %v4084_v18  ;;  %6419 = vst [vmem:[#allocation94_spill] sm:$0xff] %v4086_v60  ;;  %v4100_v18 = vsub.f32 %v158_v43, %v1597_v53  ;;  %v259_v43 = vand.u32 4294901760, %v98_v48  ;;  %v1601_v28 = vand.u32 4294901760, %v160_v1  ;;  %3000 = vmatpush1.bf16.msra.mxu1 %v4104_v3  ;;  %v1605_v53 = vand.u32 4294901760, %v162_v22 }
  0x44   :  { %6420 = vst [vmem:[#allocation95_spill] sm:$0xff] %v4088_v15  ;;  %6421 = vst [vmem:[#allocation96_spill] sm:$0xff] %v4090_v4  ;;  %v4112_v26 = vsub.f32 %v155_v32, %v1595_v11  ;;  %v257_v60 = vand.u32 4294901760, %v95_v2  ;;  %v261_v4 = vand.u32 4294901760, %v97_v12  ;;  %v4114_v37 = vpack.c.bf16 %v1599_v14, %v1595_v11  ;;  %v99_v11 = vld [vmem:[#allocation2 + $0x120] sm:$0xff]  ;;  %v101_v15 = vld [vmem:[#allocation2 + $0x130] sm:$0xff] }
  0x45   :  { %6422 = vst [vmem:[#allocation97_spill] sm:$0xff] %v4092_v10  ;;  %6423 = vst [vmem:[#allocation98_spill] sm:$0xff] %v4094_v8  ;;  %v4116_v16 = vsub.f32 %v157_v56, %v1599_v14  ;;  %v4118_v54 = vpack.c.bf16 %v259_v43, %v255_v45  ;;  %v4120_v50 = vsub.f32 %v96_v7, %v255_v45  ;;  %v166_v10 = vld [vmem:[#allocation2 + $0x338] sm:$0xff] }
  0x46   :  { %6424 = vst [vmem:[#allocation99_spill] sm:$0xff] %v4096_v46  ;;  %6425 = vst [vmem:[#allocation100_spill] sm:$0xff] %v4098_v6  ;;  %v161_v6 = vld [vmem:[#allocation2 + $0x310] sm:$0xff]  ;;  %v100_v46 = vld [vmem:[#allocation2 + $0x128] sm:$0xff]  ;;  %v4122_v8 = vsub.f32 %v98_v48, %v259_v43  ;;  %v4124_v32 = vpack.c.bf16 %v1605_v53, %v1601_v28  ;;  %3384 = vmatpush1.bf16.msra.mxu0 %v4114_v37  ;;  %v4132_v56 = vpack.c.bf16 %v261_v4, %v257_v60 }
  0x47   :  { %6426 = vst [vmem:[#allocation101_spill] sm:$0xff] %v4100_v18  ;;  %6427 = vst [vmem:[#allocation102_spill] sm:$0xff] %v4104_v3  ;;  %v159_v18 = vld [vmem:[#allocation2 + $0x300] sm:$0xff]  ;;  %v4126_v3 = vsub.f32 %v160_v1, %v1601_v28  ;;  %3002 = vmatprep.subr.bf16.mxu1 %v4118_v54  ;;  %v4134_v7 = vsub.f32 %v95_v2, %v257_v60  ;;  %v4136_v14 = vsub.f32 %v97_v12, %v261_v4 }
  0x48   :  { %6428 = vst [vmem:[#allocation103_spill] sm:$0xff] %v4106_v62  ;;  %6429 = vst [vmem:[#allocation104_spill] sm:$0xff] %v4108_v23  ;;  %v102_v23 = vld [vmem:[#allocation2 + $0x138] sm:$0xff]  ;;  %v164_v62 = vld [vmem:[#allocation2 + $0x328] sm:$0xff]  ;;  %v1603_v48 = vand.u32 4294901760, %v159_v18  ;;  %3386 = vmatprep.subr.bf16.mxu0 %v4124_v32  ;;  %v1607_v1 = vand.u32 4294901760, %v161_v6  ;;  %3004 = vmatpush1.bf16.msra.mxu1 %v4132_v56 }
  0x49   :  { %6430 = vst [vmem:[#allocation105_spill] sm:$0xff] %v4112_v26  ;;  %6431 = vst [vmem:[#allocation106_spill] sm:$0xff] %v4114_v37  ;;  %v4128_v26 = vsub.f32 %v162_v22, %v1605_v53  ;;  %v263_v45 = vand.u32 4294901760, %v100_v46  ;;  %v267_v22 = vand.u32 4294901760, %v102_v23  ;;  %v1609_v43 = vand.u32 4294901760, %v164_v62 }
  0x4a   :  { %6432 = vst [vmem:[#allocation107_spill] sm:$0xff] %v4116_v16  ;;  %6433 = vst [vmem:[#allocation108_spill] sm:$0xff] %v4118_v54  ;;  %v4140_v28 = vsub.f32 %v159_v18, %v1603_v48  ;;  %v1613_v53 = vand.u32 4294901760, %v166_v10  ;;  %v265_v37 = vand.u32 4294901760, %v99_v11  ;;  %v269_v54 = vand.u32 4294901760, %v101_v15  ;;  %v105_v16 = vld [vmem:[#allocation2 + $0x150] sm:$0xff] }
  0x4b   :  { %6434 = vst [vmem:[#allocation109_spill] sm:$0xff] %v4120_v50  ;;  %6435 = vst [vmem:[#allocation110_spill] sm:$0xff] %v4122_v8  ;;  %v4142_v60 = vpack.c.bf16 %v1607_v1, %v1603_v48  ;;  %v4144_v12 = vsub.f32 %v161_v6, %v1607_v1  ;;  %v4146_v4 = vpack.c.bf16 %v267_v22, %v263_v45  ;;  %v170_v50 = vld [vmem:[#allocation2 + $0x358] sm:$0xff]  ;;  %v103_v48 = vld [vmem:[#allocation2 + $0x140] sm:$0xff] }
  0x4c   :  { %6436 = vst [vmem:[#allocation111_spill] sm:$0xff] %v4124_v32  ;;  %6437 = vst [vmem:[#allocation112_spill] sm:$0xff] %v4126_v3  ;;  %v165_v3 = vld [vmem:[#allocation2 + $0x330] sm:$0xff]  ;;  %v4148_v2 = vsub.f32 %v100_v46, %v263_v45  ;;  %v104_v32 = vld [vmem:[#allocation2 + $0x148] sm:$0xff]  ;;  %v4150_v8 = vsub.f32 %v102_v23, %v267_v22  ;;  %v4152_v18 = vpack.c.bf16 %v1613_v53, %v1609_v43 }
  0x4d   :  { %6438 = vst [vmem:[#allocation113_spill] sm:$0xff] %v4128_v26  ;;  %6439 = vst [vmem:[#allocation114_spill] sm:$0xff] %v4132_v56  ;;  %v163_v26 = vld [vmem:[#allocation2 + $0x320] sm:$0xff]  ;;  %v4154_v56 = vsub.f32 %v164_v62, %v1609_v43  ;;  %3388 = vmatpush1.bf16.msra.mxu0 %v4142_v60  ;;  %3006 = vmatprep.subr.bf16.mxu1 %v4146_v4  ;;  %v4160_v6 = vpack.c.bf16 %v269_v54, %v265_v37  ;;  %v1615_v62 = vand.u32 4294901760, %v165_v3 }
  0x4e   :  { %6440 = vst [vmem:[#allocation115_spill] sm:$0xff] %v4134_v7  ;;  %6441 = vst [vmem:[#allocation116_spill] sm:$0xff] %v4136_v14  ;;  %v106_v14 = vld [vmem:[#allocation2 + $0x158] sm:$0xff]  ;;  %v168_v7 = vld [vmem:[#allocation2 + $0x348] sm:$0xff]  ;;  %v4162_v46 = vsub.f32 %v99_v11, %v265_v37  ;;  %v4164_v1 = vsub.f32 %v101_v15, %v269_v54  ;;  %v1611_v23 = vand.u32 4294901760, %v163_v26  ;;  %3390 = vmatprep.subr.bf16.mxu0 %v4152_v18  ;;  %v271_v45 = vand.u32 4294901760, %v104_v32 }
  0x4f   :  { %6442 = vst [vmem:[#allocation117_spill] sm:$0xff] %v4140_v28  ;;  %6443 = vst [vmem:[#allocation118_spill] sm:$0xff] %v4142_v60  ;;  %v4156_v28 = vsub.f32 %v166_v10, %v1613_v53  ;;  %v275_v10 = vand.u32 4294901760, %v106_v14  ;;  %v1617_v22 = vand.u32 4294901760, %v168_v7  ;;  %3008 = vmatpush1.bf16.msra.mxu1 %v4160_v6  ;;  %v1621_v53 = vand.u32 4294901760, %v170_v50 }
  0x50   :  { %6444 = vst [vmem:[#allocation119_spill] sm:$0xff] %v4144_v12  ;;  %6445 = vst [vmem:[#allocation120_spill] sm:$0xff] %v4146_v4  ;;  %v4168_v43 = vsub.f32 %v163_v26, %v1611_v23  ;;  %v273_v60 = vand.u32 4294901760, %v103_v48  ;;  %v277_v4 = vand.u32 4294901760, %v105_v16  ;;  %v4170_v37 = vpack.c.bf16 %v1615_v62, %v1611_v23  ;;  %v107_v23 = vld [vmem:[#allocation2 + $0x160] sm:$0xff]  ;;  %v109_v12 = vld [vmem:[#allocation2 + $0x170] sm:$0xff] }
  0x51   :  { %6446 = vst [vmem:[#allocation121_spill] sm:$0xff] %v4148_v2  ;;  %6447 = vst [vmem:[#allocation122_spill] sm:$0xff] %v4150_v8  ;;  %v4172_v15 = vsub.f32 %v165_v3, %v1615_v62  ;;  %v4174_v54 = vpack.c.bf16 %v275_v10, %v271_v45  ;;  %v4176_v11 = vsub.f32 %v104_v32, %v271_v45  ;;  %v174_v2 = vld [vmem:[#allocation2 + $0x378] sm:$0xff] }
  0x52   :  { %6448 = vst [vmem:[#allocation123_spill] sm:$0xff] %v4152_v18  ;;  %6449 = vst [vmem:[#allocation124_spill] sm:$0xff] %v4154_v56  ;;  %v169_v56 = vld [vmem:[#allocation2 + $0x350] sm:$0xff]  ;;  %v108_v18 = vld [vmem:[#allocation2 + $0x168] sm:$0xff]  ;;  %v4178_v8 = vsub.f32 %v106_v14, %v275_v10  ;;  %v4180_v26 = vpack.c.bf16 %v1621_v53, %v1617_v22  ;;  %3392 = vmatpush1.bf16.msra.mxu0 %v4170_v37  ;;  %v4188_v3 = vpack.c.bf16 %v277_v4, %v273_v60 }
  0x53   :  { %6450 = vst [vmem:[#allocation125_spill] sm:$0xff] %v4156_v28  ;;  %6451 = vst [vmem:[#allocation126_spill] sm:$0xff] %v4160_v6  ;;  %v167_v28 = vld [vmem:[#allocation2 + $0x340] sm:$0xff]  ;;  %v4182_v6 = vsub.f32 %v168_v7, %v1617_v22  ;;  %3010 = vmatprep.subr.bf16.mxu1 %v4174_v54  ;;  %v4190_v32 = vsub.f32 %v103_v48, %v273_v60  ;;  %v4192_v62 = vsub.f32 %v105_v16, %v277_v4 }
  0x54   :  { %6452 = vst [vmem:[#allocation127_spill] sm:$0xff] %v4162_v46  ;;  %6453 = vst [vmem:[#allocation128_spill] sm:$0xff] %v4164_v1  ;;  %v110_v1 = vld [vmem:[#allocation2 + $0x178] sm:$0xff]  ;;  %v172_v46 = vld [vmem:[#allocation2 + $0x368] sm:$0xff]  ;;  %v1619_v14 = vand.u32 4294901760, %v167_v28  ;;  %3394 = vmatprep.subr.bf16.mxu0 %v4180_v26  ;;  %v1623_v7 = vand.u32 4294901760, %v169_v56  ;;  %3012 = vmatpush1.bf16.msra.mxu1 %v4188_v3 }
  0x55   :  { %6454 = vst [vmem:[#allocation129_spill] sm:$0xff] %v4168_v43  ;;  %6455 = vst [vmem:[#allocation130_spill] sm:$0xff] %v4170_v37  ;;  %v4184_v43 = vsub.f32 %v170_v50, %v1621_v53  ;;  %v279_v45 = vand.u32 4294901760, %v108_v18  ;;  %v283_v50 = vand.u32 4294901760, %v110_v1  ;;  %v1625_v10 = vand.u32 4294901760, %v172_v46 }
  0x56   :  { %6456 = vst [vmem:[#allocation131_spill] sm:$0xff] %v4172_v15  ;;  %6457 = vst [vmem:[#allocation132_spill] sm:$0xff] %v4174_v54  ;;  %v4196_v22 = vsub.f32 %v167_v28, %v1619_v14  ;;  %v1629_v53 = vand.u32 4294901760, %v174_v2  ;;  %v281_v37 = vand.u32 4294901760, %v107_v23  ;;  %v285_v54 = vand.u32 4294901760, %v109_v12  ;;  %v113_v15 = vld [vmem:[#allocation2 + $0x190] sm:$0xff] }
  0x57   :  { %6458 = vst [vmem:[#allocation133_spill] sm:$0xff] %v4176_v11  ;;  %6459 = vst [vmem:[#allocation134_spill] sm:$0xff] %v4178_v8  ;;  %v4198_v60 = vpack.c.bf16 %v1623_v7, %v1619_v14  ;;  %v4200_v16 = vsub.f32 %v169_v56, %v1623_v7  ;;  %v4202_v4 = vpack.c.bf16 %v283_v50, %v279_v45  ;;  %v178_v11 = vld [vmem:[#allocation2 + $0x398] sm:$0xff]  ;;  %v111_v14 = vld [vmem:[#allocation2 + $0x180] sm:$0xff] }
  0x58   :  { %6460 = vst [vmem:[#allocation135_spill] sm:$0xff] %v4180_v26  ;;  %6461 = vst [vmem:[#allocation136_spill] sm:$0xff] %v4182_v6  ;;  %v173_v6 = vld [vmem:[#allocation2 + $0x370] sm:$0xff]  ;;  %v4204_v48 = vsub.f32 %v108_v18, %v279_v45  ;;  %v112_v26 = vld [vmem:[#allocation2 + $0x188] sm:$0xff]  ;;  %v4206_v8 = vsub.f32 %v110_v1, %v283_v50  ;;  %v4208_v28 = vpack.c.bf16 %v1629_v53, %v1625_v10 }
  0x59   :  { %6462 = vst [vmem:[#allocation137_spill] sm:$0xff] %v4184_v43  ;;  %6463 = vst [vmem:[#allocation138_spill] sm:$0xff] %v4188_v3  ;;  %v171_v43 = vld [vmem:[#allocation2 + $0x360] sm:$0xff]  ;;  %v4210_v3 = vsub.f32 %v172_v46, %v1625_v10  ;;  %3396 = vmatpush1.bf16.msra.mxu0 %v4198_v60  ;;  %3014 = vmatprep.subr.bf16.mxu1 %v4202_v4  ;;  %v4216_v56 = vpack.c.bf16 %v285_v54, %v281_v37  ;;  %v1631_v46 = vand.u32 4294901760, %v173_v6 }
  0x5a   :  { %6464 = vst [vmem:[#allocation139_spill] sm:$0xff] %v4190_v32  ;;  %6465 = vst [vmem:[#allocation140_spill] sm:$0xff] %v4192_v62  ;;  %v114_v62 = vld [vmem:[#allocation2 + $0x198] sm:$0xff]  ;;  %v176_v32 = vld [vmem:[#allocation2 + $0x388] sm:$0xff]  ;;  %v4218_v18 = vsub.f32 %v107_v23, %v281_v37  ;;  %v4220_v7 = vsub.f32 %v109_v12, %v285_v54  ;;  %v1627_v1 = vand.u32 4294901760, %v171_v43  ;;  %3398 = vmatprep.subr.bf16.mxu0 %v4208_v28  ;;  %v287_v45 = vand.u32 4294901760, %v112_v26 }
  0x5b   :  { %6466 = vst [vmem:[#allocation141_spill] sm:$0xff] %v4196_v22  ;;  %6467 = vst [vmem:[#allocation142_spill] sm:$0xff] %v4198_v60  ;;  %v4212_v22 = vsub.f32 %v174_v2, %v1629_v53  ;;  %v291_v2 = vand.u32 4294901760, %v114_v62  ;;  %v1633_v50 = vand.u32 4294901760, %v176_v32  ;;  %3016 = vmatpush1.bf16.msra.mxu1 %v4216_v56  ;;  %v1637_v53 = vand.u32 4294901760, %v178_v11 }
  0x5c   :  { %6468 = vst [vmem:[#allocation143_spill] sm:$0xff] %v4200_v16  ;;  %6469 = vst [vmem:[#allocation144_spill] sm:$0xff] %v4202_v4  ;;  %v4224_v10 = vsub.f32 %v171_v43, %v1627_v1  ;;  %v289_v60 = vand.u32 4294901760, %v111_v14  ;;  %v293_v4 = vand.u32 4294901760, %v113_v15  ;;  %v4226_v37 = vpack.c.bf16 %v1631_v46, %v1627_v1  ;;  %v115_v1 = vld [vmem:[#allocation2 + $0x1a0] sm:$0xff]  ;;  %v117_v16 = vld [vmem:[#allocation2 + $0x1b0] sm:$0xff] }
  0x5d   :  { %6470 = vst [vmem:[#allocation145_spill] sm:$0xff] %v4204_v48  ;;  %6471 = vst [vmem:[#allocation146_spill] sm:$0xff] %v4206_v8  ;;  %v4228_v12 = vsub.f32 %v173_v6, %v1631_v46  ;;  %v4230_v54 = vpack.c.bf16 %v291_v2, %v287_v45  ;;  %v4232_v23 = vsub.f32 %v112_v26, %v287_v45  ;;  %v182_v48 = vld [vmem:[#allocation2 + $0x3b8] sm:$0xff] }
  0x5e   :  { %6472 = vst [vmem:[#allocation147_spill] sm:$0xff] %v4208_v28  ;;  %6473 = vst [vmem:[#allocation148_spill] sm:$0xff] %v4210_v3  ;;  %v177_v3 = vld [vmem:[#allocation2 + $0x390] sm:$0xff]  ;;  %v116_v28 = vld [vmem:[#allocation2 + $0x1a8] sm:$0xff]  ;;  %v4234_v8 = vsub.f32 %v114_v62, %v291_v2  ;;  %v4236_v43 = vpack.c.bf16 %v1637_v53, %v1633_v50  ;;  %3400 = vmatpush1.bf16.msra.mxu0 %v4226_v37  ;;  %v4244_v6 = vpack.c.bf16 %v293_v4, %v289_v60 }
  0x5f   :  { %6474 = vst [vmem:[#allocation149_spill] sm:$0xff] %v4212_v22  ;;  %6475 = vst [vmem:[#allocation150_spill] sm:$0xff] %v4216_v56  ;;  %v175_v22 = vld [vmem:[#allocation2 + $0x380] sm:$0xff]  ;;  %v4238_v56 = vsub.f32 %v176_v32, %v1633_v50  ;;  %3018 = vmatprep.subr.bf16.mxu1 %v4230_v54  ;;  %v4246_v26 = vsub.f32 %v111_v14, %v289_v60  ;;  %v4248_v46 = vsub.f32 %v113_v15, %v293_v4 }
  0x60   :  { %6476 = vst [vmem:[#allocation151_spill] sm:$0xff] %v4218_v18  ;;  %6477 = vst [vmem:[#allocation152_spill] sm:$0xff] %v4220_v7  ;;  %v118_v7 = vld [vmem:[#allocation2 + $0x1b8] sm:$0xff]  ;;  %v180_v18 = vld [vmem:[#allocation2 + $0x3a8] sm:$0xff]  ;;  %v1635_v62 = vand.u32 4294901760, %v175_v22  ;;  %3402 = vmatprep.subr.bf16.mxu0 %v4236_v43  ;;  %v1639_v32 = vand.u32 4294901760, %v177_v3  ;;  %3020 = vmatpush1.bf16.msra.mxu1 %v4244_v6 }
  0x61   :  { %6478 = vst [vmem:[#allocation153_spill] sm:$0xff] %v4224_v10  ;;  %6479 = vst [vmem:[#allocation154_spill] sm:$0xff] %v4226_v37  ;;  %v4240_v10 = vsub.f32 %v178_v11, %v1637_v53  ;;  %v295_v45 = vand.u32 4294901760, %v116_v28  ;;  %v299_v11 = vand.u32 4294901760, %v118_v7  ;;  %v1641_v2 = vand.u32 4294901760, %v180_v18 }
  0x62   :  { %6480 = vst [vmem:[#allocation155_spill] sm:$0xff] %v4228_v12  ;;  %6481 = vst [vmem:[#allocation156_spill] sm:$0xff] %v4230_v54  ;;  %v4252_v50 = vsub.f32 %v175_v22, %v1635_v62  ;;  %v1645_v53 = vand.u32 4294901760, %v182_v48  ;;  %v297_v37 = vand.u32 4294901760, %v115_v1  ;;  %v301_v54 = vand.u32 4294901760, %v117_v16  ;;  %v121_v12 = vld [vmem:[#allocation2 + $0x1d0] sm:$0xff] }
  0x63   :  { %6482 = vst [vmem:[#allocation157_spill] sm:$0xff] %v4232_v23  ;;  %6483 = vst [vmem:[#allocation158_spill] sm:$0xff] %v4234_v8  ;;  %v4254_v60 = vpack.c.bf16 %v1639_v32, %v1635_v62  ;;  %v4256_v15 = vsub.f32 %v177_v3, %v1639_v32  ;;  %v4258_v4 = vpack.c.bf16 %v299_v11, %v295_v45  ;;  %v186_v23 = vld [vmem:[#allocation2 + $0x3d8] sm:$0xff]  ;;  %v119_v62 = vld [vmem:[#allocation2 + $0x1c0] sm:$0xff] }
  0x64   :  { %6484 = vst [vmem:[#allocation159_spill] sm:$0xff] %v4236_v43  ;;  %6485 = vst [vmem:[#allocation160_spill] sm:$0xff] %v4238_v56  ;;  %v181_v56 = vld [vmem:[#allocation2 + $0x3b0] sm:$0xff]  ;;  %v4260_v14 = vsub.f32 %v116_v28, %v295_v45  ;;  %v120_v43 = vld [vmem:[#allocation2 + $0x1c8] sm:$0xff]  ;;  %v4262_v8 = vsub.f32 %v118_v7, %v299_v11  ;;  %v4264_v22 = vpack.c.bf16 %v1645_v53, %v1641_v2 }
  0x65   :  { %6486 = vst [vmem:[#allocation161_spill] sm:$0xff] %v4240_v10  ;;  %6487 = vst [vmem:[#allocation162_spill] sm:$0xff] %v4244_v6  ;;  %v179_v10 = vld [vmem:[#allocation2 + $0x3a0] sm:$0xff]  ;;  %v4266_v6 = vsub.f32 %v180_v18, %v1641_v2  ;;  %3404 = vmatpush1.bf16.msra.mxu0 %v4254_v60  ;;  %3022 = vmatprep.subr.bf16.mxu1 %v4258_v4  ;;  %v4272_v3 = vpack.c.bf16 %v301_v54, %v297_v37  ;;  %v1647_v18 = vand.u32 4294901760, %v181_v56 }
  0x66   :  { %6488 = vst [vmem:[#allocation163_spill] sm:$0xff] %v4246_v26  ;;  %6489 = vst [vmem:[#allocation164_spill] sm:$0xff] %v4248_v46  ;;  %v122_v46 = vld [vmem:[#allocation2 + $0x1d8] sm:$0xff]  ;;  %v184_v26 = vld [vmem:[#allocation2 + $0x3c8] sm:$0xff]  ;;  %v4274_v28 = vsub.f32 %v115_v1, %v297_v37  ;;  %v4276_v32 = vsub.f32 %v117_v16, %v301_v54  ;;  %v1643_v7 = vand.u32 4294901760, %v179_v10  ;;  %3406 = vmatprep.subr.bf16.mxu0 %v4264_v22  ;;  %v303_v45 = vand.u32 4294901760, %v120_v43 }
  0x67   :  { %6490 = vst [vmem:[#allocation165_spill] sm:$0xff] %v4252_v50  ;;  %6491 = vst [vmem:[#allocation166_spill] sm:$0xff] %v4254_v60  ;;  %v4268_v50 = vsub.f32 %v182_v48, %v1645_v53  ;;  %v307_v48 = vand.u32 4294901760, %v122_v46  ;;  %v1649_v11 = vand.u32 4294901760, %v184_v26  ;;  %3024 = vmatpush1.bf16.msra.mxu1 %v4272_v3  ;;  %v1653_v53 = vand.u32 4294901760, %v186_v23 }
  0x68   :  { %6492 = vst [vmem:[#allocation167_spill] sm:$0xff] %v4256_v15  ;;  %6493 = vst [vmem:[#allocation168_spill] sm:$0xff] %v4258_v4  ;;  %v4280_v2 = vsub.f32 %v179_v10, %v1643_v7  ;;  %v305_v60 = vand.u32 4294901760, %v119_v62  ;;  %v309_v4 = vand.u32 4294901760, %v121_v12  ;;  %v4282_v37 = vpack.c.bf16 %v1647_v18, %v1643_v7  ;;  %v123_v7 = vld [vmem:[#allocation2 + $0x1e0] sm:$0xff]  ;;  %v125_v15 = vld [vmem:[#allocation2 + $0x1f0] sm:$0xff] }
  0x69   :  { %6494 = vst [vmem:[#allocation169_spill] sm:$0xff] %v4260_v14  ;;  %6495 = vst [vmem:[#allocation170_spill] sm:$0xff] %v4262_v8  ;;  %v4284_v16 = vsub.f32 %v181_v56, %v1647_v18  ;;  %v4286_v54 = vpack.c.bf16 %v307_v48, %v303_v45  ;;  %v4288_v1 = vsub.f32 %v120_v43, %v303_v45  ;;  %v190_v14 = vld [vmem:[#allocation2 + $0x3f8] sm:$0xff] }
  0x6a   :  { %6496 = vst [vmem:[#allocation171_spill] sm:$0xff] %v4264_v22  ;;  %6497 = vst [vmem:[#allocation172_spill] sm:$0xff] %v4266_v6  ;;  %v185_v6 = vld [vmem:[#allocation2 + $0x3d0] sm:$0xff]  ;;  %v124_v22 = vld [vmem:[#allocation2 + $0x1e8] sm:$0xff]  ;;  %v4290_v8 = vsub.f32 %v122_v46, %v307_v48  ;;  %v4292_v10 = vpack.c.bf16 %v1653_v53, %v1649_v11  ;;  %3408 = vmatpush1.bf16.msra.mxu0 %v4282_v37  ;;  %v4300_v56 = vpack.c.bf16 %v309_v4, %v305_v60 }
  0x6b   :  { %6498 = vst [vmem:[#allocation173_spill] sm:$0xff] %v4268_v50  ;;  %6499 = vst [vmem:[#allocation174_spill] sm:$0xff] %v4272_v3  ;;  %v183_v50 = vld [vmem:[#allocation2 + $0x3c0] sm:$0xff]  ;;  %v4294_v3 = vsub.f32 %v184_v26, %v1649_v11  ;;  %3026 = vmatprep.subr.bf16.mxu1 %v4286_v54  ;;  %v4302_v43 = vsub.f32 %v119_v62, %v305_v60  ;;  %v4304_v18 = vsub.f32 %v121_v12, %v309_v4  ;;  %v189_v62 = vld [vmem:[#allocation2 + $0x3f0] sm:$0xff] }
  0x6c   :  { %6500 = vst [vmem:[#allocation175_spill] sm:$0xff] %v4274_v28  ;;  %6501 = vst [vmem:[#allocation176_spill] sm:$0xff] %v4276_v32  ;;  %v126_v32 = vld [vmem:[#allocation2 + $0x1f8] sm:$0xff]  ;;  %v188_v28 = vld [vmem:[#allocation2 + $0x3e8] sm:$0xff]  ;;  %v1651_v46 = vand.u32 4294901760, %v183_v50  ;;  %3410 = vmatprep.subr.bf16.mxu0 %v4292_v10  ;;  %v1655_v26 = vand.u32 4294901760, %v185_v6  ;;  %3028 = vmatpush1.bf16.msra.mxu1 %v4300_v56 }
  0x6d   :  { %6502 = vst [vmem:[#allocation177_spill] sm:$0xff] %v4280_v2  ;;  %6503 = vst [vmem:[#allocation178_spill] sm:$0xff] %v4282_v37  ;;  %v4296_v2 = vsub.f32 %v186_v23, %v1653_v53  ;;  %v311_v45 = vand.u32 4294901760, %v124_v22  ;;  %v315_v23 = vand.u32 4294901760, %v126_v32  ;;  %v1657_v48 = vand.u32 4294901760, %v188_v28 }
  0x6e   :  { %6504 = vst [vmem:[#allocation179_spill] sm:$0xff] %v4284_v16  ;;  %6505 = vst [vmem:[#allocation180_spill] sm:$0xff] %v4286_v54  ;;  %v4308_v11 = vsub.f32 %v183_v50, %v1651_v46  ;;  %v1661_v53 = vand.u32 4294901760, %v190_v14  ;;  %v313_v37 = vand.u32 4294901760, %v123_v7  ;;  %v317_v54 = vand.u32 4294901760, %v125_v15 }
  0x6f   :  { %6506 = vst [vmem:[#allocation181_spill] sm:$0xff] %v4288_v1  ;;  %6507 = vst [vmem:[#allocation182_spill] sm:$0xff] %v4290_v8  ;;  %v4312_v60 = vsub.f32 %v185_v6, %v1655_v26  ;;  %v4314_v12 = vpack.c.bf16 %v315_v23, %v311_v45  ;;  %v4316_v4 = vsub.f32 %v124_v22, %v311_v45  ;;  %v6001_v45 = vand.u32 4294901760, %v3895_v19 }
  0x70   :  { %6508 = vst [vmem:[#allocation183_spill] sm:$0xff] %v4292_v10  ;;  %6509 = vst [vmem:[#allocation184_spill] sm:$0xff] %v4294_v3  ;;  %v4310_v3 = vpack.c.bf16 %v1655_v26, %v1651_v46  ;;  %v4318_v10 = vsub.f32 %v126_v32, %v315_v23  ;;  %v4324_v50 = vsub.f32 %v190_v14, %v1661_v53  ;;  %v1663_v32 = vand.u32 4294901760, %v189_v62 }
  0x71   :  { %6510 = vst [vmem:[#allocation185_spill] sm:$0xff] %v4296_v2  ;;  %6511 = vst [vmem:[#allocation186_spill] sm:$0xff] %v4300_v56  ;;  %v187_v2 = vld [vmem:[#allocation2 + $0x3e0] sm:$0xff]  ;;  %v4322_v56 = vsub.f32 %v188_v28, %v1657_v48  ;;  %3030 = vmatprep.subr.bf16.mxu1 %v4314_v12  ;;  %v4328_v46 = vpack.c.bf16 %v317_v54, %v313_v37  ;;  %v4330_v6 = vsub.f32 %v123_v7, %v313_v37 }
  0x72   :  { %6512 = vst [vmem:[#allocation187_spill] sm:$0xff] %v4302_v43  ;;  %6513 = vst [vmem:[#allocation188_spill] sm:$0xff] %v4304_v18  ;;  %v4320_v18 = vpack.c.bf16 %v1661_v53, %v1657_v48  ;;  %3412 = vmatpush1.bf16.msra.mxu0 %v4310_v3  ;;  %v4332_v26 = vsub.f32 %v125_v15, %v317_v54  ;;  %v1659_v22 = vand.u32 4294901760, %v187_v2  ;;  %v6004_v28 = vand.u32 4294901760, %v3899_v27 }
  0x73   :  { %6514 = vst [vmem:[#allocation189_spill] sm:$0xff] %v4308_v11  ;;  %6515 = vst [vmem:[#allocation190_spill] sm:$0xff] %v4310_v3  ;;  %3032 = vmatpush1.bf16.msra.mxu1 %v4328_v46  ;;  %v4346_v7 = vsub.f32 %v189_v62, %v1663_v32  ;;  %v355_v53 = vsub.f32 %v3895_v19, %v6001_v45  ;;  %v6530_v37 = vand.u32 4294901760, %v3905_v33 }
  0x74   :  { %6516 = vst [vmem:[#allocation191_spill] sm:$0xff] %v4312_v60  ;;  %6517 = vst [vmem:[#allocation192_spill] sm:$0xff] %v4314_v12  ;;  %3414 = vmatprep.subr.bf16.mxu0 %v4320_v18  ;;  %v4339_v23 = vsub.f32 %v187_v2, %v1659_v22  ;;  %v4344_v54 = vpack.c.bf16 %v1663_v32, %v1659_v22  ;;  %v367_v14 = vsub.f32 %v3899_v27, %v6004_v28 }
  0x75   :  { %6518 = vst [vmem:[#allocation193_spill] sm:$0xff] %v4316_v4  ;;  %6519 = vst [vmem:[#allocation194_spill] sm:$0xff] %v4318_v10  ;;  %v6529_v2 = vand.u32 4294901760, %v3903_v29  ;;  %v1713_v15 = vsub.f32 %v3905_v33, %v6530_v37  ;;  %v6531_v22 = vand.u32 4294901760, %v3909_v35  ;;  %v6532_v32 = vand.u32 4294901760, %v3911_v36 }
  0x76   :  { %6520 = vst [vmem:[#allocation195_spill] sm:$0xff] %v4320_v18  ;;  %6521 = vst [vmem:[#allocation196_spill] sm:$0xff] %v4322_v56  ;;  %3416 = vmatpush1.bf16.msra.mxu0 %v4344_v54  ;;  %v368_v28 = vand.u32 4294901760, %v367_v14  ;;  %v6024_v18 = vand.u32 4294901760, %v3915_v39 }
  0x77   :  { %6522 = vst [vmem:[#allocation197_spill] sm:$0xff] %v4324_v50  ;;  %6523 = vst [vmem:[#allocation198_spill] sm:$0xff] %v4328_v46  ;;  %v1701_v48 = vsub.f32 %v3903_v29, %v6529_v2  ;;  %v361_v62 = vsub.f32 %v3909_v35, %v6531_v22  ;;  %v373_v45 = vsub.f32 %v3911_v36, %v6532_v32  ;;  %v356_v46 = vand.u32 4294901760, %v355_v53 }
  0x78   :  { %6524 = vst [vmem:[#allocation199_spill] sm:$0xff] %v4330_v6  ;;  %6525 = vst [vmem:[#allocation200_spill] sm:$0xff] %v4332_v26  ;;  %v6022_v2 = vand.u32 4294901760, %v3920_v49  ;;  %v1714_v3 = vand.u32 4294901760, %v1713_v15  ;;  %v1707_v22 = vsub.f32 %v3915_v39, %v6024_v18  ;;  %v6019_v53 = vand.u32 4294901760, %v3924_v51 }
  0x79   :  { %6526 = vst [vmem:[#allocation201_spill] sm:$0xff] %v4339_v23  ;;  %6527 = vst [vmem:[#allocation202_spill] sm:$0xff] %v4344_v54  ;;  %v1702_v12 = vand.u32 4294901760, %v1701_v48  ;;  %v362_v29 = vand.u32 4294901760, %v361_v62  ;;  %v374_v37 = vand.u32 4294901760, %v373_v45  ;;  %v3033_v33 = vpack.c.bf16 %v368_v28, %v356_v46 }
  0x7a   :  { %6528 = vst [vmem:[#allocation203_spill] sm:$0xff] %v4346_v7  ;;  %v1719_v32 = vsub.f32 %v3920_v49, %v6022_v2  ;;  %v6020_v36 = vand.u32 4294901760, %v3926_v55  ;;  %v6021_v48 = vand.u32 4294901760, %v3930_v57  ;;  %v1708_v45 = vand.u32 4294901760, %v1707_v22 }
  0x7b   :  { %v3417_v14 = vpack.c.bf16 %v1714_v3, %v1702_v12  ;;  %v4376_v54 = vpack.c.bf16 %v374_v37, %v362_v29  ;;  %3034 = vmatprep.subr.bf16.mxu1 %v3033_v33  ;;  %v379_v28 = vsub.f32 %v3924_v51, %v6019_v53  ;;  %v6023_v15 = vand.u32 4294901760, %v3932_v58 }
  0x7c   :  { %v1720_v46 = vand.u32 4294901760, %v1719_v32  ;;  %v391_v3 = vsub.f32 %v3926_v55, %v6020_v36  ;;  %v1725_v29 = vsub.f32 %v3930_v57, %v6021_v48  ;;  %v6025_v12 = vand.u32 4294901760, %v3938_v63 }
  0x7d   :  { %3418 = vmatprep.subr.bf16.mxu0 %v3417_v14  ;;  %v6026_v33 = vand.u32 4294901760, %v3940_v0  ;;  %v380_v37 = vand.u32 4294901760, %v379_v28  ;;  %v1737_v22 = vsub.f32 %v3932_v58, %v6023_v15  ;;  %v6031_v32 = vand.u32 4294901760, %v3944_v9 }
  0x7e   :  { %v4392_v62 = vpack.c.bf16 %v1720_v46, %v1708_v45  ;;  %v392_v14 = vand.u32 4294901760, %v391_v3  ;;  %v1726_v53 = vand.u32 4294901760, %v1725_v29  ;;  %v385_v36 = vsub.f32 %v3938_v63, %v6025_v12 }
  0x7f   :  { %v397_v48 = vsub.f32 %v3940_v0, %v6026_v33  ;;  %v1738_v2 = vand.u32 4294901760, %v1737_v22  ;;  %v1731_v45 = vsub.f32 %v3944_v9, %v6031_v32  ;;  %v6029_v46 = vand.u32 4294901760, %v3948_v17 }
  0x80   :  { %v4408_v28 = vpack.c.bf16 %v392_v14, %v380_v37  ;;  %v386_v15 = vand.u32 4294901760, %v385_v36  ;;  %v6030_v29 = vand.u32 4294901760, %v3952_v20  ;;  %v6032_v22 = vand.u32 4294901760, %v3954_v24 }
  0x81   :  { %v398_v3 = vand.u32 4294901760, %v397_v48  ;;  %v4411_v18 = vpack.c.bf16 %v1738_v2, %v1726_v53  ;;  %v1732_v12 = vand.u32 4294901760, %v1731_v45  ;;  %v1743_v33 = vsub.f32 %v3948_v17, %v6029_v46 }
  0x82   :  { %v403_v37 = vsub.f32 %v3952_v20, %v6030_v29  ;;  %v6037_v36 = vand.u32 4294901760, %v3958_v30  ;;  %v6038_v48 = vand.u32 4294901760, %v3960_v31  ;;  %v415_v2 = vsub.f32 %v3954_v24, %v6032_v22 }
  0x83   :  { %v4417_v0 = vpack.c.bf16 %v398_v3, %v386_v15  ;;  %v1744_v14 = vand.u32 4294901760, %v1743_v33  ;;  %v6043_v53 = vand.u32 4294901760, %v3966_v41  ;;  %v6044_v45 = vand.u32 4294901760, %v3968_v42 }
  0x84   :  { %v404_v46 = vand.u32 4294901760, %v403_v37  ;;  %v1749_v15 = vsub.f32 %v3958_v30, %v6037_v36  ;;  %v1761_v3 = vsub.f32 %v3960_v31, %v6038_v48  ;;  %v6047_v29 = vand.u32 4294901760, %v3972_v52 }
  0x85   :  { %v4436_v33 = vpack.c.bf16 %v1744_v14, %v1732_v12  ;;  %v416_v32 = vand.u32 4294901760, %v415_v2  ;;  %v409_v22 = vsub.f32 %v3966_v41, %v6043_v53  ;;  %v421_v37 = vsub.f32 %v3968_v42, %v6044_v45 }
  0x86   :  { %v1750_v24 = vand.u32 4294901760, %v1749_v15  ;;  %v1762_v20 = vand.u32 4294901760, %v1761_v3  ;;  %v1755_v36 = vsub.f32 %v3972_v52, %v6047_v29  ;;  %v6045_v48 = vand.u32 4294901760, %v3976_v61 }
  0x87   :  { %v4448_v31 = vpack.c.bf16 %v416_v32, %v404_v46  ;;  %v410_v12 = vand.u32 4294901760, %v409_v22  ;;  %v422_v14 = vand.u32 4294901760, %v421_v37  ;;  %v6046_v2 = vand.u32 4294901760, %v3980_v5 }
  0x88   :  { %v4451_v30 = vpack.c.bf16 %v1762_v20, %v1750_v24  ;;  %v1756_v53 = vand.u32 4294901760, %v1755_v36  ;;  %v1767_v15 = vsub.f32 %v3976_v61, %v6045_v48  ;;  %v6048_v3 = vand.u32 4294901760, %v3982_v13 }
  0x89   :  { %v4457_v45 = vpack.c.bf16 %v422_v14, %v410_v12  ;;  %v427_v32 = vsub.f32 %v3980_v5, %v6046_v2  ;;  %v6053_v46 = vand.u32 4294901760, %v3986_v40  ;;  %v6054_v22 = vand.u32 4294901760, %v3988_v25 }
  0x8a   :  { %v1768_v37 = vand.u32 4294901760, %v1767_v15  ;;  %v439_v20 = vsub.f32 %v3982_v13, %v6048_v3  ;;  %v6059_v24 = vand.u32 4294901760, %v3994_v21  ;;  %v6060_v36 = vand.u32 4294901760, %v3996_v44 }
  0x8b   :  { %v428_v48 = vand.u32 4294901760, %v427_v32  ;;  %v1773_v12 = vsub.f32 %v3986_v40, %v6053_v46  ;;  %v1785_v14 = vsub.f32 %v3988_v25, %v6054_v22  ;;  %v6061_v2 = vand.u32 4294901760, %v4000_v47 }
  0x8c   :  { %v4476_v15 = vpack.c.bf16 %v1768_v37, %v1756_v53  ;;  %v440_v29 = vand.u32 4294901760, %v439_v20  ;;  %v433_v3 = vsub.f32 %v3994_v21, %v6059_v24  ;;  %v445_v32 = vsub.f32 %v3996_v44, %v6060_v36 }
  0x8d   :  { %v1774_v13 = vand.u32 4294901760, %v1773_v12  ;;  %v1786_v5 = vand.u32 4294901760, %v1785_v14  ;;  %v1779_v46 = vsub.f32 %v4000_v47, %v6061_v2  ;;  %v6064_v22 = vand.u32 4294901760, %v4004_v38 }
  0x8e   :  { %v4488_v25 = vpack.c.bf16 %v440_v29, %v428_v48  ;;  %v434_v53 = vand.u32 4294901760, %v433_v3  ;;  %v446_v37 = vand.u32 4294901760, %v445_v32  ;;  %v6069_v20 = vand.u32 4294901760, %v4008_v59  ;;  %v6533_v48 = vld [vmem:[#allocation64_spill] sm:$0xff]  ;;  %v6534_v32 = vld [vmem:[#allocation65_spill] sm:$0xff] }
  0x8f   :  { %v4491_v40 = vpack.c.bf16 %v1786_v5, %v1774_v13  ;;  %v1780_v24 = vand.u32 4294901760, %v1779_v46  ;;  %v1791_v12 = vsub.f32 %v4004_v38, %v6064_v22  ;;  %v6074_v14 = vand.u32 4294901760, %v4010_v34  ;;  %v6535_v13 = vld [vmem:[#allocation67_spill] sm:$0xff]  ;;  %v6536_v22 = vld [vmem:[#allocation68_spill] sm:$0xff] }
  0x90   :  { %v4497_v36 = vpack.c.bf16 %v446_v37, %v434_v53  ;;  %v451_v29 = vsub.f32 %v4008_v59, %v6069_v20  ;;  %v6079_v3 = vand.u32 4294901760, %v6533_v48  ;;  %v6080_v2 = vand.u32 4294901760, %v6534_v32  ;;  %v6537_v20 = vld [vmem:[#allocation69_spill] sm:$0xff] }
  0x91   :  { %v1792_v47 = vand.u32 4294901760, %v1791_v12  ;;  %v463_v5 = vsub.f32 %v4010_v34, %v6074_v14  ;;  %v6087_v46 = vand.u32 4294901760, %v6535_v13  ;;  %v6088_v38 = vand.u32 4294901760, %v6536_v22 }
  0x92   :  { %v452_v44 = vand.u32 4294901760, %v451_v29  ;;  %v1797_v53 = vsub.f32 %v6533_v48, %v6079_v3  ;;  %v1809_v37 = vsub.f32 %v6534_v32, %v6080_v2  ;;  %v6090_v59 = vand.u32 4294901760, %v6537_v20  ;;  %v6538_v2 = vld [vmem:[#allocation71_spill] sm:$0xff] }
  0x93   :  { %v4516_v12 = vpack.c.bf16 %v1792_v47, %v1780_v24  ;;  %v464_v21 = vand.u32 4294901760, %v463_v5  ;;  %v457_v14 = vsub.f32 %v6535_v13, %v6087_v46  ;;  %v469_v29 = vsub.f32 %v6536_v22, %v6088_v38  ;;  %v6539_v5 = vld [vmem:[#allocation73_spill] sm:$0xff] }
  0x94   :  { %v1798_v34 = vand.u32 4294901760, %v1797_v53  ;;  %v1810_v61 = vand.u32 4294901760, %v1809_v37  ;;  %v1803_v3 = vsub.f32 %v6537_v20, %v6090_v59  ;;  %v6092_v32 = vand.u32 4294901760, %v6538_v2  ;;  %v6540_v37 = vld [vmem:[#allocation74_spill] sm:$0xff] }
  0x95   :  { %v4528_v48 = vpack.c.bf16 %v464_v21, %v452_v44  ;;  %v458_v47 = vand.u32 4294901760, %v457_v14  ;;  %v470_v24 = vand.u32 4294901760, %v469_v29  ;;  %v6095_v52 = vand.u32 4294901760, %v6539_v5  ;;  %v6541_v44 = vld [vmem:[#allocation76_spill] sm:$0xff]  ;;  %v6542_v29 = vld [vmem:[#allocation77_spill] sm:$0xff] }
  0x96   :  { %v4531_v42 = vpack.c.bf16 %v1810_v61, %v1798_v34  ;;  %v1804_v46 = vand.u32 4294901760, %v1803_v3  ;;  %v1815_v53 = vsub.f32 %v6538_v2, %v6092_v32  ;;  %v6099_v38 = vand.u32 4294901760, %v6540_v37  ;;  %v6543_v61 = vld [vmem:[#allocation79_spill] sm:$0xff]  ;;  %v6544_v32 = vld [vmem:[#allocation80_spill] sm:$0xff] }
  0x97   :  { %v4537_v22 = vpack.c.bf16 %v470_v24, %v458_v47  ;;  %v475_v21 = vsub.f32 %v6539_v5, %v6095_v52  ;;  %v6103_v14 = vand.u32 4294901760, %v6541_v44  ;;  %v6104_v59 = vand.u32 4294901760, %v6542_v29  ;;  %v6545_v52 = vld [vmem:[#allocation81_spill] sm:$0xff] }
  0x98   :  { %v1816_v20 = vand.u32 4294901760, %v1815_v53  ;;  %v487_v34 = vsub.f32 %v6540_v37, %v6099_v38  ;;  %v6111_v3 = vand.u32 4294901760, %v6543_v61  ;;  %v6112_v2 = vand.u32 4294901760, %v6544_v32 }
  0x99   :  { %v476_v13 = vand.u32 4294901760, %v475_v21  ;;  %v1821_v47 = vsub.f32 %v6541_v44, %v6103_v14  ;;  %v1833_v24 = vsub.f32 %v6542_v29, %v6104_v59  ;;  %v6114_v5 = vand.u32 4294901760, %v6545_v52  ;;  %v6546_v59 = vld [vmem:[#allocation83_spill] sm:$0xff] }
  0x9a   :  { %v4556_v53 = vpack.c.bf16 %v1816_v20, %v1804_v46  ;;  %v488_v41 = vand.u32 4294901760, %v487_v34  ;;  %v481_v38 = vsub.f32 %v6543_v61, %v6111_v3  ;;  %v493_v21 = vsub.f32 %v6544_v32, %v6112_v2  ;;  %v6547_v34 = vld [vmem:[#allocation85_spill] sm:$0xff] }
  0x9b   :  { %v1822_v37 = vand.u32 4294901760, %v1821_v47  ;;  %v1834_v17 = vand.u32 4294901760, %v1833_v24  ;;  %v1827_v14 = vsub.f32 %v6545_v52, %v6114_v5  ;;  %v6116_v29 = vand.u32 4294901760, %v6546_v59  ;;  %v6548_v24 = vld [vmem:[#allocation86_spill] sm:$0xff] }
  0x9c   :  { %v4568_v44 = vpack.c.bf16 %v488_v41, %v476_v13  ;;  %v482_v20 = vand.u32 4294901760, %v481_v38  ;;  %v494_v46 = vand.u32 4294901760, %v493_v21  ;;  %v6119_v9 = vand.u32 4294901760, %v6547_v34  ;;  %v6549_v13 = vld [vmem:[#allocation88_spill] sm:$0xff]  ;;  %v6550_v21 = vld [vmem:[#allocation89_spill] sm:$0xff] }
  0x9d   :  { %v4571_v63 = vpack.c.bf16 %v1834_v17, %v1822_v37  ;;  %v1828_v3 = vand.u32 4294901760, %v1827_v14  ;;  %v1839_v47 = vsub.f32 %v6546_v59, %v6116_v29  ;;  %v6123_v2 = vand.u32 4294901760, %v6548_v24  ;;  %v6551_v37 = vld [vmem:[#allocation91_spill] sm:$0xff]  ;;  %v6552_v29 = vld [vmem:[#allocation92_spill] sm:$0xff] }
  0x9e   :  { %v4577_v32 = vpack.c.bf16 %v494_v46, %v482_v20  ;;  %v499_v41 = vsub.f32 %v6547_v34, %v6119_v9  ;;  %v6125_v38 = vand.u32 4294901760, %v6549_v13  ;;  %v6127_v5 = vand.u32 4294901760, %v6550_v21  ;;  %v6553_v9 = vld [vmem:[#allocation93_spill] sm:$0xff] }
  0x9f   :  { %v1840_v52 = vand.u32 4294901760, %v1839_v47  ;;  %v511_v17 = vsub.f32 %v6548_v24, %v6123_v2  ;;  %v6129_v14 = vand.u32 4294901760, %v6551_v37  ;;  %v6130_v59 = vand.u32 4294901760, %v6552_v29  ;;  %v4604_v24 = vpop.permute.xlu0 %34 }
  0xa0   :  { %v500_v61 = vand.u32 4294901760, %v499_v41  ;;  %v1845_v20 = vsub.f32 %v6549_v13, %v6125_v38  ;;  %v1857_v46 = vsub.f32 %v6550_v21, %v6127_v5  ;;  %v6131_v34 = vand.u32 4294901760, %v6553_v9  ;;  %6554 = vst [vmem:[#allocation204_spill] sm:$0xff] %v4604_v24  ;;  %v6557_v21 = vld [vmem:[#allocation9_spill] sm:$0xff] }
  0xa1   :  { %v4596_v47 = vpack.c.bf16 %v1840_v52, %v1828_v3  ;;  %v512_v58 = vand.u32 4294901760, %v511_v17  ;;  %v505_v2 = vsub.f32 %v6551_v37, %v6129_v14  ;;  %v517_v41 = vsub.f32 %v6552_v29, %v6130_v59  ;;  %v6555_v52 = vld [vmem:[#allocation95_spill] sm:$0xff]  ;;  %v6556_v17 = vld [vmem:[#allocation8_spill] sm:$0xff]  ;;  %v6558_v14 = vld [vmem:[#allocation10_spill] sm:$0xff] }
  0xa2   :  { %v1846_v38 = vand.u32 4294901760, %v1845_v20  ;;  %v1858_v13 = vand.u32 4294901760, %v1857_v46  ;;  %v4609_v5 = vsub.f32 %v6553_v9, %v6131_v34  ;;  %vm39_vm0 = vcmp.eq.s32.totalorder %v4604_v24, %v6556_v17  ;;  %v6559_v59 = vld [vmem:[#allocation11_spill] sm:$0xff] }
  0xa3   :  { %vm40_vm1 = vcmp.eq.s32.totalorder %v4604_v24, %v6557_v21  ;;  %vm41_vm2 = vcmp.eq.s32.totalorder %v4604_v24, %v6558_v14  ;;  %vm42_vm3 = vcmp.eq.s32.totalorder %v4604_v24, %v6559_v59  ;;  %v3845_v20 = vmov 0.0   ;;  %v4640_v51 = vpop.permute.xlu0 %37  ;;  %v6662_v24 = vld [vmem:[#allocation49_spill] sm:$0xff] }
  0xa4   :  { %v2938_v46 = vsel %vm40_vm1, 1.0, %v3845_v20  ;;  %v2940_v34 = vsel %vm42_vm3, 1.0, %v3845_v20  ;;  %v2937_v3 = vsel %vm39_vm0, 1.0, %v3845_v20  ;;  %v2939_v9 = vsel %vm41_vm2, 1.0, %v3845_v20  ;;  %6564 = vst [vmem:[#allocation209_spill] sm:$0xff] %v4640_v51 }
  0xa5   :  { %v4632_v29 = vsub.f32 %v2938_v46, %v2938_v46  ;;  %v4634_v37 = vsub.f32 %v2940_v34, %v2940_v34  ;;  %v4636_v57 = vsub.f32 %v2937_v3, %v2937_v3  ;;  %v4638_v55 = vsub.f32 %v2939_v9, %v2939_v9 }
  0xa6   :  { %v4642_v49 = vpack.c.bf16 %v512_v58, %v500_v61  ;;  %v4644_v39 = vpack.c.bf16 %v1858_v13, %v1846_v38  ;;  %v506_v35 = vand.u32 4294901760, %v505_v2  ;;  %v518_v27 = vand.u32 4294901760, %v517_v41 }
  0xa7   :  { %6560 = vst [vmem:[#allocation205_spill] sm:$0xff] %v4632_v29  ;;  %6561 = vst [vmem:[#allocation206_spill] sm:$0xff] %v4634_v37  ;;  %vm43_vm4 = vcmp.eq.s32.totalorder %v4640_v51, %v6556_v17  ;;  %vm44_vm5 = vcmp.eq.s32.totalorder %v4640_v51, %v6557_v21  ;;  %vm45_vm6 = vcmp.eq.s32.totalorder %v4640_v51, %v6558_v14  ;;  %v6156_v9 = vand.u32 4294901760, %v4632_v29  ;;  %v6664_v21 = vld [vmem:[#allocation52_spill] sm:$0xff] }
  0xa8   :  { %6562 = vst [vmem:[#allocation207_spill] sm:$0xff] %v4636_v57  ;;  %6563 = vst [vmem:[#allocation208_spill] sm:$0xff] %v4638_v55  ;;  %vm46_vm7 = vcmp.eq.s32.totalorder %v4640_v51, %v6559_v59  ;;  %v6160_v58 = vand.u32 4294901760, %v4634_v37  ;;  %v6163_v61 = vand.u32 4294901760, %v4636_v57  ;;  %v2942_v34 = vsel %vm44_vm5, 1.0, %v3845_v20 }
  0xa9   :  { %v2944_v13 = vsel %vm46_vm7, 1.0, %v3845_v20  ;;  %v2941_v38 = vsel %vm43_vm4, 1.0, %v3845_v20  ;;  %v2943_v41 = vsel %vm45_vm6, 1.0, %v3845_v20  ;;  %v322_v3 = vsub.f32 %v4632_v29, %v6156_v9 }
  0xaa   :  { %v1668_v46 = vsub.f32 %v4634_v37, %v6160_v58  ;;  %v328_v2 = vsub.f32 %v4636_v57, %v6163_v61  ;;  %v6565_v19 = vand.u32 4294901760, %v4638_v55  ;;  %v4682_v7 = vsub.f32 %v2942_v34, %v2942_v34 }
  0xab   :  { %v4684_v51 = vsub.f32 %v2944_v13, %v2944_v13  ;;  %v4686_v20 = vsub.f32 %v2941_v38, %v2941_v38  ;;  %v4688_v14 = vsub.f32 %v2943_v41, %v2943_v41  ;;  %v323_v9 = vand.u32 4294901760, %v322_v3 }
  0xac   :  { %v1674_v17 = vsub.f32 %v4638_v55, %v6565_v19  ;;  %6566 = vst [vmem:[#allocation210_spill] sm:$0xff] %v4682_v7  ;;  %v1669_v29 = vand.u32 4294901760, %v1668_v46  ;;  %v329_v23 = vand.u32 4294901760, %v328_v2  ;;  %v6168_v37 = vand.u32 4294901760, %v4682_v7  ;;  %v6571_v2 = vld [vmem:[#allocation97_spill] sm:$0xff]  ;;  %v6573_v46 = vld [vmem:[#allocation100_spill] sm:$0xff] }
  0xad   :  { %6567 = vst [vmem:[#allocation211_spill] sm:$0xff] %v4684_v51  ;;  %6568 = vst [vmem:[#allocation212_spill] sm:$0xff] %v4686_v20  ;;  %v6166_v61 = vand.u32 4294901760, %v4684_v51  ;;  %v6167_v57 = vand.u32 4294901760, %v4686_v20  ;;  %v6169_v19 = vand.u32 4294901760, %v4688_v14  ;;  %324 = vmatprep.mubr.f32.mxu1 %v323_v9  ;;  %v4694_v34 = vpack.c.bf16 %v518_v27, %v506_v35  ;;  %v6572_v35 = vld [vmem:[#allocation98_spill] sm:$0xff] }
  0xae   :  { %6569 = vst [vmem:[#allocation213_spill] sm:$0xff] %v4688_v14  ;;  %v1675_v58 = vand.u32 4294901760, %v1674_v17  ;;  %1670 = vmatprep.mubr.f32.mxu0 %v1669_v29  ;;  %v1852_v13 = vand.u32 4294901760, %v4609_v5  ;;  %v6570_v38 = vand.u32 4294901760, %v6555_v52  ;;  %v6170_v17 = vand.u32 4294901760, %v6571_v2  ;;  %330 = vmatmul.mubr.f32.vlgmr.msra.gmra.mrb[0].mxu1 %v329_v23  ;;  %v6672_v59 = vld [vmem:[#allocation205_spill] sm:$0xff] }
  0xaf   :  { %v338_v3 = vsub.f32 %v4682_v7, %v6168_v37  ;;  %v1684_v29 = vsub.f32 %v4684_v51, %v6166_v61  ;;  %v344_v27 = vsub.f32 %v4686_v20, %v6167_v57  ;;  %v6175_v5 = vand.u32 4294901760, %v6572_v35  ;;  %3036 = vmatpush1.bf16.msra.mxu1 %v4376_v54  ;;  %v6579_v51 = vld [vmem:[#allocation109_spill] sm:$0xff] }
  0xb0   :  { %v1863_v41 = vsub.f32 %v6555_v52, %v6570_v38  ;;  %1676 = vmatmul.mubr.f32.vlgmr.msra.gmra.mrb[0].mxu0 %v1675_v58  ;;  %v1690_v23 = vsub.f32 %v4688_v14, %v6169_v19  ;;  %v523_v58 = vsub.f32 %v6571_v2, %v6170_v17  ;;  %v6182_v38 = vand.u32 4294901760, %v6573_v46  ;;  %3038 = vmatprep.subr.bf16.mxu1 %v4408_v28  ;;  %v6574_v28 = vld [vmem:[#allocation101_spill] sm:$0xff]  ;;  %v6575_v14 = vld [vmem:[#allocation103_spill] sm:$0xff] }
  0xb1   :  { %3420 = vmatpush1.bf16.msra.mxu0 %v4392_v62  ;;  %v339_v61 = vand.u32 4294901760, %v338_v3  ;;  %v1685_v57 = vand.u32 4294901760, %v1684_v29  ;;  %v345_v54 = vand.u32 4294901760, %v344_v27  ;;  %v535_v62 = vsub.f32 %v6572_v35, %v6175_v5  ;;  %v6576_v27 = vld [vmem:[#allocation104_spill] sm:$0xff]  ;;  %v6602_v2 = vld [vmem:[#allocation139_spill] sm:$0xff] }
  0xb2   :  { %v1864_v9 = vand.u32 4294901760, %v1863_v41  ;;  %3422 = vmatprep.subr.bf16.mxu0 %v4411_v18  ;;  %v1691_v37 = vand.u32 4294901760, %v1690_v23  ;;  %v524_v41 = vand.u32 4294901760, %v523_v58  ;;  %v1869_v17 = vsub.f32 %v6573_v46, %v6182_v38  ;;  %v6577_v23 = vld [vmem:[#allocation105_spill] sm:$0xff] }
  0xb3   :  { %340 = vmatprep.mubr.f32.mxu1 %v339_v61  ;;  %1686 = vmatprep.mubr.f32.mxu0 %v1685_v57  ;;  %v536_v3 = vand.u32 4294901760, %v535_v62  ;;  %v6181_v29 = vand.u32 4294901760, %v6574_v28  ;;  %v6180_v18 = vand.u32 4294901760, %v6575_v14  ;;  %v6183_v20 = vand.u32 4294901760, %v6576_v27  ;;  %v6601_v46 = vld [vmem:[#allocation137_spill] sm:$0xff] }
  0xb4   :  { %v4725_v19 = vpack.c.bf16 %v1864_v9, %v1852_v13  ;;  %346 = vmatmul.mubr.f32.gmra.mrb[2].mxu1 %v345_v54  ;;  %1692 = vmatmul.mubr.f32.gmra.mrb[2].mxu0 %v1691_v37  ;;  %v1870_v5 = vand.u32 4294901760, %v1869_v17  ;;  %v6184_v13 = vand.u32 4294901760, %v6577_v23  ;;  %v6578_v9 = vld [vmem:[#allocation107_spill] sm:$0xff]  ;;  %v6191_v7 = vand.u32 4294901760, %v6579_v51  ;;  %v6580_v17 = vld [vmem:[#allocation110_spill] sm:$0xff] }
  0xb5   :  { %v6190_v58 = vand.u32 4294901760, %v6578_v9  ;;  %3040 = vmatpush1.bf16.msra.mxu1 %v4417_v0  ;;  %3424 = vmatpush1.bf16.msra.mxu0 %v4436_v33  ;;  %v4738_v57 = vpack.c.bf16 %v536_v3, %v524_v41  ;;  %v1881_v61 = vsub.f32 %v6574_v28, %v6181_v29  ;;  %v529_v37 = vsub.f32 %v6575_v14, %v6180_v18  ;;  %v6581_v3 = vld [vmem:[#allocation112_spill] sm:$0xff] }
  0xb6   :  { %v6193_v54 = vand.u32 4294901760, %v6580_v17  ;;  %v6185_v62 = vmov 1.0   ;;  %v541_v0 = vsub.f32 %v6576_v27, %v6183_v20  ;;  %v1875_v33 = vsub.f32 %v6577_v23, %v6184_v13  ;;  %3042 = vmatprep.subr.bf16.mxu1 %v4448_v31  ;;  %3426 = vmatprep.subr.bf16.mxu0 %v4451_v30 }
  0xb7   :  { %2945 = vmatprep.mubr.msk.f32.mxu1 %vm40_vm1, %v6185_v62  ;;  %2957 = vmatprep.mubr.msk.f32.mxu0 %vm42_vm3, %v6185_v62  ;;  %v1887_v41 = vsub.f32 %v6578_v9, %v6190_v58  ;;  %v6192_v18 = vand.u32 4294901760, %v6581_v3  ;;  %v1882_v29 = vand.u32 4294901760, %v1881_v61  ;;  %v530_v38 = vand.u32 4294901760, %v529_v37  ;;  %v6582_v37 = vld [vmem:[#allocation113_spill] sm:$0xff] }
  0xb8   :  { %v547_v20 = vsub.f32 %v6579_v51, %v6191_v7  ;;  %v559_v13 = vsub.f32 %v6580_v17, %v6193_v54  ;;  %v542_v62 = vand.u32 4294901760, %v541_v0  ;;  %v1876_v55 = vand.u32 4294901760, %v1875_v33 }
  0xb9   :  { %v1888_v23 = vand.u32 4294901760, %v1887_v41  ;;  %v1893_v58 = vsub.f32 %v6581_v3, %v6192_v18  ;;  %3044 = vmatpush1.bf16.msra.mxu1 %v4457_v45  ;;  %3428 = vmatpush1.bf16.msra.mxu0 %v4476_v15  ;;  %v4778_v30 = vpack.c.bf16 %v1882_v29, %v1870_v5  ;;  %v6194_v7 = vand.u32 4294901760, %v6582_v37  ;;  %v6583_v18 = vld [vmem:[#allocation115_spill] sm:$0xff]  ;;  %v6585_v29 = vld [vmem:[#allocation117_spill] sm:$0xff] }
  0xba   :  { %v548_v31 = vand.u32 4294901760, %v547_v20  ;;  %v560_v61 = vand.u32 4294901760, %v559_v13  ;;  %3046 = vmatprep.subr.bf16.mxu1 %v4488_v25  ;;  %3430 = vmatprep.subr.bf16.mxu0 %v4491_v40  ;;  %v4783_v0 = vpack.c.bf16 %v542_v62, %v530_v38  ;;  %v6195_v54 = vand.u32 4294901760, %v6583_v18  ;;  %v6584_v20 = vld [vmem:[#allocation116_spill] sm:$0xff]  ;;  %v6586_v40 = vld [vmem:[#allocation119_spill] sm:$0xff]  ;;  %v6587_v38 = vld [vmem:[#allocation121_spill] sm:$0xff] }
  0xbb   :  { %v4785_v33 = vpack.c.bf16 %v1888_v23, %v1876_v55  ;;  %v1894_v41 = vand.u32 4294901760, %v1893_v58  ;;  %v1905_v15 = vsub.f32 %v6582_v37, %v6194_v7  ;;  %v6197_v5 = vand.u32 4294901760, %v6584_v20  ;;  %v6588_v58 = vld [vmem:[#allocation122_spill] sm:$0xff] }
  0xbc   :  { %v4788_v45 = vpack.c.bf16 %v560_v61, %v548_v31  ;;  %v6198_v13 = vand.u32 4294901760, %v6585_v29  ;;  %v553_v25 = vsub.f32 %v6583_v18, %v6195_v54  ;;  %v6202_v55 = vand.u32 4294901760, %v6586_v40  ;;  %v6589_v54 = vld [vmem:[#allocation124_spill] sm:$0xff] }
  0xbd   :  { %v6204_v23 = vand.u32 4294901760, %v6587_v38  ;;  %3048 = vmatpush1.bf16.msra.mxu1 %v4497_v36  ;;  %3432 = vmatpush1.bf16.msra.mxu0 %v4516_v12  ;;  %v1906_v31 = vand.u32 4294901760, %v1905_v15  ;;  %v565_v61 = vsub.f32 %v6584_v20, %v6197_v5  ;;  %v6590_v15 = vand.u32 4294901760, %v6588_v58 }
  0xbe   :  { %v1899_v7 = vsub.f32 %v6585_v29, %v6198_v13  ;;  %3050 = vmatprep.subr.bf16.mxu1 %v4528_v48  ;;  %3434 = vmatprep.subr.bf16.mxu0 %v4531_v42  ;;  %v554_v62 = vand.u32 4294901760, %v553_v25  ;;  %v1911_v36 = vsub.f32 %v6586_v40, %v6202_v55  ;;  %v6591_v48 = vand.u32 4294901760, %v6589_v54  ;;  %v6592_v55 = vld [vmem:[#allocation125_spill] sm:$0xff] }
  0xbf   :  { %v571_v12 = vsub.f32 %v6587_v38, %v6204_v23  ;;  %v583_v5 = vsub.f32 %v6588_v58, %v6590_v15  ;;  %v4821_v13 = vpack.c.bf16 %v1906_v31, %v1894_v41  ;;  %v566_v37 = vand.u32 4294901760, %v565_v61  ;;  %v6593_v41 = vld [vmem:[#allocation127_spill] sm:$0xff]  ;;  %v6594_v61 = vld [vmem:[#allocation128_spill] sm:$0xff] }
  0xc0   :  { %v1900_v3 = vand.u32 4294901760, %v1899_v7  ;;  %v1917_v42 = vsub.f32 %v6589_v54, %v6591_v48  ;;  %v1912_v25 = vand.u32 4294901760, %v1911_v36  ;;  %v6205_v9 = vand.u32 4294901760, %v6592_v55 }
  0xc1   :  { %v572_v17 = vand.u32 4294901760, %v571_v12  ;;  %v584_v51 = vand.u32 4294901760, %v583_v5  ;;  %3052 = vmatpush1.bf16.msra.mxu1 %v4537_v22  ;;  %3436 = vmatpush1.bf16.msra.mxu0 %v4556_v53  ;;  %v4829_v23 = vpack.c.bf16 %v566_v37, %v554_v62  ;;  %v6207_v31 = vand.u32 4294901760, %v6593_v41  ;;  %v6595_v53 = vld [vmem:[#allocation129_spill] sm:$0xff]  ;;  %v6596_v12 = vld [vmem:[#allocation131_spill] sm:$0xff] }
  0xc2   :  { %v1918_v15 = vand.u32 4294901760, %v1917_v42  ;;  %v6209_v7 = vand.u32 4294901760, %v6594_v61  ;;  %3054 = vmatprep.subr.bf16.mxu1 %v4568_v44  ;;  %3438 = vmatprep.subr.bf16.mxu0 %v4571_v63  ;;  %v4835_v36 = vpack.c.bf16 %v1912_v25, %v1900_v3  ;;  %v1929_v22 = vsub.f32 %v6592_v55, %v6205_v9  ;;  %v6597_v3 = vld [vmem:[#allocation133_spill] sm:$0xff]  ;;  %v6598_v42 = vld [vmem:[#allocation134_spill] sm:$0xff]  ;;  %v6599_v9 = vld [vmem:[#allocation136_spill] sm:$0xff] }
  0xc3   :  { %v4837_v5 = vpack.c.bf16 %v584_v51, %v572_v17  ;;  %v6210_v37 = vand.u32 4294901760, %v6595_v53  ;;  %v577_v62 = vsub.f32 %v6593_v41, %v6207_v31  ;;  %v6211_v63 = vand.u32 4294901760, %v6596_v12 }
  0xc4   :  { %v589_v44 = vsub.f32 %v6594_v61, %v6209_v7  ;;  %v6214_v48 = vand.u32 4294901760, %v6597_v3  ;;  %v1930_v51 = vand.u32 4294901760, %v1929_v22  ;;  %v6218_v25 = vand.u32 4294901760, %v6598_v42 }
  0xc5   :  { %v1923_v17 = vsub.f32 %v6595_v53, %v6210_v37  ;;  %3056 = vmatpush1.bf16.msra.mxu1 %v4577_v32  ;;  %3440 = vmatpush1.bf16.msra.mxu0 %v4596_v47  ;;  %v578_v31 = vand.u32 4294901760, %v577_v62  ;;  %v1935_v7 = vsub.f32 %v6596_v12, %v6211_v63  ;;  %v6600_v47 = vand.u32 4294901760, %v6599_v9 }
  0xc6   :  { %v590_v14 = vand.u32 4294901760, %v589_v44  ;;  %v595_v22 = vsub.f32 %v6597_v3, %v6214_v48  ;;  %3058 = vmatprep.subr.bf16.mxu1 %v4642_v49  ;;  %3442 = vmatprep.subr.bf16.mxu0 %v4644_v39  ;;  %v3453_v37 = vpack.c.bf16 %v1930_v51, %v1918_v15  ;;  %v607_v32 = vsub.f32 %v6598_v42, %v6218_v25  ;;  %v6603_v15 = vld [vmem:[#allocation140_spill] sm:$0xff] }
  0xc7   :  { %v1924_v27 = vand.u32 4294901760, %v1923_v17  ;;  %v1941_v62 = vsub.f32 %v6599_v9, %v6600_v47  ;;  %v1936_v63 = vand.u32 4294901760, %v1935_v7  ;;  %v6217_v48 = vand.u32 4294901760, %v6601_v46 }
  0xc8   :  { %v4872_v44 = vpack.c.bf16 %v590_v14, %v578_v31  ;;  %v596_v28 = vand.u32 4294901760, %v595_v22  ;;  %v608_v35 = vand.u32 4294901760, %v607_v32  ;;  %v6219_v39 = vand.u32 4294901760, %v6602_v2  ;;  %v6604_v31 = vld [vmem:[#allocation141_spill] sm:$0xff]  ;;  %v6605_v22 = vld [vmem:[#allocation143_spill] sm:$0xff] }
  0xc9   :  { %v1942_v49 = vand.u32 4294901760, %v1941_v62  ;;  %v6220_v51 = vand.u32 4294901760, %v6603_v15  ;;  %3060 = vmatpush1.bf16.msra.mxu1 %v4694_v34  ;;  %3444 = vmatpush1.bf16.msra.mxu0 %v4725_v19  ;;  %v3455_v17 = vpack.c.bf16 %v1936_v63, %v1924_v27  ;;  %v1953_v14 = vsub.f32 %v6601_v46, %v6217_v48  ;;  %v6606_v27 = vld [vmem:[#allocation145_spill] sm:$0xff] }
  0xca   :  { %v6222_v7 = vand.u32 4294901760, %v6604_v31  ;;  %v6224_v47 = vand.u32 4294901760, %v6605_v22  ;;  %3062 = vmatprep.subr.bf16.mxu1 %v4738_v57  ;;  %3446 = vmatprep.subr.bf16.mxu0 %v4778_v30  ;;  %v3073_v32 = vpack.c.bf16 %v608_v35, %v596_v28  ;;  %v601_v34 = vsub.f32 %v6602_v2, %v6219_v39  ;;  %v6607_v35 = vld [vmem:[#allocation146_spill] sm:$0xff] }
  0xcb   :  { %v613_v19 = vsub.f32 %v6603_v15, %v6220_v51  ;;  %v6225_v63 = vand.u32 4294901760, %v6606_v27  ;;  %v1954_v62 = vand.u32 4294901760, %v1953_v14  ;;  %v6232_v28 = vand.u32 4294901760, %v6607_v35  ;;  %v6608_v51 = vld [vmem:[#allocation148_spill] sm:$0xff] }
  0xcc   :  { %v1947_v48 = vsub.f32 %v6604_v31, %v6222_v7  ;;  %v1959_v57 = vsub.f32 %v6605_v22, %v6224_v47  ;;  %v602_v30 = vand.u32 4294901760, %v601_v34  ;;  %v6229_v52 = vand.u32 4294901760, %v6608_v51 }
  0xcd   :  { %v614_v25 = vand.u32 4294901760, %v613_v19  ;;  %v619_v39 = vsub.f32 %v6606_v27, %v6225_v63  ;;  %3064 = vmatpush1.bf16.msra.mxu1 %v4783_v0  ;;  %3448 = vmatpush1.bf16.msra.mxu0 %v4785_v33  ;;  %v3457_v14 = vpack.c.bf16 %v1954_v62, %v1942_v49  ;;  %v631_v47 = vsub.f32 %v6607_v35, %v6232_v28  ;;  %v6609_v0 = vld [vmem:[#allocation149_spill] sm:$0xff] }
  0xce   :  { %v1948_v7 = vand.u32 4294901760, %v1947_v48  ;;  %v1960_v31 = vand.u32 4294901760, %v1959_v57  ;;  %3066 = vmatprep.subr.bf16.mxu1 %v4788_v45  ;;  %3450 = vmatprep.subr.bf16.mxu0 %v4821_v13  ;;  %v1965_v63 = vsub.f32 %v6608_v51, %v6229_v52  ;;  %v6230_v27 = vand.u32 4294901760, %v6609_v0  ;;  %v6610_v48 = vld [vmem:[#allocation151_spill] sm:$0xff]  ;;  %v6611_v57 = vld [vmem:[#allocation152_spill] sm:$0xff]  ;;  %v6612_v13 = vld [vmem:[#allocation153_spill] sm:$0xff] }
  0xcf   :  { %v3075_v34 = vpack.c.bf16 %v614_v25, %v602_v30  ;;  %v620_v19 = vand.u32 4294901760, %v619_v39  ;;  %v632_v49 = vand.u32 4294901760, %v631_v47  ;;  %v6231_v62 = vand.u32 4294901760, %v6610_v48  ;;  %v6613_v39 = vld [vmem:[#allocation155_spill] sm:$0xff]  ;;  %v6614_v47 = vld [vmem:[#allocation157_spill] sm:$0xff] }
  0xd0   :  { %v3459_v33 = vpack.c.bf16 %v1960_v31, %v1948_v7  ;;  %v6233_v22 = vand.u32 4294901760, %v6611_v57  ;;  %v1966_v15 = vand.u32 4294901760, %v1965_v63  ;;  %v1977_v45 = vsub.f32 %v6609_v0, %v6230_v27 }
  0xd1   :  { %v6236_v25 = vand.u32 4294901760, %v6612_v13  ;;  %v6237_v30 = vand.u32 4294901760, %v6613_v39  ;;  %3068 = vmatpush1.bf16.msra.mxu1 %v4829_v23  ;;  %3452 = vmatpush1.bf16.msra.mxu0 %v4835_v36  ;;  %v3077_v52 = vpack.c.bf16 %v632_v49, %v620_v19  ;;  %v625_v31 = vsub.f32 %v6610_v48, %v6231_v62  ;;  %v6615_v19 = vld [vmem:[#allocation158_spill] sm:$0xff] }
  0xd2   :  { %v637_v7 = vsub.f32 %v6611_v57, %v6233_v22  ;;  %v6239_v63 = vand.u32 4294901760, %v6614_v47  ;;  %3070 = vmatprep.subr.bf16.mxu1 %v4837_v5  ;;  %3454 = vmatprep.subr.bf16.mxu0 %v3453_v37  ;;  %v1978_v27 = vand.u32 4294901760, %v1977_v45  ;;  %v6242_v49 = vand.u32 4294901760, %v6615_v19  ;;  %v6616_v57 = vld [vmem:[#allocation160_spill] sm:$0xff] }
  0xd3   :  { %v1971_v23 = vsub.f32 %v6612_v13, %v6236_v25  ;;  %v1983_v36 = vsub.f32 %v6613_v39, %v6237_v30  ;;  %v626_v62 = vand.u32 4294901760, %v625_v31  ;;  %v6243_v5 = vand.u32 4294901760, %v6616_v57 }
  0xd4   :  { %v638_v28 = vand.u32 4294901760, %v637_v7  ;;  %v643_v22 = vsub.f32 %v6614_v47, %v6239_v63  ;;  %v3461_v37 = vpack.c.bf16 %v1978_v27, %v1966_v15  ;;  %v655_v25 = vsub.f32 %v6615_v19, %v6242_v49  ;;  %v6617_v7 = vld [vmem:[#allocation161_spill] sm:$0xff]  ;;  %v6619_v47 = vld [vmem:[#allocation164_spill] sm:$0xff] }
  0xd5   :  { %v1972_v45 = vand.u32 4294901760, %v1971_v23  ;;  %v1984_v48 = vand.u32 4294901760, %v1983_v36  ;;  %3072 = vmatpush1.bf16.msra.mxu1 %v4872_v44  ;;  %3456 = vmatpush1.bf16.msra.mxu0 %v3455_v17  ;;  %v1989_v31 = vsub.f32 %v6616_v57, %v6243_v5  ;;  %v6244_v63 = vand.u32 4294901760, %v6617_v7  ;;  %v6618_v23 = vld [vmem:[#allocation163_spill] sm:$0xff]  ;;  %v6620_v17 = vld [vmem:[#allocation165_spill] sm:$0xff] }
  0xd6   :  { %v3079_v30 = vpack.c.bf16 %v638_v28, %v626_v62  ;;  %v644_v39 = vand.u32 4294901760, %v643_v22  ;;  %3074 = vmatprep.subr.bf16.mxu1 %v3073_v32  ;;  %3458 = vmatprep.subr.bf16.mxu0 %v3457_v14  ;;  %v656_v27 = vand.u32 4294901760, %v655_v25  ;;  %v6245_v36 = vand.u32 4294901760, %v6618_v23  ;;  %v6621_v28 = vld [vmem:[#allocation167_spill] sm:$0xff] }
  0xd7   :  { %v3463_v15 = vpack.c.bf16 %v1984_v48, %v1972_v45  ;;  %v6247_v13 = vand.u32 4294901760, %v6619_v47  ;;  %v1990_v49 = vand.u32 4294901760, %v1989_v31  ;;  %v2001_v44 = vsub.f32 %v6617_v7, %v6244_v63  ;;  %v6622_v48 = vld [vmem:[#allocation169_spill] sm:$0xff] }
  0xd8   :  { %v6250_v22 = vand.u32 4294901760, %v6620_v17  ;;  %v6251_v62 = vand.u32 4294901760, %v6621_v28  ;;  %v3081_v5 = vpack.c.bf16 %v656_v27, %v644_v39  ;;  %v649_v32 = vsub.f32 %v6618_v23, %v6245_v36  ;;  %v6623_v27 = vld [vmem:[#allocation170_spill] sm:$0xff] }
  0xd9   :  { %v661_v14 = vsub.f32 %v6619_v47, %v6247_v13  ;;  %v6253_v25 = vand.u32 4294901760, %v6622_v48  ;;  %3076 = vmatpush1.bf16.msra.mxu1 %v3075_v34  ;;  %3460 = vmatpush1.bf16.msra.mxu0 %v3459_v33  ;;  %v2002_v45 = vand.u32 4294901760, %v2001_v44  ;;  %v6256_v63 = vand.u32 4294901760, %v6623_v27  ;;  %v6624_v33 = vld [vmem:[#allocation172_spill] sm:$0xff] }
  0xda   :  { %v1995_v31 = vsub.f32 %v6620_v17, %v6250_v22  ;;  %v2007_v39 = vsub.f32 %v6621_v28, %v6251_v62  ;;  %3078 = vmatprep.subr.bf16.mxu1 %v3077_v52  ;;  %3462 = vmatprep.subr.bf16.mxu0 %v3461_v37  ;;  %v650_v36 = vand.u32 4294901760, %v649_v32  ;;  %v6255_v44 = vand.u32 4294901760, %v6624_v33  ;;  %v6625_v37 = vld [vmem:[#allocation173_spill] sm:$0xff] }
  0xdb   :  { %v662_v23 = vand.u32 4294901760, %v661_v14  ;;  %v667_v34 = vsub.f32 %v6622_v48, %v6253_v25  ;;  %v3465_v13 = vpack.c.bf16 %v2002_v45, %v1990_v49  ;;  %v679_v22 = vsub.f32 %v6623_v27, %v6256_v63  ;;  %v6626_v48 = vld [vmem:[#allocation175_spill] sm:$0xff]  ;;  %v6627_v45 = vld [vmem:[#allocation176_spill] sm:$0xff] }
  0xdc   :  { %v1996_v47 = vand.u32 4294901760, %v1995_v31  ;;  %v2008_v7 = vand.u32 4294901760, %v2007_v39  ;;  %v2013_v52 = vsub.f32 %v6624_v33, %v6255_v44  ;;  %v6259_v32 = vand.u32 4294901760, %v6625_v37  ;;  %v6704_v33 = vld [vmem:[#allocation71_spill] sm:$0xff] }
  0xdd   :  { %v3083_v62 = vpack.c.bf16 %v662_v23, %v650_v36  ;;  %v668_v28 = vand.u32 4294901760, %v667_v34  ;;  %3080 = vmatpush1.bf16.msra.mxu1 %v3079_v30  ;;  %3464 = vmatpush1.bf16.msra.mxu0 %v3463_v15  ;;  %v680_v25 = vand.u32 4294901760, %v679_v22  ;;  %v6258_v49 = vand.u32 4294901760, %v6626_v48  ;;  %v6628_v36 = vld [vmem:[#allocation177_spill] sm:$0xff] }
  0xde   :  { %v3467_v14 = vpack.c.bf16 %v2008_v7, %v1996_v47  ;;  %v6257_v31 = vand.u32 4294901760, %v6627_v45  ;;  %3082 = vmatprep.subr.bf16.mxu1 %v3081_v5  ;;  %3466 = vmatprep.subr.bf16.mxu0 %v3465_v13  ;;  %v2014_v39 = vand.u32 4294901760, %v2013_v52  ;;  %v2025_v23 = vsub.f32 %v6625_v37, %v6259_v32 }
  0xdf   :  { %v6260_v34 = vand.u32 4294901760, %v6628_v36  ;;  %v6261_v44 = vand.u32 4294901760, %v4284_v16  ;;  %v3085_v63 = vpack.c.bf16 %v680_v25, %v668_v28  ;;  %v673_v30 = vsub.f32 %v6626_v48, %v6258_v49 }
  0xe0   :  { %v685_v47 = vsub.f32 %v6627_v45, %v6257_v31  ;;  %v6265_v13 = vand.u32 4294901760, %v4288_v1  ;;  %v2026_v5 = vand.u32 4294901760, %v2025_v23  ;;  %v6271_v22 = vand.u32 4294901760, %v4290_v8  ;;  %v6629_v31 = vld [vmem:[#allocation184_spill] sm:$0xff] }
  0xe1   :  { %v2019_v7 = vsub.f32 %v6628_v36, %v6260_v34  ;;  %v2031_v15 = vsub.f32 %v4284_v16, %v6261_v44  ;;  %3084 = vmatpush1.bf16.msra.mxu1 %v3083_v62  ;;  %3468 = vmatpush1.bf16.msra.mxu0 %v3467_v14  ;;  %v674_v28 = vand.u32 4294901760, %v673_v30  ;;  %v6269_v23 = vand.u32 4294901760, %v6629_v31  ;;  %v6630_v14 = vld [vmem:[#allocation185_spill] sm:$0xff] }
  0xe2   :  { %v686_v25 = vand.u32 4294901760, %v685_v47  ;;  %v691_v52 = vsub.f32 %v4288_v1, %v6265_v13  ;;  %3086 = vmatprep.subr.bf16.mxu1 %v3085_v63  ;;  %v3469_v49 = vpack.c.bf16 %v2026_v5, %v2014_v39  ;;  %v703_v44 = vsub.f32 %v4290_v8, %v6271_v22  ;;  %v6631_v39 = vld [vmem:[#allocation188_spill] sm:$0xff] }
  0xe3   :  { %v2020_v32 = vand.u32 4294901760, %v2019_v7  ;;  %v2032_v34 = vand.u32 4294901760, %v2031_v15  ;;  %v2037_v62 = vsub.f32 %v6629_v31, %v6269_v23  ;;  %v6268_v30 = vand.u32 4294901760, %v6630_v14  ;;  %v6709_v31 = vld [vmem:[#allocation79_spill] sm:$0xff]  ;;  %v6710_v8 = vld [vmem:[#allocation80_spill] sm:$0xff] }
  0xe4   :  { %v3087_v16 = vpack.c.bf16 %v686_v25, %v674_v28  ;;  %v692_v36 = vand.u32 4294901760, %v691_v52  ;;  %3470 = vmatprep.subr.bf16.mxu0 %v3469_v49  ;;  %v704_v13 = vand.u32 4294901760, %v703_v44  ;;  %v6267_v63 = vand.u32 4294901760, %v4302_v43 }
  0xe5   :  { %v3471_v47 = vpack.c.bf16 %v2032_v34, %v2020_v32  ;;  %v6266_v5 = vand.u32 4294901760, %v6631_v39  ;;  %v2038_v7 = vand.u32 4294901760, %v2037_v62  ;;  %v2049_v15 = vsub.f32 %v6630_v14, %v6268_v30 }
  0xe6   :  { %3088 = vmatpush1.bf16.msra.mxu1 %v3087_v16  ;;  %v6270_v28 = vand.u32 4294901760, %v4308_v11  ;;  %v6272_v25 = vand.u32 4294901760, %v4312_v60  ;;  %v3089_v52 = vpack.c.bf16 %v704_v13, %v692_v36  ;;  %v697_v44 = vsub.f32 %v4302_v43, %v6267_v63  ;;  %v6702_v43 = vld [vmem:[#allocation68_spill] sm:$0xff] }
  0xe7   :  { %3472 = vmatpush1.bf16.msra.mxu0 %v3471_v47  ;;  %v709_v32 = vsub.f32 %v6631_v39, %v6266_v5  ;;  %v6273_v16 = vand.u32 4294901760, %v4316_v4  ;;  %v2050_v49 = vand.u32 4294901760, %v2049_v15  ;;  %v6279_v36 = vand.u32 4294901760, %v4318_v10 }
  0xe8   :  { %v2043_v34 = vsub.f32 %v4308_v11, %v6270_v28  ;;  %v2055_v62 = vsub.f32 %v4312_v60, %v6272_v25  ;;  %3090 = vmatprep.subr.bf16.mxu1 %v3089_v52  ;;  %v698_v13 = vand.u32 4294901760, %v697_v44  ;;  %v6276_v63 = vand.u32 4294901760, %v4322_v56 }
  0xe9   :  { %v710_v47 = vand.u32 4294901760, %v709_v32  ;;  %v715_v5 = vsub.f32 %v4316_v4, %v6273_v16  ;;  %v3473_v15 = vpack.c.bf16 %v2050_v49, %v2038_v7  ;;  %v727_v28 = vsub.f32 %v4318_v10, %v6279_v36  ;;  %v6635_v36 = vld [vmem:[#allocation14_spill] sm:$0xff]  ;;  %v6666_v10 = vld [vmem:[#allocation55_spill] sm:$0xff] }
  0xea   :  { %v2044_v30 = vand.u32 4294901760, %v2043_v34  ;;  %v2056_v23 = vand.u32 4294901760, %v2055_v62  ;;  %v2061_v52 = vsub.f32 %v4322_v56, %v6276_v63  ;;  %v6277_v44 = vand.u32 4294901760, %v4324_v50 }
  0xeb   :  { %v3091_v22 = vpack.c.bf16 %v710_v47, %v698_v13  ;;  %v716_v25 = vand.u32 4294901760, %v715_v5  ;;  %3474 = vmatprep.subr.bf16.mxu0 %v3473_v15  ;;  %v728_v16 = vand.u32 4294901760, %v727_v28  ;;  %v6278_v4 = vand.u32 4294901760, %v4330_v6  ;;  %v6632_v5 = vld [vmem:[#allocation201_spill] sm:$0xff]  ;;  %v6633_v13 = vld [vmem:[#allocation203_spill] sm:$0xff] }
  0xec   :  { %v3475_v32 = vpack.c.bf16 %v2056_v23, %v2044_v30  ;;  %v6284_v7 = vand.u32 4294901760, %v4332_v26  ;;  %v2062_v49 = vand.u32 4294901760, %v2061_v52  ;;  %v2073_v34 = vsub.f32 %v4324_v50, %v6277_v44 }
  0xed   :  { %3092 = vmatpush1.bf16.msra.mxu1 %v3091_v22  ;;  %v6289_v62 = vand.u32 4294901760, %v6632_v5  ;;  %v6290_v47 = vand.u32 4294901760, %v6633_v13  ;;  %v3093_v63 = vpack.c.bf16 %v728_v16, %v716_v25  ;;  %v721_v23 = vsub.f32 %v4330_v6, %v6278_v4  ;;  %v6634_v4 = vld [vmem:[#allocation12_spill] sm:$0xff] }
  0xee   :  { %3476 = vmatpush1.bf16.msra.mxu0 %v3475_v32  ;;  %v733_v30 = vsub.f32 %v4332_v26, %v6284_v7  ;;  %v2074_v22 = vand.u32 4294901760, %v2073_v34  ;;  %v3097_v6 = vpack.c.bf16 %v6635_v36, %v6634_v4  ;;  %v6636_v7 = vld [vmem:[#allocation16_spill] sm:$0xff]  ;;  %v6637_v34 = vld [vmem:[#allocation17_spill] sm:$0xff]  ;;  %v6644_v36 = vmov 1.0  }
  0xef   :  { %v2067_v28 = vsub.f32 %v6632_v5, %v6289_v62  ;;  %v2079_v15 = vsub.f32 %v6633_v13, %v6290_v47  ;;  %3094 = vmatprep.subr.bf16.mxu1 %v3093_v63  ;;  %v722_v52 = vand.u32 4294901760, %v721_v23  ;;  %v3481_v26 = vpack.c.bf16 %v6637_v34, %v6636_v7  ;;  %v6638_v62 = vld [vmem:[#allocation19_spill] sm:$0xff]  ;;  %v6639_v47 = vld [vmem:[#allocation20_spill] sm:$0xff]  ;;  %v6640_v23 = vld [vmem:[#allocation21_spill] sm:$0xff] }
  0xf0   :  { %v734_v25 = vand.u32 4294901760, %v733_v30  ;;  %v3477_v16 = vpack.c.bf16 %v2074_v22, %v2062_v49  ;;  %v3099_v63 = vpack.c.bf16 %v6639_v47, %v6638_v62  ;;  %v6641_v49 = vld [vmem:[#allocation23_spill] sm:$0xff]  ;;  %v6642_v22 = vld [vmem:[#allocation25_spill] sm:$0xff]  ;;  %v6653_v34 = vld [vmem:[#allocation38_spill] sm:$0xff] }
  0xf1   :  { %v2068_v32 = vand.u32 4294901760, %v2067_v28  ;;  %v2080_v44 = vand.u32 4294901760, %v2079_v15  ;;  %v3483_v30 = vpack.c.bf16 %v6641_v49, %v6640_v23  ;;  %v6643_v28 = vld [vmem:[#allocation26_spill] sm:$0xff]  ;;  %v6651_v47 = vld [vmem:[#allocation35_spill] sm:$0xff]  ;;  %v6652_v62 = vld [vmem:[#allocation37_spill] sm:$0xff] }
  0xf2   :  { %v3095_v50 = vpack.c.bf16 %v734_v25, %v722_v52  ;;  %3478 = vmatprep.subr.bf16.mxu0 %v3477_v16  ;;  %v3101_v15 = vpack.c.bf16 %v6643_v28, %v6642_v22  ;;  %v6646_v25 = vld [vmem:[#allocation28_spill] sm:$0xff]  ;;  %v3105_v49 = vpack.c.bf16 %v6653_v34, %v6652_v62  ;;  %v6663_v34 = vld [vmem:[#allocation50_spill] sm:$0xff]  ;;  %v6665_v13 = vld [vmem:[#allocation53_spill] sm:$0xff] }
  0xf3   :  { %v3479_v56 = vpack.c.bf16 %v2080_v44, %v2068_v32  ;;  %v6647_v44 = vld [vmem:[#allocation29_spill] sm:$0xff]  ;;  %v3109_v62 = vpack.c.bf16 %v6663_v34, %v6662_v24  ;;  %v3493_v5 = vpack.c.bf16 %v6665_v13, %v6664_v21  ;;  %v6674_v22 = vld [vmem:[#allocation140_spill] sm:$0xff] }
  0xf4   :  { %3096 = vmatpush1.bf16.msra.mxu1 %v3095_v50  ;;  %v3485_v50 = vpack.c.bf16 %v6647_v44, %v6646_v25  ;;  %v6650_v32 = vld [vmem:[#allocation33_spill] sm:$0xff]  ;;  %v6656_v44 = vld [vmem:[#allocation40_spill] sm:$0xff] }
  0xf5   :  { %3480 = vmatpush1.bf16.msra.mxu0 %v3479_v56  ;;  %3098 = vmatprep.subr.bf16.mxu1 %v3097_v6  ;;  %v6648_v56 = vld [vmem:[#allocation31_spill] sm:$0xff]  ;;  %v6649_v6 = vld [vmem:[#allocation32_spill] sm:$0xff]  ;;  %v6657_v25 = vld [vmem:[#allocation41_spill] sm:$0xff] }
  0xf6   :  { %3482 = vmatprep.subr.bf16.mxu0 %v3481_v26  ;;  %v3103_v16 = vpack.c.bf16 %v6649_v6, %v6648_v56  ;;  %v3487_v26 = vpack.c.bf16 %v6651_v47, %v6650_v32  ;;  %v3489_v23 = vpack.c.bf16 %v6657_v25, %v6656_v44  ;;  %v6658_v6 = vld [vmem:[#allocation43_spill] sm:$0xff]  ;;  %v6659_v56 = vld [vmem:[#allocation44_spill] sm:$0xff]  ;;  %v6660_v47 = vld [vmem:[#allocation45_spill] sm:$0xff] }
  0xf7   :  { %2946 = vmatmul.mubr.msk.f32.vlgmr.msra.gmra.mrb[0].mxu1 %vm39_vm0, %v6644_v36  ;;  %v3107_v7 = vpack.c.bf16 %v6659_v56, %v6658_v6  ;;  %v6661_v32 = vld [vmem:[#allocation47_spill] sm:$0xff]  ;;  %v6667_v25 = vld [vmem:[#allocation56_spill] sm:$0xff]  ;;  %v6668_v56 = vld [vmem:[#allocation57_spill] sm:$0xff] }
  0xf8   :  { %2958 = vmatmul.mubr.msk.f32.vlgmr.msra.gmra.mrb[0].mxu0 %vm41_vm2, %v6644_v36  ;;  %2947 = vmatprep.mubr.msk.f32.mxu1 %vm44_vm5, %v6644_v36  ;;  %v3491_v4 = vpack.c.bf16 %v6661_v32, %v6660_v47  ;;  %v3111_v44 = vpack.c.bf16 %v6667_v25, %v6666_v10  ;;  %v6669_v6 = vld [vmem:[#allocation59_spill] sm:$0xff]  ;;  %v6671_v47 = vld [vmem:[#allocation62_spill] sm:$0xff]  ;;  %v6677_v52 = vld [vmem:[#allocation145_spill] sm:$0xff] }
  0xf9   :  { %3100 = vmatpush1.bf16.msra.mxu1 %v3099_v63  ;;  %2959 = vmatprep.mubr.msk.f32.mxu0 %vm46_vm7, %v6644_v36  ;;  %v3495_v32 = vpack.c.bf16 %v6669_v6, %v6668_v56  ;;  %v6670_v63 = vld [vmem:[#allocation61_spill] sm:$0xff]  ;;  %v6679_v56 = vld [vmem:[#allocation152_spill] sm:$0xff]  ;;  %v6689_v10 = vld [vmem:[#allocation179_spill] sm:$0xff] }
  0xfa   :  { %3484 = vmatpush1.bf16.msra.mxu0 %v3483_v30  ;;  %3102 = vmatprep.subr.bf16.mxu1 %v3101_v15  ;;  %v3113_v60 = vpack.c.bf16 %v6671_v47, %v6670_v63  ;;  %v6673_v30 = vld [vmem:[#allocation206_spill] sm:$0xff]  ;;  %v6675_v47 = vld [vmem:[#allocation141_spill] sm:$0xff]  ;;  %v6676_v63 = vld [vmem:[#allocation143_spill] sm:$0xff] }
  0xfb   :  { %2948 = vmatmul.mubr.msk.f32.gmra.mrb[2].mxu1 %vm43_vm4, %v6644_v36  ;;  %3486 = vmatprep.subr.bf16.mxu0 %v3485_v50  ;;  %v6680_v13 = vld [vmem:[#allocation153_spill] sm:$0xff]  ;;  %v6681_v15 = vld [vmem:[#allocation155_spill] sm:$0xff]  ;;  %v6685_v24 = vld [vmem:[#allocation164_spill] sm:$0xff] }
  0xfc   :  { %2960 = vmatmul.mubr.msk.f32.gmra.mrb[2].mxu0 %vm45_vm6, %v6644_v36  ;;  %947 = vmatprep.mubr.f32.mxu1 %v6672_v59  ;;  %v6683_v6 = vld [vmem:[#allocation161_spill] sm:$0xff]  ;;  %v6686_v50 = vld [vmem:[#allocation167_spill] sm:$0xff]  ;;  %v6695_v28 = vld [vmem:[#allocation64_spill] sm:$0xff] }
  0xfd   :  { %3104 = vmatpush1.bf16.msra.mxu1 %v3103_v16  ;;  %2293 = vmatprep.mubr.f32.mxu0 %v6673_v30  ;;  %v6678_v16 = vld [vmem:[#allocation151_spill] sm:$0xff]  ;;  %v6687_v25 = vld [vmem:[#allocation169_spill] sm:$0xff]  ;;  %v6698_v36 = vld [vmem:[#allocation200_spill] sm:$0xff] }
  0xfe   :  { %3488 = vmatpush1.bf16.msra.mxu0 %v3487_v26  ;;  %3106 = vmatprep.subr.bf16.mxu1 %v3105_v49  ;;  %v6684_v49 = vld [vmem:[#allocation163_spill] sm:$0xff]  ;;  %v6696_v26 = vld [vmem:[#allocation65_spill] sm:$0xff] }
  0xff   :  { %3490 = vmatprep.subr.bf16.mxu0 %v3489_v23  ;;  %v6690_v23 = vld [vmem:[#allocation191_spill] sm:$0xff]  ;;  %v3497_v1 = vpack.c.bf16 %v6696_v26, %v6695_v28  ;;  %v6705_v34 = vld [vmem:[#allocation73_spill] sm:$0xff]  ;;  %v6707_v26 = vld [vmem:[#allocation76_spill] sm:$0xff] }
 0x100   :  { %v6700_v30 = vld [vmem:[#allocation203_spill] sm:$0xff]  ;;  %v6708_v28 = vld [vmem:[#allocation77_spill] sm:$0xff] }
 0x101   :  { %3108 = vmatpush1.bf16.msra.mxu1 %v3107_v7  ;;  %v6703_v7 = vld [vmem:[#allocation69_spill] sm:$0xff]  ;;  %v3501_v45 = vpack.c.bf16 %v6708_v28, %v6707_v26 }
 0x102   :  { %3492 = vmatpush1.bf16.msra.mxu0 %v3491_v4  ;;  %3110 = vmatprep.subr.bf16.mxu1 %v3109_v62  ;;  %v6701_v62 = vld [vmem:[#allocation67_spill] sm:$0xff]  ;;  %v3499_v21 = vpack.c.bf16 %v6704_v33, %v6703_v7  ;;  %v3119_v4 = vpack.c.bf16 %v6710_v8, %v6709_v31  ;;  %v6715_v33 = vld [vmem:[#allocation88_spill] sm:$0xff]  ;;  %v6716_v7 = vld [vmem:[#allocation89_spill] sm:$0xff] }
 0x103   :  { %3494 = vmatprep.subr.bf16.mxu0 %v3493_v5  ;;  %v3115_v59 = vpack.c.bf16 %v6702_v43, %v6701_v62  ;;  %v6706_v5 = vld [vmem:[#allocation74_spill] sm:$0xff]  ;;  %v6712_v43 = vld [vmem:[#allocation83_spill] sm:$0xff] }
 0x104   :  { %v3117_v48 = vpack.c.bf16 %v6706_v5, %v6705_v34  ;;  %v6714_v62 = vld [vmem:[#allocation86_spill] sm:$0xff]  ;;  %v3505_v5 = vpack.c.bf16 %v6716_v7, %v6715_v33  ;;  %v6718_v34 = vld [vmem:[#allocation92_spill] sm:$0xff]  ;;  %v6720_v8 = vld [vmem:[#allocation95_spill] sm:$0xff] }
 0x105   :  { %3112 = vmatpush1.bf16.msra.mxu1 %v3111_v44  ;;  %v6711_v44 = vld [vmem:[#allocation81_spill] sm:$0xff]  ;;  %v6722_v31 = vld [vmem:[#allocation98_spill] sm:$0xff] }
 0x106   :  { %3496 = vmatpush1.bf16.msra.mxu0 %v3495_v32  ;;  %3114 = vmatprep.subr.bf16.mxu1 %v3113_v60  ;;  %v3503_v32 = vpack.c.bf16 %v6712_v43, %v6711_v44  ;;  %v6713_v60 = vld [vmem:[#allocation85_spill] sm:$0xff]  ;;  %v6723_v43 = vld [vmem:[#allocation100_spill] sm:$0xff] }
 0x107   :  { %3498 = vmatprep.subr.bf16.mxu0 %v3497_v1  ;;  %v3121_v14 = vpack.c.bf16 %v6714_v62, %v6713_v60  ;;  %v6717_v1 = vld [vmem:[#allocation91_spill] sm:$0xff]  ;;  %v6724_v44 = vld [vmem:[#allocation101_spill] sm:$0xff]  ;;  %v6726_v60 = vld [vmem:[#allocation104_spill] sm:$0xff] }
 0x108   :  { %v3123_v28 = vpack.c.bf16 %v6718_v34, %v6717_v1  ;;  %v3509_v62 = vpack.c.bf16 %v6724_v44, %v6723_v43  ;;  %v6728_v34 = vld [vmem:[#allocation107_spill] sm:$0xff]  ;;  %v6730_v1 = vld [vmem:[#allocation110_spill] sm:$0xff] }
 0x109   :  { %3116 = vmatpush1.bf16.msra.mxu1 %v3115_v59  ;;  %v6719_v59 = vld [vmem:[#allocation93_spill] sm:$0xff] }
 0x10a   :  { %3500 = vmatpush1.bf16.msra.mxu0 %v3499_v21  ;;  %3118 = vmatprep.subr.bf16.mxu1 %v3117_v48  ;;  %v3507_v21 = vpack.c.bf16 %v6720_v8, %v6719_v59  ;;  %v6721_v48 = vld [vmem:[#allocation97_spill] sm:$0xff]  ;;  %v6731_v8 = vld [vmem:[#allocation112_spill] sm:$0xff] }
 0x10b   :  { %3502 = vmatprep.subr.bf16.mxu0 %v3501_v45  ;;  %v3125_v26 = vpack.c.bf16 %v6722_v31, %v6721_v48  ;;  %v6725_v45 = vld [vmem:[#allocation103_spill] sm:$0xff]  ;;  %v6732_v59 = vld [vmem:[#allocation113_spill] sm:$0xff] }
 0x10c   :  { %v3127_v7 = vpack.c.bf16 %v6726_v60, %v6725_v45  ;;  %v3513_v31 = vpack.c.bf16 %v6732_v59, %v6731_v8 }
 0x10d   :  { %3120 = vmatpush1.bf16.msra.mxu1 %v3119_v4  ;;  %v6727_v4 = vld [vmem:[#allocation105_spill] sm:$0xff] }
 0x10e   :  { %3504 = vmatpush1.bf16.msra.mxu0 %v3503_v32  ;;  %3122 = vmatprep.subr.bf16.mxu1 %v3121_v14  ;;  %v3511_v32 = vpack.c.bf16 %v6728_v34, %v6727_v4  ;;  %v6729_v14 = vld [vmem:[#allocation109_spill] sm:$0xff] }
 0x10f   :  { %3506 = vmatprep.subr.bf16.mxu0 %v3505_v5  ;;  %v3129_v33 = vpack.c.bf16 %v6730_v1, %v6729_v14  ;;  %v6735_v5 = vpack.c.bf16 %v6588_v58, %v6587_v38 }
 0x111   :  { %3124 = vmatpush1.bf16.msra.mxu1 %v3123_v28  ;;  %v6733_v28 = vpack.c.bf16 %v6584_v20, %v6583_v18 }
 0x112   :  { %3508 = vmatpush1.bf16.msra.mxu0 %v3507_v21  ;;  %3126 = vmatprep.subr.bf16.mxu1 %v3125_v26  ;;  %v6734_v26 = vpack.c.bf16 %v6586_v40, %v6585_v29  ;;  %v6740_v21 = vpack.c.bf16 %v6601_v46, %v6599_v9 }
 0x113   :  { %3510 = vmatprep.subr.bf16.mxu0 %v3509_v62  ;;  %v6736_v62 = vpack.c.bf16 %v6592_v55, %v6589_v54 }
 0x115   :  { %3128 = vmatpush1.bf16.msra.mxu1 %v3127_v7  ;;  %v6739_v7 = vpack.c.bf16 %v6598_v42, %v6597_v3 }
 0x116   :  { %3512 = vmatpush1.bf16.msra.mxu0 %v3511_v32  ;;  %3130 = vmatprep.subr.bf16.mxu1 %v3129_v33  ;;  %v6737_v33 = vpack.c.bf16 %v6594_v61, %v6593_v41  ;;  %v6741_v32 = vpack.c.bf16 %v6674_v22, %v6602_v2 }
 0x117   :  { %3514 = vmatprep.subr.bf16.mxu0 %v3513_v31  ;;  %v6738_v31 = vpack.c.bf16 %v6596_v12, %v6595_v53 }
 0x119   :  { %3132 = vmatpush1.bf16.msra.mxu1 %v6733_v28  ;;  %v6742_v28 = vpack.c.bf16 %v6676_v63, %v6675_v47 }
 0x11a   :  { %3516 = vmatpush1.bf16.msra.mxu0 %v6734_v26  ;;  %3134 = vmatprep.subr.bf16.mxu1 %v6735_v5  ;;  %v6743_v26 = vpack.c.bf16 %v6607_v35, %v6677_v52  ;;  %v6744_v5 = vpack.c.bf16 %v6609_v0, %v6608_v51 }
 0x11b   :  { %3518 = vmatprep.subr.bf16.mxu0 %v6736_v62  ;;  %v6745_v62 = vpack.c.bf16 %v6679_v56, %v6678_v16 }
 0x11d   :  { %3136 = vmatpush1.bf16.msra.mxu1 %v6737_v33  ;;  %v6746_v33 = vpack.c.bf16 %v6681_v15, %v6680_v13 }
 0x11e   :  { %3520 = vmatpush1.bf16.msra.mxu0 %v6738_v31  ;;  %3138 = vmatprep.subr.bf16.mxu1 %v6739_v7  ;;  %v6747_v31 = vld [vmem:[#allocation157_spill] sm:$0xff] }
 0x11f   :  { %3522 = vmatprep.subr.bf16.mxu0 %v6740_v21  ;;  %v6748_v7 = vpack.c.bf16 %v6615_v19, %v6747_v31  ;;  %v6749_v21 = vpack.c.bf16 %v6683_v6, %v6616_v57 }
 0x121   :  { %3140 = vmatpush1.bf16.msra.mxu1 %v6741_v32  ;;  %v6750_v32 = vpack.c.bf16 %v6685_v24, %v6684_v49  ;;  %v6761_v49 = vld [vmem:[#allocation181_spill] sm:$0xff] }
 0x122   :  { %3524 = vmatpush1.bf16.msra.mxu0 %v6742_v28  ;;  %3142 = vmatprep.subr.bf16.mxu1 %v6743_v26  ;;  %v6751_v28 = vpack.c.bf16 %v6686_v50, %v6620_v17  ;;  %v6752_v26 = vpack.c.bf16 %v6623_v27, %v6687_v25  ;;  %v6764_v17 = vld [vmem:[#allocation184_spill] sm:$0xff]  ;;  %v6859_v25 = vld [vmem:[#allocation198_spill] sm:$0xff] }
 0x123   :  { %3526 = vmatprep.subr.bf16.mxu0 %v6744_v5  ;;  %v6753_v5 = vld [vmem:[#allocation172_spill] sm:$0xff] }
 0x125   :  { %3144 = vmatpush1.bf16.msra.mxu1 %v6745_v62  ;;  %v6754_v62 = vpack.c.bf16 %v6625_v37, %v6753_v5 }
 0x126   :  { %3528 = vmatpush1.bf16.msra.mxu0 %v6746_v33  ;;  %3146 = vmatprep.subr.bf16.mxu1 %v6748_v7  ;;  %v6755_v33 = vld [vmem:[#allocation176_spill] sm:$0xff]  ;;  %v6756_v7 = vld [vmem:[#allocation175_spill] sm:$0xff] }
 0x127   :  { %3530 = vmatprep.subr.bf16.mxu0 %v6749_v21  ;;  %v6757_v6 = vpack.c.bf16 %v6755_v33, %v6756_v7  ;;  %v6758_v21 = vld [vmem:[#allocation177_spill] sm:$0xff] }
 0x128   :  { %v6759_v24 = vpack.c.bf16 %v6689_v10, %v6758_v21  ;;  %v6770_v33 = vld [vmem:[#allocation193_spill] sm:$0xff]  ;;  %v6773_v21 = vld [vmem:[#allocation196_spill] sm:$0xff] }
 0x129   :  { %3148 = vmatpush1.bf16.msra.mxu1 %v6750_v32  ;;  %v6760_v32 = vld [vmem:[#allocation182_spill] sm:$0xff] }
 0x12a   :  { %3532 = vmatpush1.bf16.msra.mxu0 %v6751_v28  ;;  %3150 = vmatprep.subr.bf16.mxu1 %v6752_v26  ;;  %v6762_v50 = vpack.c.bf16 %v6760_v32, %v6761_v49  ;;  %v6763_v28 = vld [vmem:[#allocation185_spill] sm:$0xff]  ;;  %v6766_v26 = vld [vmem:[#allocation187_spill] sm:$0xff] }
 0x12b   :  { %3534 = vmatprep.subr.bf16.mxu0 %v6754_v62  ;;  %v6765_v27 = vpack.c.bf16 %v6763_v28, %v6764_v17  ;;  %v6767_v37 = vpack.c.bf16 %v6631_v39, %v6766_v26  ;;  %v6768_v62 = vpack.c.bf16 %v6690_v23, %v4308_v11  ;;  %v6780_v23 = vld [vmem:[#allocation15_spill] sm:$0xff]  ;;  %v6797_v11 = vld [vmem:[#allocation36_spill] sm:$0xff]  ;;  %v6800_v26 = vld [vmem:[#allocation46_spill] sm:$0xff] }
 0x12c   :  { %v6802_v17 = vld [vmem:[#allocation51_spill] sm:$0xff] }
 0x12d   :  { %3152 = vmatpush1.bf16.msra.mxu1 %v6757_v6  ;;  %v6769_v6 = vld [vmem:[#allocation194_spill] sm:$0xff] }
 0x12e   :  { %3536 = vmatpush1.bf16.msra.mxu0 %v6759_v24  ;;  %3154 = vmatprep.subr.bf16.mxu1 %v6762_v50  ;;  %v6771_v10 = vpack.c.bf16 %v6769_v6, %v6770_v33  ;;  %v6772_v24 = vld [vmem:[#allocation197_spill] sm:$0xff]  ;;  %v6775_v50 = vld [vmem:[#allocation199_spill] sm:$0xff]  ;;  %v6782_v6 = vld [vmem:[#allocation208_spill] sm:$0xff] }
 0x12f   :  { %3538 = vmatprep.subr.bf16.mxu0 %v6765_v27  ;;  %v6774_v32 = vpack.c.bf16 %v6772_v24, %v6773_v21  ;;  %v6776_v28 = vpack.c.bf16 %v6698_v36, %v6775_v50  ;;  %v6777_v27 = vld [vmem:[#allocation201_spill] sm:$0xff]  ;;  %v6784_v24 = vld [vmem:[#allocation18_spill] sm:$0xff] }
 0x130   :  { %v6778_v39 = vpack.c.bf16 %v6700_v30, %v6777_v27  ;;  %v6786_v36 = vld [vmem:[#allocation22_spill] sm:$0xff]  ;;  %v6788_v30 = vld [vmem:[#allocation212_spill] sm:$0xff] }
 0x131   :  { %3156 = vmatpush1.bf16.msra.mxu1 %v6767_v37  ;;  %v6779_v37 = vld [vmem:[#allocation13_spill] sm:$0xff]  ;;  %v6793_v50 = vld [vmem:[#allocation30_spill] sm:$0xff] }
 0x132   :  { %3540 = vmatpush1.bf16.msra.mxu0 %v6768_v62  ;;  %3158 = vmatprep.subr.bf16.mxu1 %v6771_v10  ;;  %v6781_v62 = vld [vmem:[#allocation207_spill] sm:$0xff]  ;;  %v6783_v10 = vld [vmem:[#allocation210_spill] sm:$0xff] }
 0x133   :  { %3542 = vmatprep.subr.bf16.mxu0 %v6774_v32  ;;  %v6785_v32 = vld [vmem:[#allocation211_spill] sm:$0xff]  ;;  %v6794_v21 = vld [vmem:[#allocation206_spill] sm:$0xff] }
 0x134   :  { %v6795_v33 = vand.u32 4294901760, %v6794_v21  ;;  %v6805_v21 = vld [vmem:[#allocation60_spill] sm:$0xff] }
 0x135   :  { %3160 = vmatpush1.bf16.msra.mxu1 %v6776_v28  ;;  %v6787_v28 = vld [vmem:[#allocation24_spill] sm:$0xff] }
 0x136   :  { %3544 = vmatpush1.bf16.msra.mxu0 %v6778_v39  ;;  %3162 = vmatprep.subr.bf16.mxu1 %v6779_v37  ;;  %v6789_v39 = vld [vmem:[#allocation27_spill] sm:$0xff]  ;;  %v6790_v37 = vld [vmem:[#allocation213_spill] sm:$0xff] }
 0x137   :  { %3546 = vmatprep.subr.bf16.mxu0 %v6780_v23  ;;  %v6791_v23 = vld [vmem:[#allocation205_spill] sm:$0xff] }
 0x138   :  { %950 = vmatmul.mubr.f32.vlgmr.msra.gmra.mrb[0].mxu1 %v6781_v62  ;;  %v6792_v27 = vand.u32 4294901760, %v6791_v23  ;;  %v6803_v23 = vld [vmem:[#allocation54_spill] sm:$0xff] }
 0x139   :  { %2296 = vmatmul.mubr.f32.vlgmr.msra.gmra.mrb[0].mxu0 %v6782_v6  ;;  %957 = vmatprep.mubr.f32.mxu1 %v6783_v10 }
 0x13a   :  { %3164 = vmatpush1.bf16.msra.mxu1 %v6784_v24  ;;  %2303 = vmatprep.mubr.f32.mxu0 %v6785_v32  ;;  %v6796_v24 = vld [vmem:[#allocation34_spill] sm:$0xff] }
 0x13b   :  { %3548 = vmatpush1.bf16.msra.mxu0 %v6786_v36  ;;  %3166 = vmatprep.subr.bf16.mxu1 %v6787_v28  ;;  %v6798_v36 = vld [vmem:[#allocation39_spill] sm:$0xff]  ;;  %v6799_v28 = vld [vmem:[#allocation42_spill] sm:$0xff] }
 0x13c   :  { %960 = vmatmul.mubr.f32.gmra.mrb[2].mxu1 %v6788_v30  ;;  %3550 = vmatprep.subr.bf16.mxu0 %v6789_v39  ;;  %v6801_v39 = vld [vmem:[#allocation48_spill] sm:$0xff] }
 0x13d   :  { %2306 = vmatmul.mubr.f32.gmra.mrb[2].mxu0 %v6790_v37  ;;  %1097 = vmatprep.mubr.f32.mxu1 %v6792_v27  ;;  %v6804_v27 = vld [vmem:[#allocation58_spill] sm:$0xff] }
 0x13e   :  { %3168 = vmatpush1.bf16.msra.mxu1 %v6793_v50  ;;  %2443 = vmatprep.mubr.f32.mxu0 %v6795_v33  ;;  %v6806_v33 = vld [vmem:[#allocation63_spill] sm:$0xff]  ;;  %v6852_v50 = vld [vmem:[#allocation14_spill] sm:$0xff] }
 0x13f   :  { %3552 = vmatpush1.bf16.msra.mxu0 %v6796_v24  ;;  %3170 = vmatprep.subr.bf16.mxu1 %v6797_v11  ;;  %v6807_v24 = vld [vmem:[#allocation66_spill] sm:$0xff] }
 0x140   :  { %3554 = vmatprep.subr.bf16.mxu0 %v6798_v36  ;;  %v6808_v11 = vld [vmem:[#allocation70_spill] sm:$0xff]  ;;  %v6809_v36 = vld [vmem:[#allocation72_spill] sm:$0xff] }
 0x142   :  { %3172 = vmatpush1.bf16.msra.mxu1 %v6799_v28  ;;  %v6810_v28 = vld [vmem:[#allocation75_spill] sm:$0xff] }
 0x143   :  { %3556 = vmatpush1.bf16.msra.mxu0 %v6800_v26  ;;  %3174 = vmatprep.subr.bf16.mxu1 %v6801_v39  ;;  %v6811_v26 = vld [vmem:[#allocation78_spill] sm:$0xff] }
 0x144   :  { %3558 = vmatprep.subr.bf16.mxu0 %v6802_v17  ;;  %v6812_v39 = vld [vmem:[#allocation82_spill] sm:$0xff]  ;;  %v6813_v17 = vld [vmem:[#allocation84_spill] sm:$0xff] }
 0x146   :  { %3176 = vmatpush1.bf16.msra.mxu1 %v6803_v23  ;;  %v6814_v23 = vld [vmem:[#allocation87_spill] sm:$0xff] }
 0x147   :  { %3560 = vmatpush1.bf16.msra.mxu0 %v6804_v27  ;;  %3178 = vmatprep.subr.bf16.mxu1 %v6805_v21  ;;  %v6815_v27 = vld [vmem:[#allocation90_spill] sm:$0xff] }
 0x148   :  { %3562 = vmatprep.subr.bf16.mxu0 %v6806_v33  ;;  %v6816_v21 = vld [vmem:[#allocation94_spill] sm:$0xff]  ;;  %v6817_v33 = vld [vmem:[#allocation96_spill] sm:$0xff] }
 0x14a   :  { %3180 = vmatpush1.bf16.msra.mxu1 %v6807_v24  ;;  %v6818_v24 = vld [vmem:[#allocation99_spill] sm:$0xff] }
 0x14b   :  { %3564 = vmatpush1.bf16.msra.mxu0 %v6808_v11  ;;  %3182 = vmatprep.subr.bf16.mxu1 %v6809_v36  ;;  %v6819_v11 = vld [vmem:[#allocation102_spill] sm:$0xff] }
 0x14c   :  { %3566 = vmatprep.subr.bf16.mxu0 %v6810_v28  ;;  %v6820_v36 = vld [vmem:[#allocation106_spill] sm:$0xff]  ;;  %v6821_v28 = vld [vmem:[#allocation108_spill] sm:$0xff] }
 0x14e   :  { %3184 = vmatpush1.bf16.msra.mxu1 %v6811_v26  ;;  %v6822_v26 = vld [vmem:[#allocation111_spill] sm:$0xff] }
 0x14f   :  { %3568 = vmatpush1.bf16.msra.mxu0 %v6812_v39  ;;  %3186 = vmatprep.subr.bf16.mxu1 %v6813_v17  ;;  %v6823_v39 = vld [vmem:[#allocation114_spill] sm:$0xff] }
 0x150   :  { %3570 = vmatprep.subr.bf16.mxu0 %v6814_v23  ;;  %v6824_v17 = vld [vmem:[#allocation118_spill] sm:$0xff]  ;;  %v6825_v23 = vld [vmem:[#allocation120_spill] sm:$0xff] }
 0x152   :  { %3188 = vmatpush1.bf16.msra.mxu1 %v6815_v27  ;;  %v6826_v27 = vld [vmem:[#allocation123_spill] sm:$0xff] }
 0x153   :  { %3572 = vmatpush1.bf16.msra.mxu0 %v6816_v21  ;;  %3190 = vmatprep.subr.bf16.mxu1 %v6817_v33  ;;  %v6827_v21 = vld [vmem:[#allocation126_spill] sm:$0xff] }
 0x154   :  { %3574 = vmatprep.subr.bf16.mxu0 %v6818_v24  ;;  %v6828_v33 = vld [vmem:[#allocation130_spill] sm:$0xff]  ;;  %v6829_v24 = vld [vmem:[#allocation132_spill] sm:$0xff] }
 0x156   :  { %3192 = vmatpush1.bf16.msra.mxu1 %v6819_v11  ;;  %v6830_v11 = vld [vmem:[#allocation135_spill] sm:$0xff] }
 0x157   :  { %3576 = vmatpush1.bf16.msra.mxu0 %v6820_v36  ;;  %3194 = vmatprep.subr.bf16.mxu1 %v6821_v28  ;;  %v6831_v36 = vld [vmem:[#allocation138_spill] sm:$0xff] }
 0x158   :  { %3578 = vmatprep.subr.bf16.mxu0 %v6822_v26  ;;  %v6832_v28 = vld [vmem:[#allocation142_spill] sm:$0xff]  ;;  %v6833_v26 = vld [vmem:[#allocation144_spill] sm:$0xff] }
 0x15a   :  { %3196 = vmatpush1.bf16.msra.mxu1 %v6823_v39  ;;  %v6834_v39 = vld [vmem:[#allocation147_spill] sm:$0xff] }
 0x15b   :  { %3580 = vmatpush1.bf16.msra.mxu0 %v6824_v17  ;;  %3198 = vmatprep.subr.bf16.mxu1 %v6825_v23  ;;  %v6835_v17 = vld [vmem:[#allocation150_spill] sm:$0xff] }
 0x15c   :  { %3582 = vmatprep.subr.bf16.mxu0 %v6826_v27  ;;  %v6836_v23 = vld [vmem:[#allocation154_spill] sm:$0xff]  ;;  %v6837_v27 = vld [vmem:[#allocation156_spill] sm:$0xff] }
 0x15e   :  { %3200 = vmatpush1.bf16.msra.mxu1 %v6827_v21  ;;  %v6838_v21 = vld [vmem:[#allocation159_spill] sm:$0xff] }
 0x15f   :  { %3584 = vmatpush1.bf16.msra.mxu0 %v6828_v33  ;;  %3202 = vmatprep.subr.bf16.mxu1 %v6829_v24  ;;  %v6839_v33 = vld [vmem:[#allocation162_spill] sm:$0xff] }
 0x160   :  { %3586 = vmatprep.subr.bf16.mxu0 %v6830_v11  ;;  %v6840_v24 = vld [vmem:[#allocation166_spill] sm:$0xff]  ;;  %v6841_v11 = vld [vmem:[#allocation168_spill] sm:$0xff] }
 0x162   :  { %3204 = vmatpush1.bf16.msra.mxu1 %v6831_v36  ;;  %v6842_v36 = vld [vmem:[#allocation171_spill] sm:$0xff] }
 0x163   :  { %3588 = vmatpush1.bf16.msra.mxu0 %v6832_v28  ;;  %3206 = vmatprep.subr.bf16.mxu1 %v6833_v26  ;;  %v6843_v28 = vld [vmem:[#allocation174_spill] sm:$0xff] }
 0x164   :  { %3590 = vmatprep.subr.bf16.mxu0 %v6834_v39  ;;  %v6844_v26 = vld [vmem:[#allocation178_spill] sm:$0xff]  ;;  %v6845_v39 = vld [vmem:[#allocation180_spill] sm:$0xff] }
 0x166   :  { %3208 = vmatpush1.bf16.msra.mxu1 %v6835_v17  ;;  %v6846_v17 = vld [vmem:[#allocation183_spill] sm:$0xff] }
 0x167   :  { %3592 = vmatpush1.bf16.msra.mxu0 %v6836_v23  ;;  %3210 = vmatprep.subr.bf16.mxu1 %v6837_v27  ;;  %v6847_v23 = vld [vmem:[#allocation186_spill] sm:$0xff] }
 0x168   :  { %3594 = vmatprep.subr.bf16.mxu0 %v6838_v21  ;;  %v6848_v27 = vld [vmem:[#allocation190_spill] sm:$0xff]  ;;  %v6849_v21 = vld [vmem:[#allocation192_spill] sm:$0xff] }
 0x16a   :  { %3212 = vmatpush1.bf16.msra.mxu1 %v6839_v33  ;;  %v6850_v33 = vld [vmem:[#allocation12_spill] sm:$0xff] }
 0x16b   :  { %3596 = vmatpush1.bf16.msra.mxu0 %v6840_v24  ;;  %3214 = vmatprep.subr.bf16.mxu1 %v6841_v11  ;;  %v6851_v24 = vand.u32 4294901760, %v6850_v33  ;;  %v6853_v11 = vand.u32 4294901760, %v6852_v50  ;;  %v6865_v50 = vld [vmem:[#allocation21_spill] sm:$0xff] }
 0x16c   :  { %3598 = vmatprep.subr.bf16.mxu0 %v6842_v36  ;;  %v6854_v36 = vld [vmem:[#allocation195_spill] sm:$0xff] }
 0x16d   :  { %v3225_v49 = vpack.c.bf16 %v6853_v11, %v6851_v24  ;;  %v6866_v11 = vand.u32 4294901760, %v6865_v50  ;;  %v6867_v24 = vld [vmem:[#allocation23_spill] sm:$0xff]  ;;  %v6883_v50 = vld [vmem:[#allocation32_spill] sm:$0xff] }
 0x16e   :  { %3216 = vmatpush1.bf16.msra.mxu1 %v6843_v28  ;;  %v6855_v28 = vld [vmem:[#allocation16_spill] sm:$0xff] }
 0x16f   :  { %3600 = vmatpush1.bf16.msra.mxu0 %v6844_v26  ;;  %3218 = vmatprep.subr.bf16.mxu1 %v6845_v39  ;;  %v6856_v7 = vand.u32 4294901760, %v6855_v28  ;;  %v6857_v26 = vld [vmem:[#allocation17_spill] sm:$0xff] }
 0x170   :  { %3602 = vmatprep.subr.bf16.mxu0 %v6846_v17  ;;  %v6858_v5 = vand.u32 4294901760, %v6857_v26  ;;  %v6860_v17 = vld [vmem:[#allocation202_spill] sm:$0xff]  ;;  %v6869_v28 = vld [vmem:[#allocation25_spill] sm:$0xff] }
 0x171   :  { %v6870_v31 = vand.u32 4294901760, %v6869_v28  ;;  %v6871_v26 = vld [vmem:[#allocation26_spill] sm:$0xff]  ;;  %v6889_v28 = vld [vmem:[#allocation37_spill] sm:$0xff] }
 0x172   :  { %3220 = vmatpush1.bf16.msra.mxu1 %v6847_v23  ;;  %v3609_v39 = vpack.c.bf16 %v6858_v5, %v6856_v7  ;;  %v6872_v5 = vand.u32 4294901760, %v6871_v26  ;;  %v6890_v26 = vand.u32 4294901760, %v6889_v28 }
 0x173   :  { %3604 = vmatpush1.bf16.msra.mxu0 %v6848_v27  ;;  %3222 = vmatprep.subr.bf16.mxu1 %v6849_v21  ;;  %v6861_v27 = vld [vmem:[#allocation19_spill] sm:$0xff]  ;;  %v6863_v21 = vld [vmem:[#allocation20_spill] sm:$0xff] }
 0x174   :  { %3606 = vmatprep.subr.bf16.mxu0 %v6854_v36  ;;  %v6862_v23 = vand.u32 4294901760, %v6861_v27  ;;  %v6864_v57 = vand.u32 4294901760, %v6863_v21  ;;  %v6868_v36 = vand.u32 4294901760, %v6867_v24  ;;  %v3229_v7 = vpack.c.bf16 %v6872_v5, %v6870_v31  ;;  %v6876_v27 = vld [vmem:[#allocation29_spill] sm:$0xff] }
 0x175   :  { %v6877_v15 = vand.u32 4294901760, %v6876_v27 }
 0x176   :  { %3224 = vmatpush1.bf16.msra.mxu1 %v6859_v25  ;;  %v3227_v33 = vpack.c.bf16 %v6864_v57, %v6862_v23  ;;  %v3611_v19 = vpack.c.bf16 %v6868_v36, %v6866_v11  ;;  %v6873_v25 = vand.u32 4294901760, %v6781_v62  ;;  %v6878_v57 = vand.u32 4294901760, %v6782_v6  ;;  %v6881_v23 = vld [vmem:[#allocation31_spill] sm:$0xff]  ;;  %v6885_v11 = vld [vmem:[#allocation33_spill] sm:$0xff] }
 0x177   :  { %3608 = vmatpush1.bf16.msra.mxu0 %v6860_v17  ;;  %3226 = vmatprep.subr.bf16.mxu1 %v3225_v49  ;;  %v6874_v49 = vld [vmem:[#allocation28_spill] sm:$0xff]  ;;  %v6880_v36 = vand.u32 4294901760, %v6785_v32  ;;  %v6882_v31 = vand.u32 4294901760, %v6881_v23  ;;  %v6884_v62 = vand.u32 4294901760, %v6883_v50  ;;  %v6886_v24 = vand.u32 4294901760, %v6885_v11 }
 0x178   :  { %3610 = vmatprep.subr.bf16.mxu0 %v3609_v39  ;;  %v6875_v17 = vand.u32 4294901760, %v6874_v49  ;;  %v6879_v39 = vand.u32 4294901760, %v6783_v10  ;;  %v6891_v10 = vld [vmem:[#allocation38_spill] sm:$0xff]  ;;  %v6893_v32 = vand.u32 4294901760, %v6788_v30  ;;  %v6894_v49 = vld [vmem:[#allocation40_spill] sm:$0xff]  ;;  %v6903_v30 = vld [vmem:[#allocation43_spill] sm:$0xff] }
 0x179   :  { %1101 = vmatmul.mubr.f32.vlgmr.msra.gmra.mrb[0].mxu1 %v6873_v25  ;;  %v3231_v25 = vpack.c.bf16 %v6884_v62, %v6882_v31  ;;  %v6892_v5 = vand.u32 4294901760, %v6891_v10  ;;  %v6895_v27 = vand.u32 4294901760, %v6894_v49  ;;  %v6905_v62 = vld [vmem:[#allocation44_spill] sm:$0xff]  ;;  %v6911_v10 = vld [vmem:[#allocation49_spill] sm:$0xff] }
 0x17a   :  { %v3613_v21 = vpack.c.bf16 %v6877_v15, %v6875_v17  ;;  %2447 = vmatmul.mubr.f32.vlgmr.msra.gmra.mrb[0].mxu0 %v6878_v57  ;;  %1109 = vmatprep.mubr.f32.mxu1 %v6879_v39  ;;  %v6887_v17 = vld [vmem:[#allocation35_spill] sm:$0xff]  ;;  %v6896_v57 = vld [vmem:[#allocation41_spill] sm:$0xff]  ;;  %v6906_v11 = vand.u32 4294901760, %v6905_v62 }
 0x17b   :  { %3228 = vmatpush1.bf16.msra.mxu1 %v3227_v33  ;;  %2455 = vmatprep.mubr.f32.mxu0 %v6880_v36  ;;  %v6888_v15 = vand.u32 4294901760, %v6887_v17  ;;  %v3233_v33 = vpack.c.bf16 %v6892_v5, %v6890_v26  ;;  %v6897_v39 = vand.u32 4294901760, %v6896_v57  ;;  %v6899_v36 = vmov 1.0  }
 0x17c   :  { %3612 = vmatpush1.bf16.msra.mxu0 %v3611_v19  ;;  %3230 = vmatprep.subr.bf16.mxu1 %v3229_v7  ;;  %v6898_v7 = vand.u32 4294901760, %v6790_v37  ;;  %v6907_v37 = vld [vmem:[#allocation45_spill] sm:$0xff]  ;;  %v6912_v5 = vand.u32 4294901760, %v6911_v10 }
 0x17d   :  { %v3615_v6 = vpack.c.bf16 %v6888_v15, %v6886_v24  ;;  %1113 = vmatmul.mubr.f32.gmra.mrb[2].mxu1 %v6893_v32  ;;  %3614 = vmatprep.subr.bf16.mxu0 %v3613_v21  ;;  %v3617_v19 = vpack.c.bf16 %v6897_v39, %v6895_v27  ;;  %v6904_v21 = vand.u32 4294901760, %v6903_v30  ;;  %v6908_v17 = vand.u32 4294901760, %v6907_v37  ;;  %v6909_v15 = vld [vmem:[#allocation47_spill] sm:$0xff]  ;;  %v6915_v27 = vld [vmem:[#allocation52_spill] sm:$0xff]  ;;  %v6917_v39 = vld [vmem:[#allocation53_spill] sm:$0xff] }
 0x17e   :  { %2459 = vmatmul.mubr.f32.gmra.mrb[2].mxu0 %v6898_v7  ;;  %2949 = vmatprep.mubr.msk.f32.mxu1 %vm40_vm1, %v6899_v36  ;;  %v6910_v28 = vand.u32 4294901760, %v6909_v15  ;;  %v6916_v57 = vand.u32 4294901760, %v6915_v27  ;;  %v6918_v7 = vand.u32 4294901760, %v6917_v39  ;;  %v6923_v37 = vld [vmem:[#allocation57_spill] sm:$0xff]  ;;  %v6925_v15 = vld [vmem:[#allocation59_spill] sm:$0xff] }
 0x17f   :  { %3232 = vmatpush1.bf16.msra.mxu1 %v3231_v25  ;;  %2961 = vmatprep.mubr.msk.f32.mxu0 %vm42_vm3, %v6899_v36  ;;  %v3235_v24 = vpack.c.bf16 %v6906_v11, %v6904_v21  ;;  %v6913_v25 = vld [vmem:[#allocation50_spill] sm:$0xff]  ;;  %v6919_v21 = vld [vmem:[#allocation55_spill] sm:$0xff]  ;;  %v6933_v39 = vld [vmem:[#allocation65_spill] sm:$0xff] }
 0x180   :  { %3616 = vmatpush1.bf16.msra.mxu0 %v3615_v6  ;;  %3234 = vmatprep.subr.bf16.mxu1 %v3233_v33  ;;  %v3619_v26 = vpack.c.bf16 %v6910_v28, %v6908_v17  ;;  %v6914_v32 = vand.u32 4294901760, %v6913_v25  ;;  %v3621_v30 = vpack.c.bf16 %v6918_v7, %v6916_v57  ;;  %v6920_v6 = vand.u32 4294901760, %v6919_v21  ;;  %v6921_v33 = vld [vmem:[#allocation56_spill] sm:$0xff]  ;;  %v6929_v25 = vld [vmem:[#allocation62_spill] sm:$0xff] }
 0x181   :  { %3618 = vmatprep.subr.bf16.mxu0 %v3617_v19  ;;  %v6922_v62 = vand.u32 4294901760, %v6921_v33  ;;  %v6924_v17 = vand.u32 4294901760, %v6923_v37  ;;  %v6926_v28 = vand.u32 4294901760, %v6925_v15  ;;  %v6931_v57 = vld [vmem:[#allocation64_spill] sm:$0xff]  ;;  %v6934_v7 = vand.u32 4294901760, %v6933_v39  ;;  %v6939_v37 = vld [vmem:[#allocation69_spill] sm:$0xff] }
 0x182   :  { %v3237_v49 = vpack.c.bf16 %v6914_v32, %v6912_v5  ;;  %v6927_v5 = vld [vmem:[#allocation61_spill] sm:$0xff]  ;;  %v6930_v32 = vand.u32 4294901760, %v6929_v25  ;;  %v6941_v15 = vld [vmem:[#allocation71_spill] sm:$0xff]  ;;  %v6945_v25 = vld [vmem:[#allocation74_spill] sm:$0xff] }
 0x183   :  { %3236 = vmatpush1.bf16.msra.mxu1 %v3235_v24  ;;  %v3239_v11 = vpack.c.bf16 %v6922_v62, %v6920_v6  ;;  %v3623_v10 = vpack.c.bf16 %v6926_v28, %v6924_v17  ;;  %v6928_v19 = vand.u32 4294901760, %v6927_v5  ;;  %v6932_v24 = vand.u32 4294901760, %v6931_v57  ;;  %v6935_v6 = vld [vmem:[#allocation67_spill] sm:$0xff]  ;;  %v6949_v39 = vld [vmem:[#allocation77_spill] sm:$0xff] }
 0x184   :  { %3620 = vmatpush1.bf16.msra.mxu0 %v3619_v26  ;;  %3238 = vmatprep.subr.bf16.mxu1 %v3237_v49  ;;  %v6936_v26 = vand.u32 4294901760, %v6935_v6  ;;  %v6937_v49 = vld [vmem:[#allocation68_spill] sm:$0xff]  ;;  %v6940_v17 = vand.u32 4294901760, %v6939_v37  ;;  %v6942_v28 = vand.u32 4294901760, %v6941_v15  ;;  %v6955_v37 = vld [vmem:[#allocation81_spill] sm:$0xff]  ;;  %v6957_v15 = vld [vmem:[#allocation83_spill] sm:$0xff] }
 0x185   :  { %v3241_v27 = vpack.c.bf16 %v6930_v32, %v6928_v19  ;;  %3622 = vmatprep.subr.bf16.mxu0 %v3621_v30  ;;  %v3625_v21 = vpack.c.bf16 %v6934_v7, %v6932_v24  ;;  %v6938_v33 = vand.u32 4294901760, %v6937_v49  ;;  %v6943_v19 = vld [vmem:[#allocation73_spill] sm:$0xff]  ;;  %v6946_v32 = vand.u32 4294901760, %v6945_v25  ;;  %v6947_v24 = vld [vmem:[#allocation76_spill] sm:$0xff]  ;;  %v6961_v25 = vld [vmem:[#allocation86_spill] sm:$0xff] }
 0x186   :  { %v3627_v5 = vpack.c.bf16 %v6942_v28, %v6940_v17  ;;  %v6944_v30 = vand.u32 4294901760, %v6943_v19  ;;  %v6950_v7 = vand.u32 4294901760, %v6949_v39  ;;  %v6956_v17 = vand.u32 4294901760, %v6955_v37  ;;  %v6965_v39 = vld [vmem:[#allocation89_spill] sm:$0xff] }
 0x187   :  { %3240 = vmatpush1.bf16.msra.mxu1 %v3239_v11  ;;  %v3243_v62 = vpack.c.bf16 %v6938_v33, %v6936_v26  ;;  %v6948_v11 = vand.u32 4294901760, %v6947_v24  ;;  %v6951_v26 = vld [vmem:[#allocation79_spill] sm:$0xff]  ;;  %v6958_v28 = vand.u32 4294901760, %v6957_v15  ;;  %v6971_v37 = vld [vmem:[#allocation93_spill] sm:$0xff] }
 0x188   :  { %3624 = vmatpush1.bf16.msra.mxu0 %v3623_v10  ;;  %3242 = vmatprep.subr.bf16.mxu1 %v3241_v27  ;;  %v3245_v57 = vpack.c.bf16 %v6946_v32, %v6944_v30  ;;  %v6952_v10 = vand.u32 4294901760, %v6951_v26  ;;  %v6953_v27 = vld [vmem:[#allocation80_spill] sm:$0xff]  ;;  %v6959_v30 = vld [vmem:[#allocation85_spill] sm:$0xff]  ;;  %v6962_v32 = vand.u32 4294901760, %v6961_v25  ;;  %v6973_v15 = vld [vmem:[#allocation95_spill] sm:$0xff] }
 0x189   :  { %3626 = vmatprep.subr.bf16.mxu0 %v3625_v21  ;;  %v3629_v6 = vpack.c.bf16 %v6950_v7, %v6948_v11  ;;  %v6954_v49 = vand.u32 4294901760, %v6953_v27  ;;  %v3631_v19 = vpack.c.bf16 %v6958_v28, %v6956_v17  ;;  %v6960_v21 = vand.u32 4294901760, %v6959_v30  ;;  %v6963_v11 = vld [vmem:[#allocation88_spill] sm:$0xff] }
 0x18a   :  { %v6966_v7 = vand.u32 4294901760, %v6965_v39  ;;  %v6972_v17 = vand.u32 4294901760, %v6971_v37  ;;  %v6974_v28 = vand.u32 4294901760, %v6973_v15  ;;  %v6997_v15 = vand.u32 4294901760, %v6594_v61 }
 0x18b   :  { %3244 = vmatpush1.bf16.msra.mxu1 %v3243_v62  ;;  %v3247_v33 = vpack.c.bf16 %v6954_v49, %v6952_v10  ;;  %v3249_v24 = vpack.c.bf16 %v6962_v32, %v6960_v21  ;;  %v6964_v62 = vand.u32 4294901760, %v6963_v11  ;;  %v6967_v10 = vld [vmem:[#allocation91_spill] sm:$0xff]  ;;  %v6976_v21 = vld [vmem:[#allocation98_spill] sm:$0xff]  ;;  %v6979_v11 = vand.u32 4294901760, %v6724_v44 }
 0x18c   :  { %3628 = vmatpush1.bf16.msra.mxu0 %v3627_v5  ;;  %3246 = vmatprep.subr.bf16.mxu1 %v3245_v57  ;;  %v6968_v5 = vand.u32 4294901760, %v6967_v10  ;;  %v6969_v57 = vld [vmem:[#allocation92_spill] sm:$0xff]  ;;  %v3635_v30 = vpack.c.bf16 %v6974_v28, %v6972_v17  ;;  %v6977_v25 = vand.u32 4294901760, %v6976_v21  ;;  %v6986_v44 = vand.u32 4294901760, %v6731_v8 }
 0x18d   :  { %3630 = vmatprep.subr.bf16.mxu0 %v3629_v6  ;;  %v3633_v26 = vpack.c.bf16 %v6966_v7, %v6964_v62  ;;  %v6970_v27 = vand.u32 4294901760, %v6969_v57  ;;  %v6975_v6 = vand.u32 4294901760, %v6721_v48  ;;  %v6982_v7 = vand.u32 4294901760, %v6727_v4 }
 0x18e   :  { %v6983_v48 = vand.u32 4294901760, %v6728_v34  ;;  %v6990_v34 = vand.u32 4294901760, %v6585_v29  ;;  %v6993_v8 = vand.u32 4294901760, %v6588_v58  ;;  %v7000_v28 = vand.u32 4294901760, %v6597_v3 }
 0x18f   :  { %3248 = vmatpush1.bf16.msra.mxu1 %v3247_v33  ;;  %v3251_v49 = vpack.c.bf16 %v6970_v27, %v6968_v5  ;;  %v3253_v32 = vpack.c.bf16 %v6977_v25, %v6975_v6  ;;  %v6978_v33 = vand.u32 4294901760, %v6723_v43  ;;  %v6985_v43 = vand.u32 4294901760, %v6730_v1 }
 0x190   :  { %3632 = vmatpush1.bf16.msra.mxu0 %v3631_v19  ;;  %3250 = vmatprep.subr.bf16.mxu1 %v3249_v24  ;;  %v6980_v19 = vand.u32 4294901760, %v6725_v45  ;;  %v6981_v24 = vand.u32 4294901760, %v6726_v60  ;;  %v3639_v10 = vpack.c.bf16 %v6983_v48, %v6982_v7  ;;  %v6987_v45 = vand.u32 4294901760, %v6732_v59 }
 0x191   :  { %3634 = vmatprep.subr.bf16.mxu0 %v3633_v26  ;;  %v3637_v62 = vpack.c.bf16 %v6979_v11, %v6978_v33  ;;  %v6984_v26 = vand.u32 4294901760, %v6729_v14  ;;  %v6988_v60 = vand.u32 4294901760, %v6583_v18  ;;  %v6989_v27 = vand.u32 4294901760, %v6584_v20 }
 0x192   :  { %v3255_v39 = vpack.c.bf16 %v6981_v24, %v6980_v19  ;;  %v3641_v57 = vpack.c.bf16 %v6987_v45, %v6986_v44  ;;  %v6991_v14 = vand.u32 4294901760, %v6586_v40  ;;  %v6994_v59 = vand.u32 4294901760, %v6589_v54  ;;  %v7017_v19 = vld [vmem:[#allocation157_spill] sm:$0xff] }
 0x193   :  { %3252 = vmatpush1.bf16.msra.mxu1 %v3251_v49  ;;  %v3257_v5 = vpack.c.bf16 %v6985_v43, %v6984_v26  ;;  %v3259_v4 = vpack.c.bf16 %v6989_v27, %v6988_v60  ;;  %v6992_v49 = vand.u32 4294901760, %v6587_v38  ;;  %v6995_v18 = vand.u32 4294901760, %v6592_v55  ;;  %v7029_v45 = vld [vmem:[#allocation165_spill] sm:$0xff]  ;;  %v7031_v60 = vld [vmem:[#allocation167_spill] sm:$0xff] }
 0x194   :  { %3636 = vmatpush1.bf16.msra.mxu0 %v3635_v30  ;;  %3254 = vmatprep.subr.bf16.mxu1 %v3253_v32  ;;  %v3643_v1 = vpack.c.bf16 %v6991_v14, %v6990_v34  ;;  %v6996_v20 = vand.u32 4294901760, %v6593_v41  ;;  %v6998_v40 = vand.u32 4294901760, %v6595_v53  ;;  %v6999_v38 = vand.u32 4294901760, %v6596_v12  ;;  %v7033_v34 = vld [vmem:[#allocation169_spill] sm:$0xff] }
 0x195   :  { %3638 = vmatprep.subr.bf16.mxu0 %v3637_v62  ;;  %v3261_v37 = vpack.c.bf16 %v6993_v8, %v6992_v49  ;;  %v3645_v17 = vpack.c.bf16 %v6995_v18, %v6994_v59  ;;  %v7001_v54 = vand.u32 4294901760, %v6598_v42  ;;  %v7002_v55 = vand.u32 4294901760, %v6599_v9  ;;  %v7039_v18 = vld [vmem:[#allocation173_spill] sm:$0xff] }
 0x196   :  { %v3263_v29 = vpack.c.bf16 %v6997_v15, %v6996_v20  ;;  %v3647_v58 = vpack.c.bf16 %v6999_v38, %v6998_v40  ;;  %v7003_v41 = vand.u32 4294901760, %v6601_v46  ;;  %v7004_v61 = vand.u32 4294901760, %v6602_v2  ;;  %v7041_v15 = vld [vmem:[#allocation175_spill] sm:$0xff]  ;;  %v7043_v40 = vld [vmem:[#allocation176_spill] sm:$0xff] }
 0x197   :  { %3256 = vmatpush1.bf16.msra.mxu1 %v3255_v39  ;;  %v3265_v30 = vpack.c.bf16 %v7001_v54, %v7000_v28  ;;  %v7005_v21 = vand.u32 4294901760, %v6674_v22  ;;  %v7006_v12 = vand.u32 4294901760, %v6675_v47  ;;  %v7007_v3 = vand.u32 4294901760, %v6676_v63  ;;  %v7019_v39 = vld [vmem:[#allocation158_spill] sm:$0xff]  ;;  %v7045_v28 = vld [vmem:[#allocation177_spill] sm:$0xff] }
 0x198   :  { %3640 = vmatpush1.bf16.msra.mxu0 %v3639_v10  ;;  %3258 = vmatprep.subr.bf16.mxu1 %v3257_v5  ;;  %v3649_v6 = vpack.c.bf16 %v7003_v41, %v7002_v55  ;;  %v7008_v25 = vand.u32 4294901760, %v6677_v52  ;;  %v7009_v9 = vand.u32 4294901760, %v6607_v35  ;;  %v7010_v46 = vand.u32 4294901760, %v6608_v51  ;;  %v7015_v52 = vld [vmem:[#allocation155_spill] sm:$0xff]  ;;  %v7023_v10 = vld [vmem:[#allocation161_spill] sm:$0xff]  ;;  %v7027_v5 = vld [vmem:[#allocation164_spill] sm:$0xff] }
 0x199   :  { %3642 = vmatprep.subr.bf16.mxu0 %v3641_v57  ;;  %v3267_v53 = vpack.c.bf16 %v7005_v21, %v7004_v61  ;;  %v3651_v42 = vpack.c.bf16 %v7007_v3, %v7006_v12  ;;  %v7011_v2 = vand.u32 4294901760, %v6609_v0  ;;  %v7012_v22 = vand.u32 4294901760, %v6678_v16  ;;  %v7021_v0 = vld [vmem:[#allocation160_spill] sm:$0xff]  ;;  %v7051_v21 = vld [vmem:[#allocation182_spill] sm:$0xff] }
 0x19a   :  { %v3269_v32 = vpack.c.bf16 %v7009_v9, %v7008_v25  ;;  %v7013_v11 = vand.u32 4294901760, %v6679_v56  ;;  %v7014_v63 = vand.u32 4294901760, %v6680_v13  ;;  %v7016_v62 = vand.u32 4294901760, %v7015_v52  ;;  %v7025_v56 = vld [vmem:[#allocation163_spill] sm:$0xff]  ;;  %v7053_v3 = vld [vmem:[#allocation184_spill] sm:$0xff]  ;;  %v7055_v25 = vld [vmem:[#allocation185_spill] sm:$0xff] }
 0x19b   :  { %3260 = vmatpush1.bf16.msra.mxu1 %v3259_v4  ;;  %v3653_v33 = vpack.c.bf16 %v7011_v2, %v7010_v46  ;;  %v7018_v24 = vand.u32 4294901760, %v7017_v19  ;;  %v7020_v51 = vand.u32 4294901760, %v7019_v39  ;;  %v7022_v48 = vand.u32 4294901760, %v7021_v0  ;;  %v7057_v46 = vld [vmem:[#allocation187_spill] sm:$0xff]  ;;  %v7065_v19 = vld [vmem:[#allocation193_spill] sm:$0xff]  ;;  %v7067_v39 = vld [vmem:[#allocation194_spill] sm:$0xff] }
 0x19c   :  { %3644 = vmatpush1.bf16.msra.mxu0 %v3643_v1  ;;  %3262 = vmatprep.subr.bf16.mxu1 %v3261_v37  ;;  %v3271_v47 = vpack.c.bf16 %v7013_v11, %v7012_v22  ;;  %v3655_v35 = vpack.c.bf16 %v7016_v62, %v7014_v63  ;;  %v7024_v16 = vand.u32 4294901760, %v7023_v10  ;;  %v7026_v43 = vand.u32 4294901760, %v7025_v56  ;;  %v7035_v1 = vld [vmem:[#allocation170_spill] sm:$0xff]  ;;  %v7037_v37 = vld [vmem:[#allocation172_spill] sm:$0xff]  ;;  %v7063_v52 = vld [vmem:[#allocation191_spill] sm:$0xff] }
 0x19d   :  { %3646 = vmatprep.subr.bf16.mxu0 %v3645_v17  ;;  %v3273_v7 = vpack.c.bf16 %v7020_v51, %v7018_v24  ;;  %v7028_v44 = vand.u32 4294901760, %v7027_v5  ;;  %v7030_v57 = vand.u32 4294901760, %v7029_v45  ;;  %v7032_v27 = vand.u32 4294901760, %v7031_v60  ;;  %v7069_v0 = vld [vmem:[#allocation196_spill] sm:$0xff]  ;;  %v7071_v10 = vld [vmem:[#allocation197_spill] sm:$0xff]  ;;  %v7073_v56 = vld [vmem:[#allocation199_spill] sm:$0xff] }
 0x19e   :  { %v3657_v26 = vpack.c.bf16 %v7024_v16, %v7022_v48  ;;  %v7034_v14 = vand.u32 4294901760, %v7033_v34  ;;  %v7036_v49 = vand.u32 4294901760, %v7035_v1  ;;  %v7038_v59 = vand.u32 4294901760, %v7037_v37  ;;  %v7075_v5 = vld [vmem:[#allocation200_spill] sm:$0xff]  ;;  %v7077_v45 = vld [vmem:[#allocation201_spill] sm:$0xff]  ;;  %v7079_v60 = vld [vmem:[#allocation203_spill] sm:$0xff] }
 0x19f   :  { %3264 = vmatpush1.bf16.msra.mxu1 %v3263_v29  ;;  %v3275_v13 = vpack.c.bf16 %v7028_v44, %v7026_v43  ;;  %v3659_v4 = vpack.c.bf16 %v7032_v27, %v7030_v57  ;;  %v7040_v17 = vand.u32 4294901760, %v7039_v18  ;;  %v7042_v29 = vand.u32 4294901760, %v7041_v15  ;;  %v7081_v34 = vld [vmem:[#allocation13_spill] sm:$0xff]  ;;  %v7086_v37 = vld [vmem:[#allocation18_spill] sm:$0xff]  ;;  %v7088_v18 = vld [vmem:[#allocation24_spill] sm:$0xff] }
 0x1a0   :  { %3648 = vmatpush1.bf16.msra.mxu0 %v3647_v58  ;;  %3266 = vmatprep.subr.bf16.mxu1 %v3265_v30  ;;  %v3277_v8 = vpack.c.bf16 %v7036_v49, %v7034_v14  ;;  %v7044_v38 = vand.u32 4294901760, %v7043_v40  ;;  %v7046_v54 = vand.u32 4294901760, %v7045_v28  ;;  %v7047_v30 = vld [vmem:[#allocation179_spill] sm:$0xff]  ;;  %v7056_v9 = vand.u32 4294901760, %v7055_v25  ;;  %v7091_v15 = vld [vmem:[#allocation34_spill] sm:$0xff]  ;;  %v7096_v28 = vld [vmem:[#allocation48_spill] sm:$0xff] }
 0x1a1   :  { %3650 = vmatprep.subr.bf16.mxu0 %v3649_v6  ;;  %v3661_v20 = vpack.c.bf16 %v7040_v17, %v7038_v59  ;;  %v7048_v55 = vand.u32 4294901760, %v7047_v30  ;;  %v7049_v6 = vld [vmem:[#allocation181_spill] sm:$0xff]  ;;  %v7058_v2 = vand.u32 4294901760, %v7057_v46  ;;  %v7064_v62 = vand.u32 4294901760, %v7063_v52  ;;  %v7082_v14 = vld [vmem:[#allocation15_spill] sm:$0xff]  ;;  %v7087_v59 = vld [vmem:[#allocation22_spill] sm:$0xff] }
 0x1a2   :  { %v3279_v58 = vpack.c.bf16 %v7044_v38, %v7042_v29  ;;  %v7050_v61 = vand.u32 4294901760, %v7049_v6  ;;  %v7066_v24 = vand.u32 4294901760, %v7065_v19  ;;  %v7068_v51 = vand.u32 4294901760, %v7067_v39  ;;  %v7089_v17 = vld [vmem:[#allocation27_spill] sm:$0xff]  ;;  %v7092_v29 = vld [vmem:[#allocation36_spill] sm:$0xff]  ;;  %v7094_v38 = vld [vmem:[#allocation42_spill] sm:$0xff] }
 0x1a3   :  { %3268 = vmatpush1.bf16.msra.mxu1 %v3267_v53  ;;  %v3663_v41 = vpack.c.bf16 %v7048_v55, %v7046_v54  ;;  %v7052_v53 = vand.u32 4294901760, %v7051_v21  ;;  %v7070_v48 = vand.u32 4294901760, %v7069_v0  ;;  %v7072_v16 = vand.u32 4294901760, %v7071_v10  ;;  %v7093_v40 = vld [vmem:[#allocation39_spill] sm:$0xff]  ;;  %v7098_v30 = vld [vmem:[#allocation54_spill] sm:$0xff]  ;;  %v7108_v25 = vld [vmem:[#allocation84_spill] sm:$0xff] }
 0x1a4   :  { %3652 = vmatpush1.bf16.msra.mxu0 %v3651_v42  ;;  %3270 = vmatprep.subr.bf16.mxu1 %v3269_v32  ;;  %v7054_v42 = vand.u32 4294901760, %v7053_v3  ;;  %v7074_v43 = vand.u32 4294901760, %v7073_v56  ;;  %v7076_v44 = vand.u32 4294901760, %v7075_v5  ;;  %v7078_v57 = vand.u32 4294901760, %v7077_v45  ;;  %v7097_v54 = vld [vmem:[#allocation51_spill] sm:$0xff]  ;;  %v7099_v55 = vld [vmem:[#allocation58_spill] sm:$0xff] }
 0x1a5   :  { %3654 = vmatprep.subr.bf16.mxu0 %v3653_v33  ;;  %v3281_v12 = vpack.c.bf16 %v7052_v53, %v7050_v61  ;;  %v7059_v33 = vld [vmem:[#allocation188_spill] sm:$0xff]  ;;  %v7080_v27 = vand.u32 4294901760, %v7079_v60  ;;  %v7101_v6 = vld [vmem:[#allocation63_spill] sm:$0xff]  ;;  %v7102_v61 = vld [vmem:[#allocation66_spill] sm:$0xff] }
 0x1a6   :  { %v3665_v32 = vpack.c.bf16 %v7056_v9, %v7054_v42  ;;  %v7060_v22 = vand.u32 4294901760, %v7059_v33  ;;  %v7103_v21 = vld [vmem:[#allocation70_spill] sm:$0xff]  ;;  %v7104_v53 = vld [vmem:[#allocation72_spill] sm:$0xff]  ;;  %v7109_v9 = vld [vmem:[#allocation87_spill] sm:$0xff] }
 0x1a7   :  { %3272 = vmatpush1.bf16.msra.mxu1 %v3271_v47  ;;  %v7061_v47 = vld [vmem:[#allocation189_spill] sm:$0xff]  ;;  %v7106_v3 = vld [vmem:[#allocation78_spill] sm:$0xff]  ;;  %v7113_v33 = vld [vmem:[#allocation99_spill] sm:$0xff] }
 0x1a8   :  { %3656 = vmatpush1.bf16.msra.mxu0 %v3655_v35  ;;  %3274 = vmatprep.subr.bf16.mxu1 %v3273_v7  ;;  %v3283_v11 = vpack.c.bf16 %v7060_v22, %v7058_v2  ;;  %v7062_v63 = vand.u32 4294901760, %v7061_v47  ;;  %v3285_v7 = vpack.c.bf16 %v7068_v51, %v7066_v24  ;;  %v7107_v42 = vld [vmem:[#allocation82_spill] sm:$0xff]  ;;  %v7112_v2 = vld [vmem:[#allocation96_spill] sm:$0xff]  ;;  %v7121_v19 = vld [vmem:[#allocation123_spill] sm:$0xff] }
 0x1a9   :  { %3658 = vmatprep.subr.bf16.mxu0 %v3657_v26  ;;  %v3669_v26 = vpack.c.bf16 %v7072_v16, %v7070_v48  ;;  %v7111_v46 = vld [vmem:[#allocation94_spill] sm:$0xff]  ;;  %v7116_v47 = vld [vmem:[#allocation108_spill] sm:$0xff]  ;;  %v7129_v16 = vld [vmem:[#allocation147_spill] sm:$0xff] }
 0x1aa   :  { %v3667_v35 = vpack.c.bf16 %v7064_v62, %v7062_v63  ;;  %v7114_v22 = vld [vmem:[#allocation102_spill] sm:$0xff]  ;;  %v7117_v63 = vld [vmem:[#allocation111_spill] sm:$0xff]  ;;  %v7124_v51 = vld [vmem:[#allocation132_spill] sm:$0xff] }
 0x1ab   :  { %3276 = vmatpush1.bf16.msra.mxu1 %v3275_v13  ;;  %v3287_v13 = vpack.c.bf16 %v7076_v44, %v7074_v43  ;;  %v7118_v52 = vld [vmem:[#allocation114_spill] sm:$0xff]  ;;  %v7128_v10 = vld [vmem:[#allocation144_spill] sm:$0xff]  ;;  %v7133_v5 = vld [vmem:[#allocation159_spill] sm:$0xff] }
 0x1ac   :  { %3660 = vmatpush1.bf16.msra.mxu0 %v3659_v4  ;;  %3278 = vmatprep.subr.bf16.mxu1 %v3277_v8  ;;  %v3671_v4 = vpack.c.bf16 %v7080_v27, %v7078_v57  ;;  %v7119_v62 = vld [vmem:[#allocation118_spill] sm:$0xff]  ;;  %v7132_v43 = vld [vmem:[#allocation156_spill] sm:$0xff]  ;;  %v7137_v57 = vld [vmem:[#allocation171_spill] sm:$0xff] }
 0x1ad   :  { %3662 = vmatprep.subr.bf16.mxu0 %v3661_v20  ;;  %v7090_v20 = vld [vmem:[#allocation30_spill] sm:$0xff]  ;;  %v7136_v45 = vld [vmem:[#allocation168_spill] sm:$0xff] }
 0x1ae   :  { %v7122_v24 = vld [vmem:[#allocation126_spill] sm:$0xff] }
 0x1af   :  { %3280 = vmatpush1.bf16.msra.mxu1 %v3279_v58  ;;  %v7095_v58 = vld [vmem:[#allocation46_spill] sm:$0xff] }
 0x1b0   :  { %3664 = vmatpush1.bf16.msra.mxu0 %v3663_v41  ;;  %3282 = vmatprep.subr.bf16.mxu1 %v3281_v12  ;;  %v7100_v41 = vld [vmem:[#allocation60_spill] sm:$0xff]  ;;  %v7105_v12 = vld [vmem:[#allocation75_spill] sm:$0xff]  ;;  %v7123_v39 = vld [vmem:[#allocation130_spill] sm:$0xff] }
 0x1b1   :  { %3666 = vmatprep.subr.bf16.mxu0 %v3665_v32  ;;  %v7110_v32 = vld [vmem:[#allocation90_spill] sm:$0xff] }
 0x1b2   :  { %v7126_v0 = vld [vmem:[#allocation138_spill] sm:$0xff] }
 0x1b3   :  { %3284 = vmatpush1.bf16.msra.mxu1 %v3283_v11  ;;  %v7115_v11 = vld [vmem:[#allocation106_spill] sm:$0xff] }
 0x1b4   :  { %3668 = vmatpush1.bf16.msra.mxu0 %v3667_v35  ;;  %3286 = vmatprep.subr.bf16.mxu1 %v3285_v7  ;;  %v7120_v35 = vld [vmem:[#allocation120_spill] sm:$0xff]  ;;  %v7125_v7 = vld [vmem:[#allocation135_spill] sm:$0xff]  ;;  %v7127_v48 = vld [vmem:[#allocation142_spill] sm:$0xff] }
 0x1b5   :  { %3670 = vmatprep.subr.bf16.mxu0 %v3669_v26  ;;  %v7130_v26 = vld [vmem:[#allocation150_spill] sm:$0xff] }
 0x1b6   :  { %v7131_v56 = vld [vmem:[#allocation154_spill] sm:$0xff] }
 0x1b7   :  { %3288 = vmatpush1.bf16.msra.mxu1 %v3287_v13  ;;  %v7134_v44 = vld [vmem:[#allocation162_spill] sm:$0xff] }
 0x1b8   :  { %3672 = vmatpush1.bf16.msra.mxu0 %v3671_v4  ;;  %3290 = vmatprep.subr.bf16.mxu1 %v7081_v34  ;;  %v7135_v13 = vld [vmem:[#allocation166_spill] sm:$0xff]  ;;  %v7140_v4 = vld [vmem:[#allocation180_spill] sm:$0xff]  ;;  %v7141_v34 = vld [vmem:[#allocation183_spill] sm:$0xff] }
 0x1b9   :  { %3674 = vmatprep.subr.bf16.mxu0 %v7082_v14  ;;  %v7138_v60 = vld [vmem:[#allocation174_spill] sm:$0xff] }
 0x1ba   :  { %2950 = vmatmul.mubr.msk.f32.vlgmr.msra.gmra.mrb[0].mxu1 %vm39_vm0, %v6899_v36  ;;  %v7139_v27 = vld [vmem:[#allocation178_spill] sm:$0xff] }
 0x1bb   :  { %2962 = vmatmul.mubr.msk.f32.vlgmr.msra.gmra.mrb[0].mxu0 %vm41_vm2, %v6899_v36  ;;  %2951 = vmatprep.mubr.msk.f32.mxu1 %vm44_vm5, %v6899_v36  ;;  %v7142_v14 = vld [vmem:[#allocation186_spill] sm:$0xff] }
 0x1bc   :  { %3292 = vmatpush1.bf16.msra.mxu1 %v7086_v37  ;;  %2963 = vmatprep.mubr.msk.f32.mxu0 %vm46_vm7, %v6899_v36  ;;  %v7143_v37 = vld [vmem:[#allocation190_spill] sm:$0xff] }
 0x1bd   :  { %3676 = vmatpush1.bf16.msra.mxu0 %v7087_v59  ;;  %3294 = vmatprep.subr.bf16.mxu1 %v7088_v18  ;;  %v7144_v59 = vld [vmem:[#allocation192_spill] sm:$0xff]  ;;  %v7145_v18 = vld [vmem:[#allocation195_spill] sm:$0xff] }
 0x1be   :  { %2952 = vmatmul.mubr.msk.f32.gmra.mrb[2].mxu1 %vm43_vm4, %v6899_v36  ;;  %3678 = vmatprep.subr.bf16.mxu0 %v7089_v17  ;;  %v7146_v17 = vld [vmem:[#allocation198_spill] sm:$0xff] }
 0x1bf   :  { %2964 = vmatmul.mubr.msk.f32.gmra.mrb[2].mxu0 %vm45_vm6, %v6899_v36  ;;  %2953 = vmatprep.mubr.msk.f32.mxu1 %vm40_vm1, %v6899_v36 }
 0x1c0   :  { %3296 = vmatpush1.bf16.msra.mxu1 %v7090_v20  ;;  %2965 = vmatprep.mubr.msk.f32.mxu0 %vm42_vm3, %v6899_v36  ;;  %v7147_v20 = vld [vmem:[#allocation202_spill] sm:$0xff] }
 0x1c1   :  { %3680 = vmatpush1.bf16.msra.mxu0 %v7091_v15  ;;  %3298 = vmatprep.subr.bf16.mxu1 %v7092_v29 }
 0x1c2   :  { %3682 = vmatprep.subr.bf16.mxu0 %v7093_v40 }
 0x1c4   :  { %3300 = vmatpush1.bf16.msra.mxu1 %v7094_v38 }
 0x1c5   :  { %3684 = vmatpush1.bf16.msra.mxu0 %v7095_v58  ;;  %3302 = vmatprep.subr.bf16.mxu1 %v7096_v28 }
 0x1c6   :  { %3686 = vmatprep.subr.bf16.mxu0 %v7097_v54 }
 0x1c8   :  { %3304 = vmatpush1.bf16.msra.mxu1 %v7098_v30 }
 0x1c9   :  { %3688 = vmatpush1.bf16.msra.mxu0 %v7099_v55  ;;  %3306 = vmatprep.subr.bf16.mxu1 %v7100_v41 }
 0x1ca   :  { %3690 = vmatprep.subr.bf16.mxu0 %v7101_v6 }
 0x1cc   :  { %3308 = vmatpush1.bf16.msra.mxu1 %v7102_v61 }
 0x1cd   :  { %3692 = vmatpush1.bf16.msra.mxu0 %v7103_v21  ;;  %3310 = vmatprep.subr.bf16.mxu1 %v7104_v53 }
 0x1ce   :  { %3694 = vmatprep.subr.bf16.mxu0 %v7105_v12 }
 0x1d0   :  { %3312 = vmatpush1.bf16.msra.mxu1 %v7106_v3 }
 0x1d1   :  { %3696 = vmatpush1.bf16.msra.mxu0 %v7107_v42  ;;  %3314 = vmatprep.subr.bf16.mxu1 %v7108_v25 }
 0x1d2   :  { %3698 = vmatprep.subr.bf16.mxu0 %v7109_v9 }
 0x1d4   :  { %3316 = vmatpush1.bf16.msra.mxu1 %v7110_v32 }
 0x1d5   :  { %3700 = vmatpush1.bf16.msra.mxu0 %v7111_v46  ;;  %3318 = vmatprep.subr.bf16.mxu1 %v7112_v2 }
 0x1d6   :  { %3702 = vmatprep.subr.bf16.mxu0 %v7113_v33 }
 0x1d8   :  { %3320 = vmatpush1.bf16.msra.mxu1 %v7114_v22 }
 0x1d9   :  { %3704 = vmatpush1.bf16.msra.mxu0 %v7115_v11  ;;  %3322 = vmatprep.subr.bf16.mxu1 %v7116_v47 }
 0x1da   :  { %3706 = vmatprep.subr.bf16.mxu0 %v7117_v63 }
 0x1dc   :  { %3324 = vmatpush1.bf16.msra.mxu1 %v7118_v52 }
 0x1dd   :  { %3708 = vmatpush1.bf16.msra.mxu0 %v7119_v62  ;;  %3326 = vmatprep.subr.bf16.mxu1 %v7120_v35 }
 0x1de   :  { %3710 = vmatprep.subr.bf16.mxu0 %v7121_v19 }
 0x1e0   :  { %3328 = vmatpush1.bf16.msra.mxu1 %v7122_v24 }
 0x1e1   :  { %3712 = vmatpush1.bf16.msra.mxu0 %v7123_v39  ;;  %3330 = vmatprep.subr.bf16.mxu1 %v7124_v51 }
 0x1e2   :  { %3714 = vmatprep.subr.bf16.mxu0 %v7125_v7 }
 0x1e4   :  { %3332 = vmatpush1.bf16.msra.mxu1 %v7126_v0 }
 0x1e5   :  { %3716 = vmatpush1.bf16.msra.mxu0 %v7127_v48  ;;  %3334 = vmatprep.subr.bf16.mxu1 %v7128_v10 }
 0x1e6   :  { %3718 = vmatprep.subr.bf16.mxu0 %v7129_v16 }
 0x1e8   :  { %3336 = vmatpush1.bf16.msra.mxu1 %v7130_v26 }
 0x1e9   :  { %3720 = vmatpush1.bf16.msra.mxu0 %v7131_v56  ;;  %3338 = vmatprep.subr.bf16.mxu1 %v7132_v43 }
 0x1ea   :  { %3722 = vmatprep.subr.bf16.mxu0 %v7133_v5 }
 0x1ec   :  { %3340 = vmatpush1.bf16.msra.mxu1 %v7134_v44 }
 0x1ed   :  { %3724 = vmatpush1.bf16.msra.mxu0 %v7135_v13  ;;  %3342 = vmatprep.subr.bf16.mxu1 %v7136_v45 }
 0x1ee   :  { %3726 = vmatprep.subr.bf16.mxu0 %v7137_v57 }
 0x1f0   :  { %3344 = vmatpush1.bf16.msra.mxu1 %v7138_v60 }
 0x1f1   :  { %3728 = vmatpush1.bf16.msra.mxu0 %v7139_v27  ;;  %3346 = vmatprep.subr.bf16.mxu1 %v7140_v4 }
 0x1f2   :  { %3730 = vmatprep.subr.bf16.mxu0 %v7141_v34 }
 0x1f4   :  { %3348 = vmatpush1.bf16.msra.mxu1 %v7142_v14 }
 0x1f5   :  { %3732 = vmatpush1.bf16.msra.mxu0 %v7143_v37  ;;  %3350 = vmatprep.subr.bf16.mxu1 %v7144_v59 }
 0x1f6   :  { %3734 = vmatprep.subr.bf16.mxu0 %v7145_v18 }
 0x1f8   :  { %3352 = vmatpush1.bf16.msra.mxu1 %v7146_v17 }
 0x1f9   :  { %3736 = vmatpush1.bf16.msra.mxu0 %v7147_v20 }
 0x1fb   :  { %2954 = vmatmul.mubr.msk.f32.vlgmr.msra.gmra.mrb[0].mxu1 %vm39_vm0, %v6899_v36 }
 0x1fc   :  { %2966 = vmatmul.mubr.msk.f32.vlgmr.msra.gmra.mrb[0].mxu0 %vm41_vm2, %v6899_v36  ;;  %2955 = vmatprep.mubr.msk.f32.mxu1 %vm44_vm5, %v6899_v36 }
 0x1fd   :  { %2967 = vmatprep.mubr.msk.f32.mxu0 %vm46_vm7, %v6899_v36 }
 0x1ff   :  { %2956 = vmatmul.mubr.msk.f32.gmra.mrb[2].mxu1 %vm43_vm4, %v6899_v36 }
 0x200   :  { %2968 = vmatmul.mubr.msk.f32.gmra.mrb[2].mxu0 %vm45_vm6, %v6899_v36 }
 0x2ce   :  { %v1524_v23 = vpop.f32.mrb[0].mxu1 }
 0x2cf   :  { %v2870_v15 = vpop.f32.mrb[0].mxu0  ;;  %v1526_v29 = vpop.f32.mrb[1].mxu1 }
 0x2d0   :  { %v3737_v31 = vadd.f32 %v2870_v15, %v1524_v23  ;;  %v2872_v40 = vpop.f32.mrb[1].mxu0 }
 0x2d1   :  { %v3738_v38 = vadd.f32 %v2872_v40, %v1526_v29 }
 0x2d2   :  { %v1532_v58 = vpop.f32.mrb[2].mxu1 }
 0x2d3   :  { %v2878_v28 = vpop.f32.mrb[2].mxu0  ;;  %v1534_v50 = vpop.f32.mrb[3].mxu1  ;;  %v2883_v54 = vadd.f32 %v3738_v38, %v3737_v31 }
 0x2d4   :  { %v3739_v30 = vadd.f32 %v2878_v28, %v1532_v58  ;;  %v2880_v55 = vpop.f32.mrb[3].mxu0 }
 0x2d5   :  { %v3740_v41 = vadd.f32 %v2880_v55, %v1534_v50  ;;  %2884 = vadd.xlane.f32.xlu1 %v2883_v54 }
 0x2d7   :  { %v2886_v1 = vadd.f32 %v3740_v41, %v3739_v30 }
 0x2d9   :  { %2887 = vadd.xlane.f32.xlu1 %v2886_v1 }
 0x362   :  { %v2885_v6 = vpop.xlane.xlu1 %2884 }
 0x363   :  { %v2890_v61 = vmul.f32 0.00390625, %v2885_v6 }
 0x365   :  { %v2892_v49 = vsub.f32 %v3737_v31, %v2890_v61  ;;  %v2893_v36 = vsub.f32 %v3738_v38, %v2890_v61 }
 0x366   :  { %v2888_v8 = vpop.xlane.xlu1 %2887 }
 0x367   :  { %v2891_v21 = vmul.f32 0.00390625, %v2888_v8  ;;  %v2896_v53 = vmul.f32 %v2892_v49, %v2892_v49  ;;  %v2897_v12 = vmul.f32 %v2893_v36, %v2893_v36 }
 0x369   :  { %v2894_v3 = vsub.f32 %v3739_v30, %v2891_v21  ;;  %v2895_v42 = vsub.f32 %v3740_v41, %v2891_v21  ;;  %v2900_v25 = vadd.f32 %v2897_v12, %v2896_v53 }
 0x36b   :  { %2901 = vadd.xlane.f32.xlu0 %v2900_v25  ;;  %v2898_v9 = vmul.f32 %v2894_v3, %v2894_v3  ;;  %v2899_v32 = vmul.f32 %v2895_v42, %v2895_v42 }
 0x36d   :  { %v2903_v46 = vadd.f32 %v2899_v32, %v2898_v9 }
 0x36f   :  { %2904 = vadd.xlane.f32.xlu1 %v2903_v46 }
 0x3f8   :  { %v2902_v2 = vpop.xlane.xlu0 %2901 }
 0x3f9   :  { %v2906_v33 = vmul.f32 0.00390625, %v2902_v2 }
 0x3fb   :  { %v2908_v22 = vadd.f32 1e-07, %v2906_v33 }
 0x3fc   :  { %v2905_v11 = vpop.xlane.xlu1 %2904 }
 0x3fd   :  { %3789 = vrsqrt.f32 %v2908_v22  ;;  %v2907_v47 = vmul.f32 0.00390625, %v2905_v11 }
 0x3ff   :  { %v2909_v63 = vadd.f32 1e-07, %v2907_v47 }
 0x401   :  { %3791 = vrsqrt.f32 %v2909_v63 }
 0x407   :  { %v3790_v52 = vpop.eup %3789 }
 0x408   :  { %v2912_v62 = vmul.f32 %v3790_v52, %v2892_v49  ;;  %v2913_v35 = vmul.f32 %v3790_v52, %v2893_v36 }
 0x40a   :  { %2916 = vst [vmem:[#allocation5] sm:$0xff] %v2912_v62  ;;  %2917 = vst [vmem:[#allocation5 + $0x8] sm:$0xff] %v2913_v35 }
 0x40b   :  { %v3792_v19 = vpop.eup %3791 }
 0x40c   :  { %v2914_v24 = vmul.f32 %v3792_v19, %v2894_v3  ;;  %v2915_v39 = vmul.f32 %v3792_v19, %v2895_v42 }
 0x40e   :  { %2918 = vst [vmem:[#allocation5 + $0x10] sm:$0xff] %v2914_v24  ;;  %2919 = vst [vmem:[#allocation5 + $0x18] sm:$0xff] %v2915_v39 }
 0x40f   :  { %3826 = shalt.err (!%p3823_p12)
}
 0x410   :  { %s3827_s30 = scalar_lea.hbm %s5797_s2, 512 }
 0x411   :  { %p3828_p13 = scmp.ne.s32.totalorder %s5797_s2, %s3827_s30  ;;  %p3831_p0 = scmp.lt.u32.totalorder %s3827_s30, %s5797_s2 }
 0x413   :  { %p3833_p1 = pnand %p3831_p0, %p3828_p13 }
 0x415   :  { %3836 = shalt.err (!%p3833_p1)
}
 0x416   :  { %2931 = dma.vmem_to_hbm [thread:$0]  %s2926_s1, 512, %s5797_s2, [#allocation4], %s3842_s19, %s3842_s19, %s3843_s20  }
 0x417   :  { %3839 = dma.done.wait [#allocation4], 512  }
 0x418   :  { %3840 = vsyncadd [#allocation4], 4294966784 }
 0x419   :  { %2935 = vsyncpa [#allocation3], 1 }
 0x41a   :  { %2936 = vsyncpa [#allocation4], 1 }

</bundles_post_ra>
